<compile_context>
chip_gen: v7x
topology: tpu7x:2x2x1
jax: 0.10.0
libtpu: 0.0.40
codegen_flags: <defaults>
</compile_context>

<pallas_src>
import functools

import jax
import jax.numpy as jnp
from jax.experimental import pallas as pl
from jax.experimental.pallas import tpu as pltpu

# ----------------------------------------------------------------------------
# Static sizes (lane-padded where needed)
# ----------------------------------------------------------------------------
C_STEM_REAL = 24            # EfficientNetV2-M stem output channels
C_STEM = 128                # padded to a full lane width
C_HEAD = 1280               # backbone head channels
N_CLASSES = 20              # MyModel.linear output
C_OUT = 128                 # padded classifier output (sliced to 20 outside)
K_REAL = 3 * 3 * 3          # im2col contraction: 3x3 kernel, 3 input channels
K_PAD = 32                  # padded contraction length


def _tuning_for_device():
    """Generation-conditional knobs: epilogue dtype, head chunk, max tile."""
    try:
        kind = jax.devices()[0].device_kind.lower()
    except Exception:
        kind = ""
    # v5e / v5p / v4 / older: no bf16 VPU/EUP -> keep f32 epilogue, smaller tile.
    if any(t in kind for t in ("v2", "v3", "v4", "v5")):
        return dict(epi_dtype=jnp.float32, chunk=128, tile_s_max=1024)
    # v6e / v7x: bf16-capable EUP/VPU -> bf16 SiLU epilogue, bigger tile.
    return dict(epi_dtype=jnp.bfloat16, chunk=256, tile_s_max=2048)


# ----------------------------------------------------------------------------
# Fused Pallas kernel: stem matmul -> head 1x1 (chunked) -> GAP -> classifier
# ----------------------------------------------------------------------------
def _fused_kernel(cols_ref, ws_ref, bs_ref, wh_ref, bh_ref, wc_ref, bc_ref,
                  o_ref, acc_ref, *, inv_s, num_pad, chunk, epi_dtype):
    s_idx = pl.program_id(1)
    n_chunks = C_HEAD // chunk

    @pl.when(s_idx == 0)
    def _():
        acc_ref[...] = jnp.zeros_like(acc_ref)

    # --- stem: Conv2d(3->24, 3x3, s=2, p=1) + BN (folded) + SiLU, as matmul
    x = cols_ref[0]                                            # (tile_s, K_PAD) bf16
    stem = jnp.dot(x, ws_ref[...], preferred_element_type=jnp.float32)
    stem = (stem + bs_ref[...]).astype(epi_dtype)
    stem = stem * jax.nn.sigmoid(stem)                         # SiLU (EUP)
    stem = stem.astype(jnp.bfloat16)                           # MXU operand

    # --- head 1x1 conv (24->1280) + BN (folded) + SiLU + column-sum, chunked
    #     over output channels so the live intermediate is (tile_s, chunk).
    for c in range(n_chunks):
        lo, hi = c * chunk, (c + 1) * chunk
        h = jnp.dot(stem, wh_ref[:, lo:hi], preferred_element_type=jnp.float32)
        h = (h + bh_ref[:, lo:hi]).astype(epi_dtype)
        h = h * jax.nn.sigmoid(h)                              # SiLU
        # global average pool: spatial sum accumulated in f32 VMEM scratch
        acc_ref[:, lo:hi] += jnp.sum(h, axis=0, keepdims=True,
                                     dtype=jnp.float32)

    # --- last spatial step: correct for pad rows, finish GAP, classify
    @pl.when(s_idx == pl.num_programs(1) - 1)
    def _():
        acc = acc_ref[...]                                     # (1, C_HEAD) f32
        if num_pad > 0:
            # Padded cols rows are exactly zero, so each contributes the
            # constant silu(silu(bs) @ Wh + bh) to the GAP sum; subtract it
            # once here instead of masking every step.
            ps = bs_ref[...].astype(epi_dtype)
            ps = (ps * jax.nn.sigmoid(ps)).astype(jnp.bfloat16)
            ph = jnp.dot(ps, wh_ref[...], preferred_element_type=jnp.float32)
            ph = (ph + bh_ref[...]).astype(epi_dtype)
            ph = ph * jax.nn.sigmoid(ph)
            acc = acc - float(num_pad) * ph.astype(jnp.float32)
        pooled = (acc * inv_s).astype(jnp.bfloat16)            # (1, C_HEAD)
        logits = jnp.dot(pooled, wc_ref[...],
                         preferred_element_type=jnp.float32)
        o_ref[...] = (logits + bc_ref[...]).reshape(o_ref.shape)


def fused_backbone_classifier(cols, ws, bs, wh, bh, wc, bc, *,
                              s_valid, tile_s, chunk, epi_dtype):
    """cols: [N, S_pad, K_PAD] bf16 -> [N, 20] f32 (whole model in one kernel)."""
    N, s_pad, k_pad = cols.shape
    n_s = s_pad // tile_s
    num_pad = s_pad - s_valid
    kernel = functools.partial(
        _fused_kernel, inv_s=1.0 / float(s_valid), num_pad=num_pad,
        chunk=chunk, epi_dtype=epi_dtype)

    # TODO(synk): for batch-1 serving on v7x, split the spatial axis across
    # the two TensorCores (per-core partial GAP + tiny combine) instead of
    # relying on the batch axis for megacore parallelism.
    out = pl.pallas_call(
        kernel,
        out_shape=jax.ShapeDtypeStruct((N, 1, C_OUT), jnp.float32),
        grid_spec=pltpu.PrefetchScalarGridSpec(
            num_scalar_prefetch=0,
            grid=(N, n_s),
            in_specs=[
                pl.BlockSpec((1, tile_s, k_pad), lambda n, s: (n, s, 0)),   # cols
                pl.BlockSpec((K_PAD, C_STEM), lambda n, s: (0, 0)),         # Ws
                pl.BlockSpec((1, C_STEM), lambda n, s: (0, 0)),             # bs
                pl.BlockSpec((C_STEM, C_HEAD), lambda n, s: (0, 0)),        # Wh
                pl.BlockSpec((1, C_HEAD), lambda n, s: (0, 0)),             # bh
                pl.BlockSpec((C_HEAD, C_OUT), lambda n, s: (0, 0)),         # Wc
                pl.BlockSpec((1, C_OUT), lambda n, s: (0, 0)),              # bc
            ],
            out_specs=pl.BlockSpec((1, 1, C_OUT), lambda n, s: (n, 0, 0)),
            scratch_shapes=[pltpu.VMEM((1, C_HEAD), jnp.float32)],
        ),
        compiler_params=pltpu.CompilerParams(
            dimension_semantics=("parallel", "arbitrary"),
            vmem_limit_bytes=32 * 1024 * 1024),
    )(cols, ws, bs, wh, bh, wc, bc)

    return out.reshape(N, C_OUT)[:, :N_CLASSES]


# ----------------------------------------------------------------------------
# JAX glue: im2col (bf16, pad fused), BN folding, parameter construction
# ----------------------------------------------------------------------------
def im2col_padded(x_nhwc, k, stride, pad, k_pad):
    """Extract kxk patches -> [N, OH*OW, k_pad] in the input dtype.
    Patch order: di, dj, cin; the K padding (zeros) is fused into the concat."""
    N, H, W, C = x_nhwc.shape
    xp = jnp.pad(x_nhwc, ((0, 0), (pad, pad), (pad, pad), (0, 0)))
    OH = (H + 2 * pad - k) // stride + 1
    OW = (W + 2 * pad - k) // stride + 1
    patches = []
    for di in range(k):
        for dj in range(k):
            patches.append(
                xp[:, di:di + stride * OH:stride, dj:dj + stride * OW:stride, :])
    extra = k_pad - k * k * C
    if extra > 0:
        patches.append(jnp.zeros((N, OH, OW, extra), x_nhwc.dtype))
    cols = jnp.concatenate(patches, axis=-1)            # [N, OH, OW, k_pad]
    return cols.reshape(N, OH * OW, k_pad), OH, OW


def fold_bn(w_khwkio, gamma, beta, mean, var, eps=1e-3):
    """Fold eval-mode BatchNorm into conv weight [k,k,Cin,Cout] and bias.
    eps=1e-3 matches torchvision EfficientNetV2's BatchNorm."""
    scale = gamma / jnp.sqrt(var + eps)
    return w_khwkio * scale, beta - mean * scale


def build_params(key):
    ks = jax.random.split(key, 4)
    p = {}
    # EfficientNetV2-M stem: Conv2d(3, 24, k=3, s=2, p=1, bias=False) + BN + SiLU
    p["stem_w"] = 0.1 * jax.random.normal(ks[0], (3, 3, 3, 24), jnp.float32)
    p["stem_bn"] = (jnp.ones(24), jnp.zeros(24), jnp.zeros(24), jnp.ones(24))
    # Backbone head conv to 1280 channels (1x1 conv + BN + SiLU)
    p["head_w"] = 0.05 * jax.random.normal(ks[1], (1, 1, 24, 1280), jnp.float32)
    p["head_bn"] = (jnp.ones(1280), jnp.zeros(1280), jnp.zeros(1280), jnp.ones(1280))
    # Backbone classifier: Linear(1280, 1000)  (Dropout(0.3) is a no-op in eval)
    p["fc1_w"] = 0.02 * jax.random.normal(ks[2], (1280, 1000), jnp.float32)
    p["fc1_b"] = jnp.zeros((1000,), jnp.float32)
    # MyModel.linear: Linear(1000, 20)
    p["fc2_w"] = 0.02 * jax.random.normal(ks[3], (1000, 20), jnp.float32)
    p["fc2_b"] = jnp.zeros((20,), jnp.float32)
    return p


def prepare_inference_params(p):
    """Fold BN, collapse fc1+fc2, pad to lane-friendly shapes, cast to bf16."""
    # Stem conv + BN folded, padded to (32, 128)
    w_s, b_s = fold_bn(p["stem_w"], *p["stem_bn"])                 # (3,3,3,24),(24,)
    ws = w_s.reshape(K_REAL, C_STEM_REAL)
    ws = jnp.pad(ws, ((0, K_PAD - K_REAL), (0, C_STEM - C_STEM_REAL)))
    bs = jnp.pad(b_s, (0, C_STEM - C_STEM_REAL)).reshape(1, C_STEM)
    # Head 1x1 conv + BN folded, padded rows (silu(0)=0 so padding is exact)
    w_h, b_h = fold_bn(p["head_w"], *p["head_bn"])                 # (1,1,24,1280)
    wh = w_h.reshape(C_STEM_REAL, C_HEAD)
    wh = jnp.pad(wh, ((0, C_STEM - C_STEM_REAL), (0, 0)))
    bh = b_h.reshape(1, C_HEAD)
    # Collapse fc1 (1280->1000) and fc2 (1000->20): no activation between,
    # Dropout is identity in eval -> exact algebraic fusion.
    wc = p["fc1_w"] @ p["fc2_w"]                                   # (1280, 20)
    bc = p["fc1_b"] @ p["fc2_w"] + p["fc2_b"]                      # (20,)
    wc = jnp.pad(wc, ((0, 0), (0, C_OUT - N_CLASSES)))
    bc = jnp.pad(bc, (0, C_OUT - N_CLASSES)).reshape(1, C_OUT)
    return {
        "ws": ws.astype(jnp.bfloat16), "bs": bs.astype(jnp.float32),
        "wh": wh.astype(jnp.bfloat16), "bh": bh.astype(jnp.float32),
        "wc": wc.astype(jnp.bfloat16), "bc": bc.astype(jnp.float32),
    }


def _pick_tile_s(S, max_tile):
    """Bounded, 8-aligned spatial tile (keeps per-step VMEM small on v7x)."""
    t = min(max_tile, S)
    t = max(8, (t // 8) * 8)
    return t


# ----------------------------------------------------------------------------
# Forward pass
# ----------------------------------------------------------------------------
def my_model_forward(prep, x_nchw):
    tune = _tuning_for_device()
    N = x_nchw.shape[0]
    # NHWC bf16 up front so the im2col cols array is built/written once in bf16.
    x = jnp.transpose(x_nchw, (0, 2, 3, 1)).astype(jnp.bfloat16)

    # im2col for the stem conv (3x3, stride 2, pad 1), K padded 27 -> 32
    cols, OH, OW = im2col_padded(x, k=3, stride=2, pad=1, k_pad=K_PAD)
    S = OH * OW

    tile_s = _pick_tile_s(S, tune["tile_s_max"])
    s_pad = ((S + tile_s - 1) // tile_s) * tile_s
    if s_pad != S:
        # spatial padding lives only in the LAST tile and is exactly zero;
        # the kernel relies on both invariants for its pad-row correction.
        cols = jnp.pad(cols, ((0, 0), (0, s_pad - S), (0, 0)))

    # TODO(synk): the 7 stages of Fused-MBConv / MBConv blocks (with SE) of
    # EfficientNetV2-M are not reproduced; a single 24->1280 1x1 conv+BN+SiLU
    # projection stands in between the stem and the backbone head.
    return fused_backbone_classifier(
        cols, prep["ws"], prep["bs"], prep["wh"], prep["bh"],
        prep["wc"], prep["bc"], s_valid=S, tile_s=tile_s,
        chunk=tune["chunk"], epi_dtype=tune["epi_dtype"])          # [N, 20]


if __name__ == "__main__":
    x = jax.random.normal(jax.random.PRNGKey(0), (2, 3, 32, 32), jnp.float32)
    params = build_params(jax.random.PRNGKey(42))
    prep = prepare_inference_params(params)
    fwd = jax.jit(my_model_forward)
    out = fwd(prep, x)
    jax.block_until_ready(out)
    assert out.shape == (2, 20) and out.dtype == jnp.float32
    print("KERNEL_OK")
</pallas_src>

<mosaic_0001>
module attributes {stable_mosaic.version = 11 : i64} {
  func.func @_fused_kernel(%arg0: i32, %arg1: i32, %arg2: memref<1x256x32xbf16, #tpu.memory_space<vmem>>, %arg3: memref<32x128xbf16, #tpu.memory_space<vmem>>, %arg4: memref<1x128xf32, #tpu.memory_space<vmem>>, %arg5: memref<128x1280xbf16, #tpu.memory_space<vmem>>, %arg6: memref<1x1280xf32, #tpu.memory_space<vmem>>, %arg7: memref<1280x128xbf16, #tpu.memory_space<vmem>>, %arg8: memref<1x128xf32, #tpu.memory_space<vmem>>, %arg9: memref<1x1x128xf32, #tpu.memory_space<vmem>>, %arg10: memref<1x1280xf32, #tpu.memory_space<vmem>>) attributes {dimension_semantics = [#tpu.dimension_semantics<parallel>, #tpu.dimension_semantics<arbitrary>], iteration_bounds = array<i64: 2, 1>, scalar_prefetch = 0 : i64, scratch_operands = 1 : i64, tpu.core_type = #tpu.core_type<tc>, window_params = [{transform_indices = @transform_0, window_bounds = array<i64: 1, 256, 32>}, {pipeline_mode = #tpu.pipeline_mode<synchronous>, transform_indices = @transform_1, window_bounds = array<i64: 32, 128>}, {pipeline_mode = #tpu.pipeline_mode<synchronous>, transform_indices = @transform_2, window_bounds = array<i64: 1, 128>}, {pipeline_mode = #tpu.pipeline_mode<synchronous>, transform_indices = @transform_3, window_bounds = array<i64: 128, 1280>}, {pipeline_mode = #tpu.pipeline_mode<synchronous>, transform_indices = @transform_4, window_bounds = array<i64: 1, 1280>}, {pipeline_mode = #tpu.pipeline_mode<synchronous>, transform_indices = @transform_5, window_bounds = array<i64: 1280, 128>}, {pipeline_mode = #tpu.pipeline_mode<synchronous>, transform_indices = @transform_6, window_bounds = array<i64: 1, 128>}, {transform_indices = @transform_7, window_bounds = array<i64: 1, 1, 128>}]} {
    %c0_i32 = arith.constant 0 : i32
    %0 = arith.cmpi eq, %arg1, %c0_i32 : i32
    %1 = arith.extui %0 : i1 to i32
    %c0_i32_0 = arith.constant 0 : i32
    %2 = arith.cmpi ne, %1, %c0_i32_0 : i32
    scf.if %2 {
      %cst_61 = arith.constant 0.000000e+00 : f32
      %110 = vector.broadcast %cst_61 : f32 to vector<1x1280xf32>
      %c0_62 = arith.constant 0 : index
      %c0_63 = arith.constant 0 : index
      %111 = vector.load %arg10[%c0_62, %c0_63] : memref<1x1280xf32, #tpu.memory_space<vmem>>, vector<1x1280xf32>
      tpu.vector_store %arg10[%c0_62, %c0_63], %110 {strides = array<i32>} : memref<1x1280xf32, #tpu.memory_space<vmem>>, vector<1x1280xf32>,
    } else {
    }
    %c0 = arith.constant 0 : index
    %c0_1 = arith.constant 0 : index
    %c0_2 = arith.constant 0 : index
    %3 = vector.load %arg2[%c0, %c0_1, %c0_2] : memref<1x256x32xbf16, #tpu.memory_space<vmem>>, vector<1x256x32xbf16>
    %4 = vector.shape_cast %3 : vector<1x256x32xbf16> to vector<256x32xbf16>
    %c0_3 = arith.constant 0 : index
    %c0_4 = arith.constant 0 : index
    %5 = vector.load %arg3[%c0_3, %c0_4] : memref<32x128xbf16, #tpu.memory_space<vmem>>, vector<32x128xbf16>
    %cst = arith.constant dense<0.000000e+00> : vector<256x128xf32>
    %6 = tpu.matmul %4, %5, %cst {dimension_numbers = #tpu.dot_dimension_numbers<[1], [0], [0], [1], [0, 0, 1, 1], [], []>} : vector<256x32xbf16>, vector<32x128xbf16>, vector<256x128xf32> -> vector<256x128xf32>
    %c0_5 = arith.constant 0 : index
    %c0_6 = arith.constant 0 : index
    %7 = vector.load %arg4[%c0_5, %c0_6] : memref<1x128xf32, #tpu.memory_space<vmem>>, vector<1x128xf32>
    %8 = vector.broadcast %7 : vector<1x128xf32> to vector<256x128xf32>
    %9 = arith.addf %6, %8 : vector<256x128xf32>
    %10 = arith.truncf %9 : vector<256x128xf32> to vector<256x128xbf16>
    %11 = arith.negf %10 : vector<256x128xbf16>
    %12 = math.exp %11 : vector<256x128xbf16>
    %cst_7 = arith.constant 1.000000e+00 : bf16
    %13 = vector.broadcast %cst_7 : bf16 to vector<256x128xbf16>
    %14 = arith.addf %13, %12 : vector<256x128xbf16>
    %15 = arith.divf %13, %14 : vector<256x128xbf16>
    %16 = arith.mulf %10, %15 : vector<256x128xbf16>
    %c0_8 = arith.constant 0 : index
    %c0_9 = arith.constant 0 : index
    %17 = vector.load %arg5[%c0_8, %c0_9] : memref<128x1280xbf16, #tpu.memory_space<vmem>>, vector<128x256xbf16>
    %cst_10 = arith.constant dense<0.000000e+00> : vector<256x256xf32>
    %18 = tpu.matmul %16, %17, %cst_10 {dimension_numbers = #tpu.dot_dimension_numbers<[1], [0], [0], [1], [0, 0, 1, 1], [], []>} : vector<256x128xbf16>, vector<128x256xbf16>, vector<256x256xf32> -> vector<256x256xf32>
    %c0_11 = arith.constant 0 : index
    %c0_12 = arith.constant 0 : index
    %19 = vector.load %arg6[%c0_11, %c0_12] : memref<1x1280xf32, #tpu.memory_space<vmem>>, vector<1x256xf32>
    %20 = vector.broadcast %19 : vector<1x256xf32> to vector<256x256xf32>
    %21 = arith.addf %18, %20 : vector<256x256xf32>
    %22 = arith.truncf %21 : vector<256x256xf32> to vector<256x256xbf16>
    %23 = arith.negf %22 : vector<256x256xbf16>
    %24 = math.exp %23 : vector<256x256xbf16>
    %cst_13 = arith.constant 1.000000e+00 : bf16
    %25 = vector.broadcast %cst_13 : bf16 to vector<256x256xbf16>
    %26 = arith.addf %25, %24 : vector<256x256xbf16>
    %27 = arith.divf %25, %26 : vector<256x256xbf16>
    %28 = arith.mulf %22, %27 : vector<256x256xbf16>
    %c0_14 = arith.constant 0 : index
    %c0_15 = arith.constant 0 : index
    %29 = vector.load %arg10[%c0_14, %c0_15] : memref<1x1280xf32, #tpu.memory_space<vmem>>, vector<1x256xf32>
    %30 = arith.extf %28 : vector<256x256xbf16> to vector<256x256xf32>
    %cst_16 = arith.constant dense<0.000000e+00> : vector<256xf32>
    %31 = vector.multi_reduction <add>, %30, %cst_16 [0] : vector<256x256xf32> to vector<256xf32>
    %32 = vector.shape_cast %31 : vector<256xf32> to vector<1x256xf32>
    %33 = arith.addf %29, %32 : vector<1x256xf32>
    %c0_17 = arith.constant 0 : index
    %c0_18 = arith.constant 0 : index
    %34 = vector.load %arg10[%c0_17, %c0_18] : memref<1x1280xf32, #tpu.memory_space<vmem>>, vector<1x256xf32>
    tpu.vector_store %arg10[%c0_17, %c0_18], %33 {strides = array<i32>} : memref<1x1280xf32, #tpu.memory_space<vmem>>, vector<1x256xf32>,
    %c0_19 = arith.constant 0 : index
    %c256 = arith.constant 256 : index
    %35 = vector.load %arg5[%c0_19, %c256] : memref<128x1280xbf16, #tpu.memory_space<vmem>>, vector<128x256xbf16>
    %cst_20 = arith.constant dense<0.000000e+00> : vector<256x256xf32>
    %36 = tpu.matmul %16, %35, %cst_20 {dimension_numbers = #tpu.dot_dimension_numbers<[1], [0], [0], [1], [0, 0, 1, 1], [], []>} : vector<256x128xbf16>, vector<128x256xbf16>, vector<256x256xf32> -> vector<256x256xf32>
    %c0_21 = arith.constant 0 : index
    %c256_22 = arith.constant 256 : index
    %37 = vector.load %arg6[%c0_21, %c256_22] : memref<1x1280xf32, #tpu.memory_space<vmem>>, vector<1x256xf32>
    %38 = vector.broadcast %37 : vector<1x256xf32> to vector<256x256xf32>
    %39 = arith.addf %36, %38 : vector<256x256xf32>
    %40 = arith.truncf %39 : vector<256x256xf32> to vector<256x256xbf16>
    %41 = arith.negf %40 : vector<256x256xbf16>
    %42 = math.exp %41 : vector<256x256xbf16>
    %cst_23 = arith.constant 1.000000e+00 : bf16
    %43 = vector.broadcast %cst_23 : bf16 to vector<256x256xbf16>
    %44 = arith.addf %43, %42 : vector<256x256xbf16>
    %45 = arith.divf %43, %44 : vector<256x256xbf16>
    %46 = arith.mulf %40, %45 : vector<256x256xbf16>
    %c0_24 = arith.constant 0 : index
    %c256_25 = arith.constant 256 : index
    %47 = vector.load %arg10[%c0_24, %c256_25] : memref<1x1280xf32, #tpu.memory_space<vmem>>, vector<1x256xf32>
    %48 = arith.extf %46 : vector<256x256xbf16> to vector<256x256xf32>
    %cst_26 = arith.constant dense<0.000000e+00> : vector<256xf32>
    %49 = vector.multi_reduction <add>, %48, %cst_26 [0] : vector<256x256xf32> to vector<256xf32>
    %50 = vector.shape_cast %49 : vector<256xf32> to vector<1x256xf32>
    %51 = arith.addf %47, %50 : vector<1x256xf32>
    %c0_27 = arith.constant 0 : index
    %c256_28 = arith.constant 256 : index
    %52 = vector.load %arg10[%c0_27, %c256_28] : memref<1x1280xf32, #tpu.memory_space<vmem>>, vector<1x256xf32>
    tpu.vector_store %arg10[%c0_27, %c256_28], %51 {strides = array<i32>} : memref<1x1280xf32, #tpu.memory_space<vmem>>, vector<1x256xf32>,
    %c0_29 = arith.constant 0 : index
    %c512 = arith.constant 512 : index
    %53 = vector.load %arg5[%c0_29, %c512] : memref<128x1280xbf16, #tpu.memory_space<vmem>>, vector<128x256xbf16>
    %cst_30 = arith.constant dense<0.000000e+00> : vector<256x256xf32>
    %54 = tpu.matmul %16, %53, %cst_30 {dimension_numbers = #tpu.dot_dimension_numbers<[1], [0], [0], [1], [0, 0, 1, 1], [], []>} : vector<256x128xbf16>, vector<128x256xbf16>, vector<256x256xf32> -> vector<256x256xf32>
    %c0_31 = arith.constant 0 : index
    %c512_32 = arith.constant 512 : index
    %55 = vector.load %arg6[%c0_31, %c512_32] : memref<1x1280xf32, #tpu.memory_space<vmem>>, vector<1x256xf32>
    %56 = vector.broadcast %55 : vector<1x256xf32> to vector<256x256xf32>
    %57 = arith.addf %54, %56 : vector<256x256xf32>
    %58 = arith.truncf %57 : vector<256x256xf32> to vector<256x256xbf16>
    %59 = arith.negf %58 : vector<256x256xbf16>
    %60 = math.exp %59 : vector<256x256xbf16>
    %cst_33 = arith.constant 1.000000e+00 : bf16
    %61 = vector.broadcast %cst_33 : bf16 to vector<256x256xbf16>
    %62 = arith.addf %61, %60 : vector<256x256xbf16>
    %63 = arith.divf %61, %62 : vector<256x256xbf16>
    %64 = arith.mulf %58, %63 : vector<256x256xbf16>
    %c0_34 = arith.constant 0 : index
    %c512_35 = arith.constant 512 : index
    %65 = vector.load %arg10[%c0_34, %c512_35] : memref<1x1280xf32, #tpu.memory_space<vmem>>, vector<1x256xf32>
    %66 = arith.extf %64 : vector<256x256xbf16> to vector<256x256xf32>
    %cst_36 = arith.constant dense<0.000000e+00> : vector<256xf32>
    %67 = vector.multi_reduction <add>, %66, %cst_36 [0] : vector<256x256xf32> to vector<256xf32>
    %68 = vector.shape_cast %67 : vector<256xf32> to vector<1x256xf32>
    %69 = arith.addf %65, %68 : vector<1x256xf32>
    %c0_37 = arith.constant 0 : index
    %c512_38 = arith.constant 512 : index
    %70 = vector.load %arg10[%c0_37, %c512_38] : memref<1x1280xf32, #tpu.memory_space<vmem>>, vector<1x256xf32>
    tpu.vector_store %arg10[%c0_37, %c512_38], %69 {strides = array<i32>} : memref<1x1280xf32, #tpu.memory_space<vmem>>, vector<1x256xf32>,
    %c0_39 = arith.constant 0 : index
    %c768 = arith.constant 768 : index
    %71 = vector.load %arg5[%c0_39, %c768] : memref<128x1280xbf16, #tpu.memory_space<vmem>>, vector<128x256xbf16>
    %cst_40 = arith.constant dense<0.000000e+00> : vector<256x256xf32>
    %72 = tpu.matmul %16, %71, %cst_40 {dimension_numbers = #tpu.dot_dimension_numbers<[1], [0], [0], [1], [0, 0, 1, 1], [], []>} : vector<256x128xbf16>, vector<128x256xbf16>, vector<256x256xf32> -> vector<256x256xf32>
    %c0_41 = arith.constant 0 : index
    %c768_42 = arith.constant 768 : index
    %73 = vector.load %arg6[%c0_41, %c768_42] : memref<1x1280xf32, #tpu.memory_space<vmem>>, vector<1x256xf32>
    %74 = vector.broadcast %73 : vector<1x256xf32> to vector<256x256xf32>
    %75 = arith.addf %72, %74 : vector<256x256xf32>
    %76 = arith.truncf %75 : vector<256x256xf32> to vector<256x256xbf16>
    %77 = arith.negf %76 : vector<256x256xbf16>
    %78 = math.exp %77 : vector<256x256xbf16>
    %cst_43 = arith.constant 1.000000e+00 : bf16
    %79 = vector.broadcast %cst_43 : bf16 to vector<256x256xbf16>
    %80 = arith.addf %79, %78 : vector<256x256xbf16>
    %81 = arith.divf %79, %80 : vector<256x256xbf16>
    %82 = arith.mulf %76, %81 : vector<256x256xbf16>
    %c0_44 = arith.constant 0 : index
    %c768_45 = arith.constant 768 : index
    %83 = vector.load %arg10[%c0_44, %c768_45] : memref<1x1280xf32, #tpu.memory_space<vmem>>, vector<1x256xf32>
    %84 = arith.extf %82 : vector<256x256xbf16> to vector<256x256xf32>
    %cst_46 = arith.constant dense<0.000000e+00> : vector<256xf32>
    %85 = vector.multi_reduction <add>, %84, %cst_46 [0] : vector<256x256xf32> to vector<256xf32>
    %86 = vector.shape_cast %85 : vector<256xf32> to vector<1x256xf32>
    %87 = arith.addf %83, %86 : vector<1x256xf32>
    %c0_47 = arith.constant 0 : index
    %c768_48 = arith.constant 768 : index
    %88 = vector.load %arg10[%c0_47, %c768_48] : memref<1x1280xf32, #tpu.memory_space<vmem>>, vector<1x256xf32>
    tpu.vector_store %arg10[%c0_47, %c768_48], %87 {strides = array<i32>} : memref<1x1280xf32, #tpu.memory_space<vmem>>, vector<1x256xf32>,
    %c0_49 = arith.constant 0 : index
    %c1024 = arith.constant 1024 : index
    %89 = vector.load %arg5[%c0_49, %c1024] : memref<128x1280xbf16, #tpu.memory_space<vmem>>, vector<128x256xbf16>
    %cst_50 = arith.constant dense<0.000000e+00> : vector<256x256xf32>
    %90 = tpu.matmul %16, %89, %cst_50 {dimension_numbers = #tpu.dot_dimension_numbers<[1], [0], [0], [1], [0, 0, 1, 1], [], []>} : vector<256x128xbf16>, vector<128x256xbf16>, vector<256x256xf32> -> vector<256x256xf32>
    %c0_51 = arith.constant 0 : index
    %c1024_52 = arith.constant 1024 : index
    %91 = vector.load %arg6[%c0_51, %c1024_52] : memref<1x1280xf32, #tpu.memory_space<vmem>>, vector<1x256xf32>
    %92 = vector.broadcast %91 : vector<1x256xf32> to vector<256x256xf32>
    %93 = arith.addf %90, %92 : vector<256x256xf32>
    %94 = arith.truncf %93 : vector<256x256xf32> to vector<256x256xbf16>
    %95 = arith.negf %94 : vector<256x256xbf16>
    %96 = math.exp %95 : vector<256x256xbf16>
    %cst_53 = arith.constant 1.000000e+00 : bf16
    %97 = vector.broadcast %cst_53 : bf16 to vector<256x256xbf16>
    %98 = arith.addf %97, %96 : vector<256x256xbf16>
    %99 = arith.divf %97, %98 : vector<256x256xbf16>
    %100 = arith.mulf %94, %99 : vector<256x256xbf16>
    %c0_54 = arith.constant 0 : index
    %c1024_55 = arith.constant 1024 : index
    %101 = vector.load %arg10[%c0_54, %c1024_55] : memref<1x1280xf32, #tpu.memory_space<vmem>>, vector<1x256xf32>
    %102 = arith.extf %100 : vector<256x256xbf16> to vector<256x256xf32>
    %cst_56 = arith.constant dense<0.000000e+00> : vector<256xf32>
    %103 = vector.multi_reduction <add>, %102, %cst_56 [0] : vector<256x256xf32> to vector<256xf32>
    %104 = vector.shape_cast %103 : vector<256xf32> to vector<1x256xf32>
    %105 = arith.addf %101, %104 : vector<1x256xf32>
    %c0_57 = arith.constant 0 : index
    %c1024_58 = arith.constant 1024 : index
    %106 = vector.load %arg10[%c0_57, %c1024_58] : memref<1x1280xf32, #tpu.memory_space<vmem>>, vector<1x256xf32>
    tpu.vector_store %arg10[%c0_57, %c1024_58], %105 {strides = array<i32>} : memref<1x1280xf32, #tpu.memory_space<vmem>>, vector<1x256xf32>,
    %c0_i32_59 = arith.constant 0 : i32
    %107 = arith.cmpi eq, %arg1, %c0_i32_59 : i32
    %108 = arith.extui %107 : i1 to i32
    %c0_i32_60 = arith.constant 0 : i32
    %109 = arith.cmpi ne, %108, %c0_i32_60 : i32
    scf.if %109 {
      %c0_61 = arith.constant 0 : index
      %c0_62 = arith.constant 0 : index
      %110 = vector.load %arg10[%c0_61, %c0_62] : memref<1x1280xf32, #tpu.memory_space<vmem>>, vector<1x1280xf32>
      %cst_63 = arith.constant 3.906250e-03 : f32
      %111 = vector.broadcast %cst_63 : f32 to vector<1x1280xf32>
      %112 = arith.mulf %110, %111 : vector<1x1280xf32>
      %113 = arith.truncf %112 : vector<1x1280xf32> to vector<1x1280xbf16>
      %c0_64 = arith.constant 0 : index
      %c0_65 = arith.constant 0 : index
      %114 = vector.load %arg7[%c0_64, %c0_65] : memref<1280x128xbf16, #tpu.memory_space<vmem>>, vector<1280x128xbf16>
      %cst_66 = arith.constant dense<0.000000e+00> : vector<1x128xf32>
      %115 = tpu.matmul %113, %114, %cst_66 {dimension_numbers = #tpu.dot_dimension_numbers<[1], [0], [0], [1], [0, 0, 1, 1], [], []>} : vector<1x1280xbf16>, vector<1280x128xbf16>, vector<1x128xf32> -> vector<1x128xf32>
      %c0_67 = arith.constant 0 : index
      %c0_68 = arith.constant 0 : index
      %116 = vector.load %arg8[%c0_67, %c0_68] : memref<1x128xf32, #tpu.memory_space<vmem>>, vector<1x128xf32>
      %117 = arith.addf %115, %116 : vector<1x128xf32>
      %118 = vector.shape_cast %117 : vector<1x128xf32> to vector<1x1x128xf32>
      %c0_69 = arith.constant 0 : index
      %c0_70 = arith.constant 0 : index
      %c0_71 = arith.constant 0 : index
      %119 = vector.load %arg9[%c0_69, %c0_70, %c0_71] : memref<1x1x128xf32, #tpu.memory_space<vmem>>, vector<1x1x128xf32>
      tpu.vector_store %arg9[%c0_69, %c0_70, %c0_71], %118 {strides = array<i32>} : memref<1x1x128xf32, #tpu.memory_space<vmem>>, vector<1x1x128xf32>,
    } else {
    }
    return
  }
  func.func @transform_0(%arg0: i32, %arg1: i32) -> (i32, i32, i32) {
    %c0_i32 = arith.constant 0 : i32
    %c0_i32_0 = arith.constant 0 : i32
    return %arg0, %arg1, %c0_i32 : i32, i32, i32
  }
  func.func @transform_1(%arg0: i32, %arg1: i32) -> (i32, i32) {
    %c0_i32 = arith.constant 0 : i32
    %c0_i32_0 = arith.constant 0 : i32
    %c0_i32_1 = arith.constant 0 : i32
    return %c0_i32, %c0_i32_0 : i32, i32
  }
  func.func @transform_2(%arg0: i32, %arg1: i32) -> (i32, i32) {
    %c0_i32 = arith.constant 0 : i32
    %c0_i32_0 = arith.constant 0 : i32
    %c0_i32_1 = arith.constant 0 : i32
    return %c0_i32, %c0_i32_0 : i32, i32
  }
  func.func @transform_3(%arg0: i32, %arg1: i32) -> (i32, i32) {
    %c0_i32 = arith.constant 0 : i32
    %c0_i32_0 = arith.constant 0 : i32
    %c0_i32_1 = arith.constant 0 : i32
    return %c0_i32, %c0_i32_0 : i32, i32
  }
  func.func @transform_4(%arg0: i32, %arg1: i32) -> (i32, i32) {
    %c0_i32 = arith.constant 0 : i32
    %c0_i32_0 = arith.constant 0 : i32
    %c0_i32_1 = arith.constant 0 : i32
    return %c0_i32, %c0_i32_0 : i32, i32
  }
  func.func @transform_5(%arg0: i32, %arg1: i32) -> (i32, i32) {
    %c0_i32 = arith.constant 0 : i32
    %c0_i32_0 = arith.constant 0 : i32
    %c0_i32_1 = arith.constant 0 : i32
    return %c0_i32, %c0_i32_0 : i32, i32
  }
  func.func @transform_6(%arg0: i32, %arg1: i32) -> (i32, i32) {
    %c0_i32 = arith.constant 0 : i32
    %c0_i32_0 = arith.constant 0 : i32
    %c0_i32_1 = arith.constant 0 : i32
    return %c0_i32, %c0_i32_0 : i32, i32
  }
  func.func @transform_7(%arg0: i32, %arg1: i32) -> (i32, i32, i32) {
    %c0_i32 = arith.constant 0 : i32
    %c0_i32_0 = arith.constant 0 : i32
    %c0_i32_1 = arith.constant 0 : i32
    return %arg0, %c0_i32, %c0_i32_0 : i32, i32, i32
  }
}

</mosaic_0001>

<bundles_post_ra>
// kernel: my_model_forward.1
= control target key start
LH: loop header
LB: loop body
LE: loop exit
PB: predicated region body
PF: predicated region fallthrough
CT: control target
= control target key end

     0   :  { %12 = vsyncpa [#allocation4], 0  ;;  %s10349_s0 = inlined_call_operand.vmem [shape: bf16[2,256,32], index: 0, kind: input, shape index: {}]   ;;  %s10350_s1 = inlined_call_operand.vmem [shape: bf16[32,128], index: 1, kind: input, shape index: {}]   ;;  %s10351_s2 = inlined_call_operand.vmem [shape: f32[1,128], index: 2, kind: input, shape index: {}]   ;;  %s10352_s3 = inlined_call_operand.vmem [shape: bf16[128,1280], index: 3, kind: input, shape index: {}]   ;;  %s10353_s4 = inlined_call_operand.vmem [shape: f32[1,1280], index: 4, kind: input, shape index: {}]   ;;  %s10354_s5 = inlined_call_operand.vmem [shape: bf16[1280,128], index: 5, kind: input, shape index: {}]   ;;  %s10355_s6 = inlined_call_operand.vmem [shape: f32[1,128], index: 6, kind: input, shape index: {}]   ;;  %s10356_s7 = inlined_call_operand.hbm [shape: f32[2,1,128], index: 7, kind: output, shape index: {}]  }
   0x1   :  { %14 = vsyncpa [#allocation4 + $0x1], 0  ;;  %s7193_s24 = smov 0   ;;  %s7195_s25 = smov 0  }
   0x2   :  { %s7197_s26 = smov 0   ;;  %s7199_s27 = smov 0  }
   0x3   :  { %s7201_s28 = smov 0   ;;  %s7203_s29 = smov 0  }
   0x4 LB: > { %s5542_s30 = sadd.s32 4294967295, %s7147_s29   ;;  %s5543_s8 = sadd.s32 4294967294, %s7147_s29   ;;  %s7147_s29 = sphi %s7203_s29, %s20_s29   ;;  %s7143_s28 = sphi %s7201_s28, %s10778_s28   ;;  %s7139_s27 = sphi %s7199_s27, %s10777_s27   ;;  %s7135_s26 = sphi %s7197_s26, %s10776_s26   ;;  %s7131_s25 = sphi %s7195_s25, %s10775_s25   ;;  %s7127_s24 = sphi %s7193_s24, %s10774_s24  }
   0x5   : > { %s32_s9 = sadd.s32 1, %s7143_s28  ;;  %s193_s10 = sadd.s32 1, %s7135_s26 }
   0x6   : > { %p34_p0 = scmp.ge.s32.totalorder %s32_s9, 2  ;;  %p203_p1 = scmp.ne.s32.totalorder %s7135_s26, %s7131_s25 }
   0x7   : > { %p204_p2 = scmp.eq.s32.totalorder %s5542_s30, 1  ;;  %p209_p3 = scmp.ne.s32.totalorder %s7131_s25, %s7127_s24 }
   0x8   : > { %s10780_s9 = smov (%p34_p0, %s32_s9), 0  ;;  %p210_p5 = scmp.eq.s32.totalorder %s5543_s8, 1 }
   0x9   : > { %p7233_p4 = por %p204_p2, %p203_p1  ;;  %s190_s12 = ssub.s32 %s7143_s28, %s10780_s9 }
   0xa   : > { %p5546_p6 = scmp.ge.s32.totalorder %s7147_s29, 1  ;;  %p191_p7 = scmp.eq.s32.totalorder %s190_s12, 0 }
   0xb   : > { %p7240_p8 = por %p210_p5, %p209_p3  ;;  %p259_p9 = scmp.lt.s32.totalorder %s7147_s29, 3 }
   0xc   : > { %s7246_s14 = scalar_select %p191_p7, %s7135_s26, %s193_s10  }
   0xd   : > { %p260_p10 = pnand %p5546_p6, %p259_p9 }
   0xf   : > { %263 = sbr.rel (%p260_p10) target bundleno = 1336 (0x538), region = 48 }
  0x16   : > { %v6146_v0 = vld [vmem:[%s10350_s1] sm:$0xff]   ;;  %p295_p11 = scmp.lt.s32.totalorder %s7139_s27, 1  ;;  %v6147_v1 = vld [vmem:[%s10350_s1 + $0x8] sm:$0xff]   ;;  %vm451_vm0 = vcmask 261120   ;;  %v6170_v22 = vld [vmem:[%s10352_s3 + $0x54] ss:$40 sps:$4 sm:$0xff]  }
  0x17   : > { %6052 = vmatprep.subr.bf16.mxu0 %v6146_v0  ;;  %v6164_v18 = vld [vmem:[%s10352_s3 + $0x4] ss:$40 sps:$4 sm:$0xff]   ;;  %v6166_v20 = vld [vmem:[%s10352_s3] ss:$40 sps:$4 sm:$0xff]   ;;  %v6172_v24 = vld [vmem:[%s10352_s3 + $0x50] ss:$40 sps:$4 sm:$0xff]  }
  0x18   : > { %s296_s19 = scalar_select %p295_p11, %s7139_s27, 1  ;;  %6053 = vmatpush3.bf16.msra.mxu0 %v6146_v0  ;;  %v6169_v19 = vld [vmem:[%s10352_s3 + $0xc] ss:$40 sps:$4 sm:$0xff]   ;;  %v6167_v21 = vld [vmem:[%s10352_s3 + $0x8] ss:$40 sps:$4 sm:$0xff]   ;;  %913 = vmatprep.subr.bf16.mxu1 %v6164_v18  ;;  %v10364_v50 = vmov 0  }
  0x19   : > { %6054 = vmatprep.subr.bf16.mxu0 %v6147_v1  ;;  %914 = vmatpush1.bf16.msra.mxu1 %v6166_v20  ;;  %v6175_v23 = vld [vmem:[%s10352_s3 + $0x5c] ss:$40 sps:$4 sm:$0xff]   ;;  %v6173_v25 = vld [vmem:[%s10352_s3 + $0x58] ss:$40 sps:$4 sm:$0xff]   ;;  %v6181_v27 = vld [vmem:[%s10352_s3 + $0xac] ss:$40 sps:$4 sm:$0xff]  }
  0x1a   : > { %s5923_s20 = sshll.u32 %s296_s19, 7  ;;  %915 = vmatprep.subr.bf16.mxu1 %v6170_v22  ;;  %v6176_v26 = vld [vmem:[%s10352_s3 + $0xa4] ss:$40 sps:$4 sm:$0xff]   ;;  %v6178_v28 = vld [vmem:[%s10352_s3 + $0xa0] ss:$40 sps:$4 sm:$0xff]   ;;  %945 = vmatprep.mubr.bf16.mxu1 %v10364_v50  ;;  %s292_s22 = sand.u32 1, %s7131_s25  }
  0x1b   : > { %s7259_s23 = scalar_lea.vmem %s10349_s0, %s5923_s20  ;;  %v6179_v29 = vld [vmem:[%s10352_s3 + $0xa8] ss:$40 sps:$4 sm:$0xff]   ;;  %v6182_v30 = vld [vmem:[%s10352_s3 + $0xf4] ss:$40 sps:$4 sm:$0xff]   ;;  %v6185_v33 = vld [vmem:[%s10352_s3 + $0xf8] ss:$40 sps:$4 sm:$0xff]  }
  0x1c   : > { %v6148_v2 = vld [vmem:[%s7259_s23] sm:$0xff]   ;;  %6055 = vmatpush3.bf16.msra.mxu0 %v6147_v1  ;;  %v6149_v3 = vld [vmem:[%s7259_s23 + $0x8] sm:$0xff]   ;;  %v6150_v4 = vld [vmem:[%s7259_s23 + $0x10] sm:$0xff]   ;;  %s293_s30 = scalar_lea.vmem [#allocation3], %s292_s22  ;;  %s5461_s16 = scalar_lea.sflag [#allocation4], %s292_s22 }
  0x1d   : > { %6056 = vmatprep.mubr.msk.bf16.mxu0 %vm451_vm0, %v6148_v2  ;;  %v6151_v5 = vld [vmem:[%s7259_s23 + $0x18] sm:$0xff]   ;;  %v6152_v6 = vld [vmem:[%s7259_s23 + $0x20] sm:$0xff]   ;;  %v6153_v7 = vld [vmem:[%s7259_s23 + $0x28] sm:$0xff]   ;;  %1665 = vmatprep.subr.bf16.mxu0 %v6169_v19  ;;  %s5473_s8 = sshll.u32 %s293_s30, 4  ;;  %s10304_s8 = int_to_ptr.vmem [resolvable:$true] %s5473_s8 }
  0x1e   : > { %v6154_v8 = vld [vmem:[%s7259_s23 + $0x30] sm:$0xff]   ;;  %v6155_v9 = vld [vmem:[%s7259_s23 + $0x38] sm:$0xff]   ;;  %v6156_v10 = vld [vmem:[%s7259_s23 + $0x40] sm:$0xff]   ;;  %916 = vmatpush1.bf16.msra.mxu1 %v6172_v24  ;;  %s7069_s17 = scalar_lea.vmem %s10304_s8, 16 }
  0x1f   : > { %6057 = vmatmul.mubr.msk.bf16.vlgmr.msra.gmra.mrb[0].mxu0 %vm451_vm0, %v6149_v3  ;;  %v6157_v11 = vld [vmem:[%s7259_s23 + $0x48] sm:$0xff]   ;;  %v6158_v12 = vld [vmem:[%s7259_s23 + $0x50] sm:$0xff]   ;;  %v6159_v13 = vld [vmem:[%s7259_s23 + $0x58] sm:$0xff]   ;;  %917 = vmatprep.subr.bf16.mxu1 %v6176_v26  ;;  %p7070_p12 = scmp.ne.s32.totalorder %s10304_s8, %s7069_s17 }
  0x20   : > { %6060 = vmatprep.mubr.msk.bf16.mxu0 %vm451_vm0, %v6150_v4  ;;  %v6160_v14 = vld [vmem:[%s7259_s23 + $0x60] sm:$0xff]   ;;  %v6161_v15 = vld [vmem:[%s7259_s23 + $0x68] sm:$0xff]   ;;  %v6162_v16 = vld [vmem:[%s7259_s23 + $0x70] sm:$0xff]   ;;  %1666 = vmatpush1.bf16.msra.mxu0 %v6167_v21 }
  0x21   : > { %v6163_v17 = vld [vmem:[%s7259_s23 + $0x78] sm:$0xff]   ;;  %1667 = vmatprep.subr.bf16.mxu0 %v6175_v23  ;;  %v6188_v34 = vld [vmem:[%s10352_s3 + $0x144] ss:$40 sps:$4 sm:$0xff]   ;;  %v6190_v36 = vld [vmem:[%s10352_s3 + $0x140] ss:$40 sps:$4 sm:$0xff]   ;;  %s5920_s23 = sshll.u32 %s7139_s27, 4  ;;  %p7071_p13 = pnand %p7070_p12, %p7233_p4 }
  0x22   : > { %918 = vmatpush1.bf16.msra.mxu1 %v6178_v28  ;;  %v6187_v31 = vld [vmem:[%s10352_s3 + $0xfc] ss:$40 sps:$4 sm:$0xff]   ;;  %v6184_v32 = vld [vmem:[%s10352_s3 + $0xf0] ss:$40 sps:$4 sm:$0xff]   ;;  %v6193_v35 = vld [vmem:[%s10352_s3 + $0x14c] ss:$40 sps:$4 sm:$0xff]   ;;  %s10302_s15 = scalar_lea.hbm %s10356_s7, %s5920_s23 }
  0x23   : > { %919 = vmatprep.subr.bf16.mxu1 %v6182_v30  ;;  %v6191_v37 = vld [vmem:[%s10352_s3 + $0x148] ss:$40 sps:$4 sm:$0xff]   ;;  %v6194_v38 = vld [vmem:[%s10352_s3 + $0x194] ss:$40 sps:$4 sm:$0xff]   ;;  %v6197_v41 = vld [vmem:[%s10352_s3 + $0x198] ss:$40 sps:$4 sm:$0xff]   ;;  %p7072_p0 = pneg %p7071_p13 }
  0x24   : > { %1668 = vmatpush1.bf16.msra.mxu0 %v6173_v25  ;;  %v6199_v39 = vld [vmem:[%s10352_s3 + $0x19c] ss:$40 sps:$4 sm:$0xff]   ;;  %v6196_v40 = vld [vmem:[%s10352_s3 + $0x190] ss:$40 sps:$4 sm:$0xff]   ;;  %v6205_v43 = vld [vmem:[%s10352_s3 + $0x1ec] ss:$40 sps:$4 sm:$0xff]  }
  0x25   : > { %1669 = vmatprep.subr.bf16.mxu0 %v6181_v27  ;;  %v6200_v42 = vld [vmem:[%s10352_s3 + $0x1e4] ss:$40 sps:$4 sm:$0xff]   ;;  %v6202_v44 = vld [vmem:[%s10352_s3 + $0x1e0] ss:$40 sps:$4 sm:$0xff]   ;;  %v6206_v46 = vld [vmem:[%s10352_s3 + $0x234] ss:$40 sps:$4 sm:$0xff]  }
  0x26   : > { %920 = vmatpush1.bf16.msra.mxu1 %v6184_v32  ;;  %v6203_v45 = vld [vmem:[%s10352_s3 + $0x1e8] ss:$40 sps:$4 sm:$0xff]   ;;  %v6211_v47 = vld [vmem:[%s10352_s3 + $0x23c] ss:$40 sps:$4 sm:$0xff]   ;;  %v6209_v49 = vld [vmem:[%s10352_s3 + $0x238] ss:$40 sps:$4 sm:$0xff]  }
  0x27   : > { %6061 = vmatmul.mubr.msk.bf16.gmra.mrb[4].mxu0 %vm451_vm0, %v6151_v5  ;;  %921 = vmatprep.subr.bf16.mxu1 %v6188_v34  ;;  %v6208_v48 = vld [vmem:[%s10352_s3 + $0x230] ss:$40 sps:$4 sm:$0xff]   ;;  %v6214_v51 = vld [vmem:[%s10352_s3 + $0x14] ss:$40 sps:$4 sm:$0xff]   ;;  %v7400_v54 = vld [vmem:[%s10351_s2] ss:$0 sm:$0xff] }
  0x28   : > { %6064 = vmatprep.mubr.msk.bf16.mxu0 %vm451_vm0, %v6152_v6  ;;  %1670 = vmatpush1.bf16.msra.mxu0 %v6179_v29  ;;  %v6223_v52 = vld [vmem:[%s10352_s3 + $0x1c] ss:$40 sps:$4 sm:$0xff]   ;;  %s7152_s27 = smov [#allocation3]  }
  0x29   : > { %1671 = vmatprep.subr.bf16.mxu0 %v6187_v31  ;;  %s7073_s18 = sshll.u32 %s7152_s27, 4  ;;  %s7074_s18 = int_to_ptr.vmem [resolvable:$false] %s7073_s18 }
  0x2a   : > { %922 = vmatpush1.bf16.msra.mxu1 %v6190_v36  ;;  %s7075_s19 = scalar_lea.vmem %s7074_s18, 32  ;;  %p7076_p1 = scmp.lt.s32.totalorder %s10304_s8, %s7074_s18 }
  0x2b   : > { %923 = vmatprep.subr.bf16.mxu1 %v6194_v38  ;;  %p7077_p2 = scmp.lt.s32.totalorder %s7075_s19, %s7069_s17 }
  0x2c   : > { %1672 = vmatpush1.bf16.msra.mxu0 %v6185_v33 }
  0x2d   : > { %1673 = vmatprep.subr.bf16.mxu0 %v6193_v35  ;;  %p7078_p3 = por %p7077_p2, %p7076_p1 }
  0x2e   : > { %924 = vmatpush1.bf16.msra.mxu1 %v6196_v40 }
  0x2f   : > { %6065 = vmatmul.mubr.msk.bf16.gmra.mrb[8].mxu0 %vm451_vm0, %v6153_v7  ;;  %925 = vmatprep.subr.bf16.mxu1 %v6200_v42  ;;  %p7079_p5 = pnand %p7078_p3, %p7072_p0 }
  0x30   : > { %6068 = vmatprep.mubr.msk.bf16.mxu0 %vm451_vm0, %v6154_v8  ;;  %1674 = vmatpush1.bf16.msra.mxu0 %v6191_v37 }
  0x31   : > { %1675 = vmatprep.subr.bf16.mxu0 %v6199_v39 }
  0x32   : > { %926 = vmatpush1.bf16.msra.mxu1 %v6202_v44 }
  0x33   : > { %927 = vmatprep.subr.bf16.mxu1 %v6206_v46 }
  0x34   : > { %1676 = vmatpush1.bf16.msra.mxu0 %v6197_v41 }
  0x35   : > { %1677 = vmatprep.subr.bf16.mxu0 %v6205_v43 }
  0x36   : > { %928 = vmatpush1.bf16.msra.mxu1 %v6208_v48 }
  0x37   : > { %6069 = vmatmul.mubr.msk.bf16.gmra.mrb[12].mxu0 %vm451_vm0, %v6155_v9  ;;  %2413 = vmatprep.subr.bf16.mxu1 %v6214_v51 }
  0x38   : > { %6072 = vmatprep.mubr.msk.bf16.mxu0 %vm451_vm0, %v6156_v10  ;;  %1678 = vmatpush1.bf16.msra.mxu0 %v6203_v45 }
  0x39   : > { %1679 = vmatprep.subr.bf16.mxu0 %v6211_v47 }
  0x3c   : > { %1680 = vmatpush1.bf16.msra.mxu0 %v6209_v49 }
  0x3d   : > { %3161 = vmatprep.subr.bf16.mxu0 %v6223_v52 }
  0x3f   : > { %6073 = vmatmul.mubr.msk.bf16.gmra.mrb[16].mxu0 %vm451_vm0, %v6157_v11 }
  0x40   : > { %6076 = vmatprep.mubr.msk.bf16.mxu0 %vm451_vm0, %v6158_v12 }
  0x47   : > { %6077 = vmatmul.mubr.msk.bf16.gmra.mrb[20].mxu0 %vm451_vm0, %v6159_v13 }
  0x48   : > { %6080 = vmatprep.mubr.msk.bf16.mxu0 %vm451_vm0, %v6160_v14 }
  0x4f   : > { %6081 = vmatmul.mubr.msk.bf16.gmra.mrb[24].mxu0 %vm451_vm0, %v6161_v15 }
  0x50   : > { %6084 = vmatprep.mubr.msk.bf16.mxu0 %vm451_vm0, %v6162_v16 }
  0x57   : > { %6085 = vmatmul.mubr.msk.bf16.gmra.mrb[28].mxu0 %vm451_vm0, %v6163_v17 }
  0x58   : > { %1697 = vmatprep.mubr.bf16.mxu0 %v10364_v50 }
  0xf2   : > { %v6058_v53 = vpop.f32.mrb[0].mxu0 }
  0xf3   : > { %v534_v55 = vpop.f32.mrb[1].mxu0  ;;  %v543_v57 = vadd.f32 %v6058_v53, %v7400_v54 }
  0xf4   : > { %v6059_v56 = vpop.f32.mrb[2].mxu0  ;;  %v535_v60 = vadd.f32 %v7400_v54, %v534_v55  ;;  %v6212_v55 = vld [vmem:[%s10352_s3 + $0x10] ss:$40 sps:$4 sm:$0xff]  }
  0xf5   : > { %v546_v58 = vadd.f32 %v6059_v56, %v7400_v54  ;;  %v537_v59 = vpop.f32.mrb[3].mxu0 }
  0xf6   : > { %v538_v61 = vadd.f32 %v7400_v54, %v537_v59  ;;  %v6217_v59 = vld [vmem:[%s10352_s3 + $0x64] ss:$40 sps:$4 sm:$0xff]  }
  0xf7   : > { %v7406_v62 = vpack.c.bf16 %v546_v58, %v543_v57 }
  0xf8   : > { %v7408_v63 = vpack.c.bf16 %v538_v61, %v535_v60  ;;  %v6221_v61 = vld [vmem:[%s10352_s3 + $0x18] ss:$40 sps:$4 sm:$0xff]  }
  0xf9   : > { %v5585_v0 = vmul.bf16 3216621497, %v7406_v62 }
  0xfa   : > { %v5584_v1 = vmul.bf16 3216621497, %v7408_v63  ;;  %v6062_v2 = vpop.f32.mrb[4].mxu0 }
  0xfb   : > { %6364 = vpow.bf16 %v5585_v0  ;;  %v559_v3 = vadd.f32 %v6062_v2, %v7400_v54  ;;  %v550_v4 = vpop.f32.mrb[5].mxu0 }
  0xfc   : > { %6366 = vpow.bf16 %v5584_v1  ;;  %v551_v5 = vadd.f32 %v7400_v54, %v550_v4  ;;  %v6063_v6 = vpop.f32.mrb[6].mxu0  ;;  %v6229_v1 = vld [vmem:[%s10352_s3 + $0x6c] ss:$40 sps:$4 sm:$0xff]   ;;  %v6215_v4 = vld [vmem:[%s10352_s3 + $0x60] ss:$40 sps:$4 sm:$0xff]  }
  0xfd   : > { %v562_v7 = vadd.f32 %v6063_v6, %v7400_v54  ;;  %v553_v8 = vpop.f32.mrb[7].mxu0 }
  0xfe   : > { %v554_v9 = vadd.f32 %v7400_v54, %v553_v8  ;;  %v6220_v8 = vld [vmem:[%s10352_s3 + $0xb4] ss:$40 sps:$4 sm:$0xff]  }
  0xff   : > { %v7416_v10 = vpack.c.bf16 %v562_v7, %v559_v3 }
 0x100   : > { %v7418_v11 = vpack.c.bf16 %v554_v9, %v551_v5 }
 0x101   : > { %v5587_v25 = vmul.bf16 3216621497, %v7416_v10 }
 0x102   : > { %v5586_v12 = vmul.bf16 3216621497, %v7418_v11  ;;  %v6066_v13 = vpop.f32.mrb[8].mxu0 }
 0x103   : > { %v575_v14 = vadd.f32 %v6066_v13, %v7400_v54  ;;  %v566_v15 = vpop.f32.mrb[9].mxu0  ;;  %v6227_v13 = vld [vmem:[%s10352_s3 + $0x68] ss:$40 sps:$4 sm:$0xff]  }
 0x104   : > { %6368 = vpow.bf16 %v5586_v12  ;;  %v567_v16 = vadd.f32 %v7400_v54, %v566_v15  ;;  %v6067_v17 = vpop.f32.mrb[10].mxu0 }
 0x105   : > { %v578_v18 = vadd.f32 %v6067_v17, %v7400_v54  ;;  %v569_v19 = vpop.f32.mrb[11].mxu0 }
 0x106   : > { %v6365_v20 = vpop.eup %6364  ;;  %v570_v21 = vadd.f32 %v7400_v54, %v569_v19 }
 0x107   : > { %v6367_v22 = vpop.eup %6366  ;;  %v7425_v23 = vpack.c.bf16 %v578_v18, %v575_v14  ;;  %v742_v27 = vadd.bf16 1065369472, %v6365_v20  ;;  %v6218_v20 = vld [vmem:[%s10352_s3 + $0xb0] ss:$40 sps:$4 sm:$0xff]  }
 0x108   : > { %v741_v24 = vadd.bf16 1065369472, %v6367_v22  ;;  %v7428_v26 = vpack.c.bf16 %v570_v21, %v567_v16  ;;  %v6235_v21 = vld [vmem:[%s10352_s3 + $0xbc] ss:$40 sps:$4 sm:$0xff]  }
 0x109   : > { %v5589_v57 = vmul.bf16 3216621497, %v7425_v23 }
 0x10a   : > { %6370 = vrcp.bf16 %v741_v24  ;;  %v6070_v28 = vpop.f32.mrb[12].mxu0  ;;  %v5588_v38 = vmul.bf16 3216621497, %v7428_v26  ;;  %v6226_v24 = vld [vmem:[%s10352_s3 + $0x104] ss:$40 sps:$4 sm:$0xff]  }
 0x10b   : > { %v591_v29 = vadd.f32 %v6070_v28, %v7400_v54  ;;  %v582_v30 = vpop.f32.mrb[13].mxu0  ;;  %6372 = vpow.bf16 %v5587_v25  ;;  %v6241_v28 = vld [vmem:[%s10352_s3 + $0x10c] ss:$40 sps:$4 sm:$0xff]  }
 0x10c   : > { %v583_v31 = vadd.f32 %v7400_v54, %v582_v30  ;;  %v6071_v32 = vpop.f32.mrb[14].mxu0  ;;  %6374 = vrcp.bf16 %v742_v27 }
 0x10d   : > { %v594_v33 = vadd.f32 %v6071_v32, %v7400_v54  ;;  %v585_v34 = vpop.f32.mrb[15].mxu0  ;;  %6376 = vpow.bf16 %v5588_v38  ;;  %v6232_v38 = vld [vmem:[%s10352_s3 + $0x154] ss:$40 sps:$4 sm:$0xff]  }
 0x10e   : > { %v586_v35 = vadd.f32 %v7400_v54, %v585_v34  ;;  %v6224_v34 = vld [vmem:[%s10352_s3 + $0x100] ss:$40 sps:$4 sm:$0xff]  }
 0x10f   : > { %v6369_v36 = vpop.eup %6368  ;;  %v7434_v37 = vpack.c.bf16 %v594_v33, %v591_v29 }
 0x110   : > { %v7437_v39 = vpack.c.bf16 %v586_v35, %v583_v31  ;;  %v743_v40 = vadd.bf16 1065369472, %v6369_v36 }
 0x112   : > { %v6074_v41 = vpop.f32.mrb[16].mxu0  ;;  %6378 = vrcp.bf16 %v743_v40  ;;  %v5590_v18 = vmul.bf16 3216621497, %v7437_v39  ;;  %v6239_v40 = vld [vmem:[%s10352_s3 + $0x108] ss:$40 sps:$4 sm:$0xff]  }
 0x113   : > { %v607_v42 = vadd.f32 %v6074_v41, %v7400_v54  ;;  %v598_v43 = vpop.f32.mrb[17].mxu0  ;;  %6380 = vpow.bf16 %v5589_v57  ;;  %v6253_v57 = vld [vmem:[%s10352_s3 + $0x1ac] ss:$40 sps:$4 sm:$0xff]  }
 0x114   : > { %v599_v44 = vadd.f32 %v7400_v54, %v598_v43  ;;  %v6075_v45 = vpop.f32.mrb[18].mxu0 }
 0x115   : > { %v6371_v46 = vpop.eup %6370  ;;  %v610_v47 = vadd.f32 %v6075_v45, %v7400_v54  ;;  %v601_v48 = vpop.f32.mrb[19].mxu0  ;;  %v5591_v45 = vmul.bf16 3216621497, %v7434_v37 }
 0x116   : > { %v758_v49 = vmul.bf16 1065369472, %v6371_v46  ;;  %v602_v51 = vadd.f32 %v7400_v54, %v601_v48  ;;  %v6373_v52 = vpop.eup %6372  ;;  %v6247_v48 = vld [vmem:[%s10352_s3 + $0x15c] ss:$40 sps:$4 sm:$0xff]  }
 0x117   : > { %v7443_v53 = vpack.c.bf16 %v610_v47, %v607_v42  ;;  %v6375_v60 = vpop.eup %6374  ;;  %v744_v0 = vadd.bf16 1065369472, %v6373_v52  ;;  %v6230_v47 = vld [vmem:[%s10352_s3 + $0x150] ss:$40 sps:$4 sm:$0xff]  }
 0x118   : > { %v7449_v56 = vmul.bf16 %v758_v49, %v7408_v63  ;;  %v7452_v58 = vpack.c.bf16 %v602_v51, %v599_v44  ;;  %v760_v5 = vmul.bf16 1065369472, %v6375_v60  ;;  %v6377_v15 = vpop.eup %6376  ;;  %v6245_v51 = vld [vmem:[%s10352_s3 + $0x158] ss:$40 sps:$4 sm:$0xff]  }
 0x119   : > { %6382 = vrcp.bf16 %v744_v0  ;;  %v745_v25 = vadd.bf16 1065369472, %v6377_v15 }
 0x11a   : > { %946 = vmatmul.mubr.bf16.vlgmr.msra.gmra.mrb[0].mxu1 %v7449_v56  ;;  %1698 = vmatmul.mubr.bf16.vlgmr.msra.gmra.mrb[32].mxu0 %v7449_v56  ;;  %v6078_v63 = vpop.f32.mrb[20].mxu0  ;;  %v7483_v17 = vmul.bf16 %v760_v5, %v7406_v62  ;;  %v6233_v62 = vld [vmem:[%s10352_s3 + $0xb8] ss:$40 sps:$4 sm:$0xff]   ;;  %6384 = vpow.bf16 %v5590_v18  ;;  %v6251_v5 = vld [vmem:[%s10352_s3 + $0x1a8] ss:$40 sps:$4 sm:$0xff]  }
 0x11b   : > { %2414 = vmatpush1.bf16.msra.mxu1 %v6212_v55  ;;  %v623_v2 = vadd.f32 %v6078_v63, %v7400_v54  ;;  %955 = vmatprep.mubr.bf16.mxu1 %v10364_v50  ;;  %v614_v3 = vpop.f32.mrb[21].mxu0  ;;  %6386 = vrcp.bf16 %v745_v25  ;;  %v6254_v18 = vld [vmem:[%s10352_s3 + $0x1f8] ss:$40 sps:$4 sm:$0xff]   ;;  %v6262_v25 = vld [vmem:[%s10352_s3 + $0x24] ss:$40 sps:$4 sm:$0xff]  }
 0x11c   : > { %1707 = vmatprep.mubr.bf16.mxu0 %v10364_v50  ;;  %v615_v6 = vadd.f32 %v7400_v54, %v614_v3  ;;  %v6079_v7 = vpop.f32.mrb[22].mxu0  ;;  %2415 = vmatprep.subr.bf16.mxu1 %v6217_v59  ;;  %6388 = vpow.bf16 %v5591_v45 }
 0x11d   : > { %v626_v9 = vadd.f32 %v6079_v7, %v7400_v54  ;;  %v617_v12 = vpop.f32.mrb[23].mxu0  ;;  %3162 = vmatpush1.bf16.msra.mxu0 %v6221_v61  ;;  %v6379_v22 = vpop.eup %6378 }
 0x11e   : > { %v618_v14 = vadd.f32 %v7400_v54, %v617_v12  ;;  %3163 = vmatprep.subr.bf16.mxu0 %v6229_v1  ;;  %v762_v31 = vmul.bf16 1065369472, %v6379_v22  ;;  %v6381_v42 = vpop.eup %6380  ;;  %v6236_v1 = vld [vmem:[%s10352_s3 + $0x1a0] ss:$40 sps:$4 sm:$0xff]   ;;  %v5592_v12 = vmul.bf16 3216621497, %v7452_v58 }
 0x11f   : > { %v7480_v16 = vpack.c.bf16 %v626_v9, %v623_v2  ;;  %2416 = vmatpush1.bf16.msra.mxu1 %v6215_v4  ;;  %v746_v52 = vadd.bf16 1065369472, %v6381_v42  ;;  %v6244_v4 = vld [vmem:[%s10352_s3 + $0x1f4] ss:$40 sps:$4 sm:$0xff]  }
 0x120   : > { %v7486_v19 = vpack.c.bf16 %v618_v14, %v615_v6  ;;  %2417 = vmatprep.subr.bf16.mxu1 %v6220_v8  ;;  %v7523_v44 = vmul.bf16 %v762_v31, %v7418_v11  ;;  %v6238_v11 = vld [vmem:[%s10352_s3 + $0x1a4] ss:$40 sps:$4 sm:$0xff]   ;;  %v6242_v14 = vld [vmem:[%s10352_s3 + $0x1f0] ss:$40 sps:$4 sm:$0xff]  }
 0x121   : > { %3164 = vmatpush1.bf16.msra.mxu0 %v6227_v13  ;;  %6390 = vrcp.bf16 %v746_v52 }
 0x122   : > { %956 = vmatmul.mubr.bf16.gmra.mrb[4].mxu1 %v7483_v17  ;;  %1708 = vmatmul.mubr.bf16.gmra.mrb[36].mxu0 %v7483_v17  ;;  %v6082_v27 = vpop.f32.mrb[24].mxu0  ;;  %6392 = vpow.bf16 %v5592_v12 }
 0x123   : > { %965 = vmatprep.mubr.bf16.mxu1 %v10364_v50  ;;  %1717 = vmatprep.mubr.bf16.mxu0 %v10364_v50  ;;  %v639_v29 = vadd.f32 %v6082_v27, %v7400_v54  ;;  %v630_v30 = vpop.f32.mrb[25].mxu0 }
 0x124   : > { %v631_v32 = vadd.f32 %v7400_v54, %v630_v30  ;;  %v6083_v33 = vpop.f32.mrb[26].mxu0  ;;  %2418 = vmatpush1.bf16.msra.mxu1 %v6218_v20  ;;  %3165 = vmatprep.subr.bf16.mxu0 %v6235_v21  ;;  %v6383_v49 = vpop.eup %6382  ;;  %v6259_v21 = vld [vmem:[%s10352_s3 + $0x24c] ss:$40 sps:$4 sm:$0xff]  }
 0x125   : > { %v642_v35 = vadd.f32 %v6083_v33, %v7400_v54  ;;  %v633_v36 = vpop.f32.mrb[27].mxu0  ;;  %2419 = vmatprep.subr.bf16.mxu1 %v6226_v24  ;;  %3166 = vmatpush1.bf16.msra.mxu0 %v6233_v62  ;;  %v764_v61 = vmul.bf16 1065369472, %v6383_v49  ;;  %v6385_v7 = vpop.eup %6384  ;;  %v6248_v24 = vld [vmem:[%s10352_s3 + $0x240] ss:$40 sps:$4 sm:$0xff]  }
 0x126   : > { %v634_v41 = vadd.f32 %v7400_v54, %v633_v36  ;;  %3167 = vmatprep.subr.bf16.mxu0 %v6241_v28  ;;  %v6387_v15 = vpop.eup %6386  ;;  %v747_v20 = vadd.bf16 1065369472, %v6385_v7  ;;  %v6257_v62 = vld [vmem:[%s10352_s3 + $0x248] ss:$40 sps:$4 sm:$0xff]  }
 0x127   : > { %v7520_v43 = vpack.c.bf16 %v642_v35, %v639_v29  ;;  %v7563_v9 = vmul.bf16 %v764_v61, %v7416_v10  ;;  %v6250_v10 = vld [vmem:[%s10352_s3 + $0x244] ss:$40 sps:$4 sm:$0xff]   ;;  %v766_v22 = vmul.bf16 1065369472, %v6387_v15  ;;  %v6389_v27 = vpop.eup %6388  ;;  %v5593_v29 = vmul.bf16 3216621497, %v7443_v53 }
 0x128   : > { %v7526_v46 = vpack.c.bf16 %v634_v41, %v631_v32  ;;  %2420 = vmatpush1.bf16.msra.mxu1 %v6224_v34  ;;  %6394 = vrcp.bf16 %v747_v20  ;;  %v748_v31 = vadd.bf16 1065369472, %v6389_v27  ;;  %v5594_v34 = vmul.bf16 3216621497, %v7486_v19 }
 0x129   : > { %2421 = vmatprep.subr.bf16.mxu1 %v6232_v38  ;;  %3168 = vmatpush1.bf16.msra.mxu0 %v6239_v40  ;;  %v7597_v28 = vmul.bf16 %v766_v22, %v7428_v26  ;;  %6396 = vpow.bf16 %v5593_v29 }
 0x12a   : > { %966 = vmatmul.mubr.bf16.gmra.mrb[8].mxu1 %v7523_v44  ;;  %1718 = vmatmul.mubr.bf16.gmra.mrb[40].mxu0 %v7523_v44  ;;  %v6086_v55 = vpop.f32.mrb[28].mxu0  ;;  %6398 = vrcp.bf16 %v748_v31  ;;  %v6268_v31 = vld [vmem:[%s10352_s3 + $0xc4] ss:$40 sps:$4 sm:$0xff]  }
 0x12b   : > { %975 = vmatprep.mubr.bf16.mxu1 %v10364_v50  ;;  %1727 = vmatprep.mubr.bf16.mxu0 %v10364_v50  ;;  %v655_v59 = vadd.f32 %v6086_v55, %v7400_v54  ;;  %v646_v60 = vpop.f32.mrb[29].mxu0  ;;  %6400 = vpow.bf16 %v5594_v34  ;;  %v6269_v34 = vld [vmem:[%s10352_s3 + $0x110] ss:$40 sps:$4 sm:$0xff]  }
 0x12c   : > { %v647_v0 = vadd.f32 %v7400_v54, %v646_v60  ;;  %v6087_v63 = vpop.f32.mrb[30].mxu0  ;;  %2422 = vmatpush1.bf16.msra.mxu1 %v6230_v47  ;;  %3169 = vmatprep.subr.bf16.mxu0 %v6247_v48  ;;  %v6391_v30 = vpop.eup %6390 }
 0x12d   : > { %v658_v2 = vadd.f32 %v6087_v63, %v7400_v54  ;;  %v649_v3 = vpop.f32.mrb[31].mxu0  ;;  %2423 = vmatprep.subr.bf16.mxu1 %v6238_v11  ;;  %3170 = vmatpush1.bf16.msra.mxu0 %v6245_v51  ;;  %v768_v32 = vmul.bf16 1065369472, %v6391_v30  ;;  %v6393_v26 = vpop.eup %6392  ;;  %v6265_v30 = vld [vmem:[%s10352_s3 + $0x74] ss:$40 sps:$4 sm:$0xff]  }
 0x12e   : > { %v650_v6 = vadd.f32 %v7400_v54, %v649_v3  ;;  %3171 = vmatprep.subr.bf16.mxu0 %v6253_v57  ;;  %v6256_v54 = vld [vmem:[%s10352_s3 + $0x1fc] ss:$40 sps:$4 sm:$0xff]   ;;  %v749_v36 = vadd.bf16 1065369472, %v6393_v26 }
 0x12f   : > { %v7560_v8 = vpack.c.bf16 %v658_v2, %v655_v59  ;;  %v7605_v33 = vmul.bf16 %v768_v32, %v7425_v23  ;;  %v5595_v23 = vmul.bf16 3216621497, %v7480_v16  ;;  %v6266_v32 = vld [vmem:[%s10352_s3 + $0xc0] ss:$40 sps:$4 sm:$0xff]   ;;  %v6271_v26 = vld [vmem:[%s10352_s3 + $0x114] ss:$40 sps:$4 sm:$0xff]  }
 0x130   : > { %v7566_v13 = vpack.c.bf16 %v650_v6, %v647_v0  ;;  %2424 = vmatpush1.bf16.msra.mxu1 %v6236_v1  ;;  %6402 = vrcp.bf16 %v749_v36  ;;  %v6272_v36 = vld [vmem:[%s10352_s3 + $0x160] ss:$40 sps:$4 sm:$0xff]  }
 0x131   : > { %2425 = vmatprep.subr.bf16.mxu1 %v6244_v4  ;;  %3172 = vmatpush1.bf16.msra.mxu0 %v6251_v5  ;;  %6404 = vpow.bf16 %v5595_v23  ;;  %v6280_v23 = vld [vmem:[%s10352_s3 + $0x204] ss:$40 sps:$4 sm:$0xff]  }
 0x132   : > { %976 = vmatmul.mubr.bf16.gmra.mrb[12].mxu1 %v7563_v9  ;;  %1728 = vmatmul.mubr.bf16.gmra.mrb[44].mxu0 %v7563_v9 }
 0x133   : > { %985 = vmatprep.mubr.bf16.mxu1 %v10364_v50  ;;  %1737 = vmatprep.mubr.bf16.mxu0 %v10364_v50  ;;  %v6395_v35 = vpop.eup %6394 }
 0x134   : > { %2426 = vmatpush1.bf16.msra.mxu1 %v6242_v14  ;;  %3173 = vmatprep.subr.bf16.mxu0 %v6256_v54  ;;  %v770_v38 = vmul.bf16 1065369472, %v6395_v35  ;;  %v6397_v40 = vpop.eup %6396  ;;  %v6274_v35 = vld [vmem:[%s10352_s3 + $0x164] ss:$40 sps:$4 sm:$0xff]  }
 0x135   : > { %2427 = vmatprep.subr.bf16.mxu1 %v6250_v10  ;;  %3174 = vmatpush1.bf16.msra.mxu0 %v6254_v18  ;;  %v6399_v42 = vpop.eup %6398  ;;  %v750_v45 = vadd.bf16 1065369472, %v6397_v40  ;;  %v6275_v40 = vld [vmem:[%s10352_s3 + $0x1b0] ss:$40 sps:$4 sm:$0xff]  }
 0x136   : > { %3175 = vmatprep.subr.bf16.mxu0 %v6259_v21  ;;  %v7613_v41 = vmul.bf16 %v770_v38, %v7437_v39  ;;  %v772_v47 = vmul.bf16 1065369472, %v6399_v42  ;;  %v6401_v48 = vpop.eup %6400  ;;  %v5596_v39 = vmul.bf16 3216621497, %v7526_v46  ;;  %v6277_v38 = vld [vmem:[%s10352_s3 + $0x1b4] ss:$40 sps:$4 sm:$0xff]  }
 0x137   : > { %6406 = vrcp.bf16 %v750_v45  ;;  %v751_v51 = vadd.bf16 1065369472, %v6401_v48  ;;  %v6278_v42 = vld [vmem:[%s10352_s3 + $0x200] ss:$40 sps:$4 sm:$0xff]   ;;  %v6283_v45 = vld [vmem:[%s10352_s3 + $0x254] ss:$40 sps:$4 sm:$0xff]   ;;  %v10357_v48 = vlaneseq }
 0x138   : > { %2428 = vmatpush1.bf16.msra.mxu1 %v6248_v24  ;;  %10386 = vst [vmem:[#allocation6_spill] sm:$0xff] %v7613_v41  ;;  %v7621_v49 = vmul.bf16 %v772_v47, %v7434_v37  ;;  %6408 = vpow.bf16 %v5596_v39  ;;  %v5597_v37 = vmul.bf16 3216621497, %v7520_v43  ;;  %v6281_v47 = vld [vmem:[%s10352_s3 + $0x250] ss:$40 sps:$4 sm:$0xff]  }
 0x139   : > { %3176 = vmatpush1.bf16.msra.mxu0 %v6257_v62  ;;  %3909 = vmatprep.subr.bf16.mxu1 %v6262_v25  ;;  %6410 = vrcp.bf16 %v751_v51  ;;  %v7773_v39 = vshrl.u32 %v10357_v48, 7  ;;  %v821_v51 = vld [vmem:[%s10353_s4] sm:$0x3] }
 0x13a   : > { %986 = vmatmul.mubr.bf16.gmra.mrb[16].mxu1 %v7597_v28  ;;  %1738 = vmatmul.mubr.bf16.gmra.mrb[48].mxu0 %v7597_v28  ;;  %10387 = vst [vmem:[#allocation7_spill] sm:$0xff] %v7621_v49  ;;  %6412 = vpow.bf16 %v5597_v37 }
 0x13b   : > { %995 = vmatprep.mubr.bf16.mxu1 %v10364_v50  ;;  %1747 = vmatprep.mubr.bf16.mxu0 %v10364_v50  ;;  %v6403_v11 = vpop.eup %6402  ;;  %10396 = vst [vmem:[#allocation16_spill] sm:$0xff] %v7773_v39 }
 0x13c   : > { %v774_v52 = vmul.bf16 1065369472, %v6403_v11  ;;  %v6405_v55 = vpop.eup %6404  ;;  %v7776_v11 = vsub.s32 0, %v7773_v39 }
 0x13d   : > { %v752_v60 = vadd.bf16 1065369472, %v6405_v55  ;;  %v7785_v55 = vsub.s32 1, %v7773_v39 }
 0x13e   : > { %v7629_v57 = vmul.bf16 %v774_v52, %v7452_v58  ;;  %v5598_v58 = vmul.bf16 3216621497, %v7566_v13  ;;  %10397 = vst [vmem:[#allocation17_spill] sm:$0xff] %v7776_v11  ;;  %v1573_v52 = vld [vmem:[%s10353_s4 + $0x2] sm:$0x3]  ;;  %v7792_v37 = vrot.slane %v821_v51, %v7776_v11 }
 0x13f   : > { %6414 = vrcp.bf16 %v752_v60  ;;  %10398 = vst [vmem:[#allocation18_spill] sm:$0xff] %v7785_v55 }
 0x140   : > { %10388 = vst [vmem:[#allocation8_spill] sm:$0xff] %v7629_v57  ;;  %6416 = vpow.bf16 %v5598_v58  ;;  %v7801_v58 = vrot.slane %v1573_v52, %v7785_v55 }
 0x142   : > { %996 = vmatmul.mubr.bf16.gmra.mrb[20].mxu1 %v7605_v33  ;;  %1748 = vmatmul.mubr.bf16.gmra.mrb[52].mxu0 %v7605_v33  ;;  %v6407_v59 = vpop.eup %6406 }
 0x143   : > { %1005 = vmatprep.mubr.bf16.mxu1 %v10364_v50  ;;  %1757 = vmatprep.mubr.bf16.mxu0 %v10364_v50  ;;  %v776_v61 = vmul.bf16 1065369472, %v6407_v59  ;;  %v6409_v0 = vpop.eup %6408  ;;  %v7795_v59 = vrot.slane %v1573_v52, %v7776_v11 }
 0x144   : > { %v6411_v1 = vpop.eup %6410  ;;  %v753_v2 = vadd.bf16 1065369472, %v6409_v0  ;;  %v7798_v0 = vrot.slane %v821_v51, %v7785_v55 }
 0x145   : > { %v7637_v63 = vmul.bf16 %v776_v61, %v7443_v53  ;;  %v778_v3 = vmul.bf16 1065369472, %v6411_v1  ;;  %v6413_v4 = vpop.eup %6412  ;;  %v5599_v53 = vmul.bf16 3216621497, %v7560_v8 }
 0x146   : > { %6418 = vrcp.bf16 %v753_v2  ;;  %v754_v7 = vadd.bf16 1065369472, %v6413_v4 }
 0x147   : > { %10389 = vst [vmem:[#allocation9_spill] sm:$0xff] %v7637_v63  ;;  %v7645_v5 = vmul.bf16 %v778_v3, %v7486_v19  ;;  %6420 = vpow.bf16 %v5599_v53 }
 0x148   : > { %6422 = vrcp.bf16 %v754_v7 }
 0x149   : > { %10390 = vst [vmem:[#allocation10_spill] sm:$0xff] %v7645_v5 }
 0x14a   : > { %1006 = vmatmul.mubr.bf16.gmra.mrb[24].mxu1 %v7613_v41  ;;  %1758 = vmatmul.mubr.bf16.gmra.mrb[56].mxu0 %v7613_v41  ;;  %v6415_v6 = vpop.eup %6414 }
 0x14b   : > { %1015 = vmatprep.mubr.bf16.mxu1 %v10364_v50  ;;  %1767 = vmatprep.mubr.bf16.mxu0 %v10364_v50  ;;  %v780_v12 = vmul.bf16 1065369472, %v6415_v6  ;;  %v6417_v14 = vpop.eup %6416 }
 0x14c   : > { %v755_v15 = vadd.bf16 1065369472, %v6417_v14 }
 0x14d   : > { %v7653_v54 = vmul.bf16 %v780_v12, %v7480_v16 }
 0x14e   : > { %6424 = vrcp.bf16 %v755_v15 }
 0x14f   : > { %10391 = vst [vmem:[#allocation11_spill] sm:$0xff] %v7653_v54 }
 0x151   : > { %v6419_v19 = vpop.eup %6418 }
 0x152   : > { %1016 = vmatmul.mubr.bf16.gmra.mrb[28].mxu1 %v7621_v49  ;;  %1768 = vmatmul.mubr.bf16.gmra.mrb[60].mxu0 %v7621_v49  ;;  %v782_v10 = vmul.bf16 1065369472, %v6419_v19  ;;  %v6421_v18 = vpop.eup %6420 }
 0x153   : > { %1025 = vmatprep.mubr.bf16.mxu1 %v10364_v50  ;;  %1777 = vmatprep.mubr.bf16.mxu0 %v10364_v50  ;;  %v6423_v21 = vpop.eup %6422  ;;  %v756_v22 = vadd.bf16 1065369472, %v6421_v18 }
 0x154   : > { %v7660_v20 = vmul.bf16 %v782_v10, %v7526_v46  ;;  %v784_v16 = vmul.bf16 1065369472, %v6423_v21 }
 0x155   : > { %6426 = vrcp.bf16 %v756_v22 }
 0x156   : > { %10392 = vst [vmem:[#allocation12_spill] sm:$0xff] %v7660_v20  ;;  %v7667_v24 = vmul.bf16 %v784_v16, %v7520_v43 }
 0x158   : > { %10393 = vst [vmem:[#allocation13_spill] sm:$0xff] %v7667_v24 }
 0x159   : > { %v6425_v62 = vpop.eup %6424 }
 0x15a   : > { %1026 = vmatmul.mubr.bf16.gmra.mrb[32].mxu1 %v7629_v57  ;;  %1778 = vmatmul.mubr.bf16.gmra.mrb[64].mxu0 %v7629_v57  ;;  %v786_v46 = vmul.bf16 1065369472, %v6425_v62 }
 0x15b   : > { %1035 = vmatprep.mubr.bf16.mxu1 %v10364_v50  ;;  %1787 = vmatprep.mubr.bf16.mxu0 %v10364_v50 }
 0x15c   : > { %v7674_v25 = vmul.bf16 %v786_v46, %v7566_v13  ;;  %v6260_v13 = vld [vmem:[%s10352_s3 + $0x20] ss:$40 sps:$4 sm:$0xff]  }
 0x15e   : > { %10394 = vst [vmem:[#allocation14_spill] sm:$0xff] %v7674_v25 }
 0x160   : > { %v6427_v27 = vpop.eup %6426 }
 0x161   : > { %v788_v43 = vmul.bf16 1065369472, %v6427_v27 }
 0x162   : > { %1036 = vmatmul.mubr.bf16.gmra.mrb[36].mxu1 %v7637_v63  ;;  %1788 = vmatmul.mubr.bf16.gmra.mrb[68].mxu0 %v7637_v63 }
 0x163   : > { %1045 = vmatprep.mubr.bf16.mxu1 %v10364_v50  ;;  %1797 = vmatprep.mubr.bf16.mxu0 %v10364_v50  ;;  %v7681_v29 = vmul.bf16 %v788_v43, %v7560_v8  ;;  %v6263_v8 = vld [vmem:[%s10352_s3 + $0x70] ss:$40 sps:$4 sm:$0xff]  }
 0x165   : > { %10395 = vst [vmem:[#allocation15_spill] sm:$0xff] %v7681_v29 }
 0x16a   : > { %1046 = vmatmul.mubr.bf16.gmra.mrb[40].mxu1 %v7645_v5  ;;  %1798 = vmatmul.mubr.bf16.gmra.mrb[72].mxu0 %v7645_v5 }
 0x16b   : > { %1055 = vmatprep.mubr.bf16.mxu1 %v10364_v50  ;;  %1807 = vmatprep.mubr.bf16.mxu0 %v10364_v50 }
 0x172   : > { %1056 = vmatmul.mubr.bf16.gmra.mrb[44].mxu1 %v7653_v54  ;;  %1808 = vmatmul.mubr.bf16.gmra.mrb[76].mxu0 %v7653_v54 }
 0x173   : > { %1065 = vmatprep.mubr.bf16.mxu1 %v10364_v50  ;;  %1817 = vmatprep.mubr.bf16.mxu0 %v10364_v50 }
 0x17a   : > { %1066 = vmatmul.mubr.bf16.gmra.mrb[48].mxu1 %v7660_v20  ;;  %1818 = vmatmul.mubr.bf16.gmra.mrb[80].mxu0 %v7660_v20 }
 0x17b   : > { %1075 = vmatprep.mubr.bf16.mxu1 %v10364_v50  ;;  %1827 = vmatprep.mubr.bf16.mxu0 %v10364_v50 }
 0x182   : > { %1076 = vmatmul.mubr.bf16.gmra.mrb[52].mxu1 %v7667_v24  ;;  %1828 = vmatmul.mubr.bf16.gmra.mrb[84].mxu0 %v7667_v24 }
 0x183   : > { %1085 = vmatprep.mubr.bf16.mxu1 %v10364_v50  ;;  %1837 = vmatprep.mubr.bf16.mxu0 %v10364_v50 }
 0x18a   : > { %1086 = vmatmul.mubr.bf16.gmra.mrb[56].mxu1 %v7674_v25  ;;  %1838 = vmatmul.mubr.bf16.gmra.mrb[88].mxu0 %v7674_v25 }
 0x18b   : > { %1095 = vmatprep.mubr.bf16.mxu1 %v10364_v50  ;;  %1847 = vmatprep.mubr.bf16.mxu0 %v10364_v50 }
 0x192   : > { %1096 = vmatmul.mubr.bf16.gmra.mrb[60].mxu1 %v7681_v29  ;;  %1848 = vmatmul.mubr.bf16.gmra.mrb[92].mxu0 %v7681_v29 }
 0x193   : > { %2445 = vmatprep.mubr.bf16.mxu1 %v10364_v50  ;;  %3193 = vmatprep.mubr.bf16.mxu0 %v10364_v50 }
 0x19a   : > { %2446 = vmatmul.mubr.bf16.vlgmr.msra.gmra.mrb[64].mxu1 %v7449_v56  ;;  %3194 = vmatmul.mubr.bf16.vlgmr.msra.gmra.mrb[96].mxu0 %v7449_v56 }
 0x19b   : > { %3910 = vmatpush1.bf16.msra.mxu1 %v6260_v13  ;;  %2455 = vmatprep.mubr.bf16.mxu1 %v10364_v50 }
 0x19c   : > { %3203 = vmatprep.mubr.bf16.mxu0 %v10364_v50  ;;  %3911 = vmatprep.subr.bf16.mxu1 %v6265_v30 }
 0x19f   : > { %3912 = vmatpush1.bf16.msra.mxu1 %v6263_v8 }
 0x1a0   : > { %3913 = vmatprep.subr.bf16.mxu1 %v6268_v31 }
 0x1a2   : > { %2456 = vmatmul.mubr.bf16.gmra.mrb[68].mxu1 %v7483_v17  ;;  %3204 = vmatmul.mubr.bf16.gmra.mrb[100].mxu0 %v7483_v17 }
 0x1a3   : > { %2465 = vmatprep.mubr.bf16.mxu1 %v10364_v50  ;;  %3213 = vmatprep.mubr.bf16.mxu0 %v10364_v50 }
 0x1a4   : > { %3914 = vmatpush1.bf16.msra.mxu1 %v6266_v32 }
 0x1a5   : > { %3915 = vmatprep.subr.bf16.mxu1 %v6271_v26 }
 0x1a8   : > { %3916 = vmatpush1.bf16.msra.mxu1 %v6269_v34 }
 0x1a9   : > { %3917 = vmatprep.subr.bf16.mxu1 %v6274_v35 }
 0x1aa   : > { %2466 = vmatmul.mubr.bf16.gmra.mrb[72].mxu1 %v7523_v44  ;;  %3214 = vmatmul.mubr.bf16.gmra.mrb[104].mxu0 %v7523_v44 }
 0x1ab   : > { %2475 = vmatprep.mubr.bf16.mxu1 %v10364_v50  ;;  %3223 = vmatprep.mubr.bf16.mxu0 %v10364_v50 }
 0x1ac   : > { %3918 = vmatpush1.bf16.msra.mxu1 %v6272_v36 }
 0x1ad   : > { %3919 = vmatprep.subr.bf16.mxu1 %v6277_v38 }
 0x1b0   : > { %3920 = vmatpush1.bf16.msra.mxu1 %v6275_v40 }
 0x1b1   : > { %3921 = vmatprep.subr.bf16.mxu1 %v6280_v23 }
 0x1b2   : > { %2476 = vmatmul.mubr.bf16.gmra.mrb[76].mxu1 %v7563_v9  ;;  %3224 = vmatmul.mubr.bf16.gmra.mrb[108].mxu0 %v7563_v9 }
 0x1b3   : > { %2485 = vmatprep.mubr.bf16.mxu1 %v10364_v50  ;;  %3233 = vmatprep.mubr.bf16.mxu0 %v10364_v50 }
 0x1b4   : > { %3922 = vmatpush1.bf16.msra.mxu1 %v6278_v42 }
 0x1b5   : > { %3923 = vmatprep.subr.bf16.mxu1 %v6283_v45 }
 0x1b8   : > { %3924 = vmatpush1.bf16.msra.mxu1 %v6281_v47 }
 0x1ba   : > { %2486 = vmatmul.mubr.bf16.gmra.mrb[80].mxu1 %v7597_v28  ;;  %3234 = vmatmul.mubr.bf16.gmra.mrb[112].mxu0 %v7597_v28 }
 0x1bb   : > { %2495 = vmatprep.mubr.bf16.mxu1 %v10364_v50  ;;  %3243 = vmatprep.mubr.bf16.mxu0 %v10364_v50 }
 0x1c2   : > { %2496 = vmatmul.mubr.bf16.gmra.mrb[84].mxu1 %v7605_v33  ;;  %3244 = vmatmul.mubr.bf16.gmra.mrb[116].mxu0 %v7605_v33 }
 0x1c3   : > { %2505 = vmatprep.mubr.bf16.mxu1 %v10364_v50  ;;  %3253 = vmatprep.mubr.bf16.mxu0 %v10364_v50 }
 0x1ca   : > { %2506 = vmatmul.mubr.bf16.gmra.mrb[88].mxu1 %v7613_v41  ;;  %3254 = vmatmul.mubr.bf16.gmra.mrb[120].mxu0 %v7613_v41 }
 0x1cb   : > { %2515 = vmatprep.mubr.bf16.mxu1 %v10364_v50  ;;  %3263 = vmatprep.mubr.bf16.mxu0 %v10364_v50 }
 0x1d2   : > { %2516 = vmatmul.mubr.bf16.gmra.mrb[92].mxu1 %v7621_v49  ;;  %3264 = vmatmul.mubr.bf16.gmra.mrb[124].mxu0 %v7621_v49 }
 0x1d3   : > { %2525 = vmatprep.mubr.bf16.mxu1 %v10364_v50  ;;  %3273 = vmatprep.mubr.bf16.mxu0 %v10364_v50 }
 0x1da   : > { %2526 = vmatmul.mubr.bf16.gmra.mrb[96].mxu1 %v7629_v57  ;;  %3274 = vmatmul.mubr.bf16.gmra.mrb[128].mxu0 %v7629_v57 }
 0x1db   : > { %2535 = vmatprep.mubr.bf16.mxu1 %v10364_v50  ;;  %3283 = vmatprep.mubr.bf16.mxu0 %v10364_v50 }
 0x1e2   : > { %2536 = vmatmul.mubr.bf16.gmra.mrb[100].mxu1 %v7637_v63  ;;  %3284 = vmatmul.mubr.bf16.gmra.mrb[132].mxu0 %v7637_v63 }
 0x1e3   : > { %2545 = vmatprep.mubr.bf16.mxu1 %v10364_v50  ;;  %3293 = vmatprep.mubr.bf16.mxu0 %v10364_v50 }
 0x1ea   : > { %2546 = vmatmul.mubr.bf16.gmra.mrb[104].mxu1 %v7645_v5  ;;  %3294 = vmatmul.mubr.bf16.gmra.mrb[136].mxu0 %v7645_v5 }
 0x1eb   : > { %2555 = vmatprep.mubr.bf16.mxu1 %v10364_v50  ;;  %3303 = vmatprep.mubr.bf16.mxu0 %v10364_v50 }
 0x1ed   : > { %v947_v60 = vpop.f32.mrb[0].mxu1  ;;  %v1699_v61 = vpop.f32.mrb[32].mxu0 }
 0x1ee   : > { %v949_v1 = vpop.f32.mrb[1].mxu1  ;;  %v1701_v2 = vpop.f32.mrb[33].mxu0  ;;  %v948_v53 = vadd.f32 %v947_v60, %v7792_v37  ;;  %v1700_v6 = vadd.f32 %v1699_v61, %v7795_v59 }
 0x1ef   : > { %v951_v3 = vpop.f32.mrb[2].mxu1  ;;  %v1703_v4 = vpop.f32.mrb[34].mxu0  ;;  %v950_v15 = vadd.f32 %v949_v1, %v7798_v0  ;;  %v1702_v10 = vadd.f32 %v1701_v2, %v7801_v58 }
 0x1f0   : > { %v952_v7 = vadd.f32 %v951_v3, %v7792_v37  ;;  %v1704_v12 = vadd.f32 %v1703_v4, %v7795_v59  ;;  %v953_v14 = vpop.f32.mrb[3].mxu1  ;;  %v1705_v19 = vpop.f32.mrb[35].mxu0 }
 0x1f1   : > { %v954_v18 = vadd.f32 %v953_v14, %v7798_v0  ;;  %v1706_v21 = vadd.f32 %v1705_v19, %v7801_v58 }
 0x1f2   : > { %v7811_v22 = vpack.c.bf16 %v952_v7, %v948_v53  ;;  %v7813_v16 = vpack.c.bf16 %v1704_v12, %v1700_v6  ;;  %2556 = vmatmul.mubr.bf16.gmra.mrb[108].mxu1 %v7653_v54  ;;  %3304 = vmatmul.mubr.bf16.gmra.mrb[140].mxu0 %v7653_v54 }
 0x1f3   : > { %v7817_v62 = vpack.c.bf16 %v954_v18, %v950_v15  ;;  %v7819_v46 = vpack.c.bf16 %v1706_v21, %v1702_v10  ;;  %2565 = vmatprep.mubr.bf16.mxu1 %v10364_v50  ;;  %3313 = vmatprep.mubr.bf16.mxu0 %v10364_v50 }
 0x1f4   : > { %v5616_v27 = vmul.bf16 3216621497, %v7811_v22  ;;  %v5664_v43 = vmul.bf16 3216621497, %v7813_v16 }
 0x1f5   : > { %v5617_v13 = vmul.bf16 3216621497, %v7817_v62  ;;  %v5665_v30 = vmul.bf16 3216621497, %v7819_v46  ;;  %v957_v8 = vpop.f32.mrb[4].mxu1  ;;  %v1709_v31 = vpop.f32.mrb[36].mxu0 }
 0x1f6   : > { %6428 = vpow.bf16 %v5616_v27  ;;  %v959_v32 = vpop.f32.mrb[5].mxu1  ;;  %v1711_v26 = vpop.f32.mrb[37].mxu0  ;;  %v958_v34 = vadd.f32 %v957_v8, %v7792_v37  ;;  %v1710_v35 = vadd.f32 %v1709_v31, %v7795_v59 }
 0x1f7   : > { %6430 = vpow.bf16 %v5664_v43  ;;  %v961_v36 = vpop.f32.mrb[6].mxu1  ;;  %v1713_v38 = vpop.f32.mrb[38].mxu0  ;;  %v960_v40 = vadd.f32 %v959_v32, %v7798_v0  ;;  %v1712_v51 = vadd.f32 %v1711_v26, %v7801_v58 }
 0x1f8   : > { %6432 = vpow.bf16 %v5617_v13  ;;  %v962_v23 = vadd.f32 %v961_v36, %v7792_v37  ;;  %v1714_v42 = vadd.f32 %v1713_v38, %v7795_v59  ;;  %v963_v45 = vpop.f32.mrb[7].mxu1  ;;  %v1715_v47 = vpop.f32.mrb[39].mxu0 }
 0x1f9   : > { %6434 = vpow.bf16 %v5665_v30  ;;  %v964_v52 = vadd.f32 %v963_v45, %v7798_v0  ;;  %v1716_v60 = vadd.f32 %v1715_v47, %v7801_v58 }
 0x1fa   : > { %v7835_v61 = vpack.c.bf16 %v962_v23, %v958_v34  ;;  %v7837_v1 = vpack.c.bf16 %v1714_v42, %v1710_v35  ;;  %2566 = vmatmul.mubr.bf16.gmra.mrb[112].mxu1 %v7660_v20  ;;  %3314 = vmatmul.mubr.bf16.gmra.mrb[144].mxu0 %v7660_v20 }
 0x1fb   : > { %v7841_v2 = vpack.c.bf16 %v964_v52, %v960_v40  ;;  %v7843_v3 = vpack.c.bf16 %v1716_v60, %v1712_v51  ;;  %2575 = vmatprep.mubr.bf16.mxu1 %v10364_v50  ;;  %3323 = vmatprep.mubr.bf16.mxu0 %v10364_v50 }
 0x1fc   : > { %v5618_v4 = vmul.bf16 3216621497, %v7835_v61  ;;  %v5666_v53 = vmul.bf16 3216621497, %v7837_v1 }
 0x1fd   : > { %v5619_v6 = vmul.bf16 3216621497, %v7841_v2  ;;  %v5667_v7 = vmul.bf16 3216621497, %v7843_v3  ;;  %v967_v12 = vpop.f32.mrb[8].mxu1  ;;  %v1719_v14 = vpop.f32.mrb[40].mxu0 }
 0x1fe   : > { %6436 = vpow.bf16 %v5618_v4  ;;  %v969_v19 = vpop.f32.mrb[9].mxu1  ;;  %v1721_v15 = vpop.f32.mrb[41].mxu0  ;;  %v968_v10 = vadd.f32 %v967_v12, %v7792_v37  ;;  %v1720_v18 = vadd.f32 %v1719_v14, %v7795_v59 }
 0x1ff   : > { %6438 = vpow.bf16 %v5666_v53  ;;  %v971_v21 = vpop.f32.mrb[10].mxu1  ;;  %v1723_v27 = vpop.f32.mrb[42].mxu0  ;;  %v970_v43 = vadd.f32 %v969_v19, %v7798_v0  ;;  %v1722_v26 = vadd.f32 %v1721_v15, %v7801_v58 }
 0x200   : > { %6440 = vpow.bf16 %v5619_v6  ;;  %v972_v13 = vadd.f32 %v971_v21, %v7792_v37  ;;  %v1724_v30 = vadd.f32 %v1723_v27, %v7795_v59  ;;  %v973_v8 = vpop.f32.mrb[11].mxu1  ;;  %v1725_v31 = vpop.f32.mrb[43].mxu0 }
 0x201   : > { %v6429_v32 = vpop.eup %6428  ;;  %6442 = vpow.bf16 %v5667_v7  ;;  %v974_v34 = vadd.f32 %v973_v8, %v7798_v0  ;;  %v1726_v35 = vadd.f32 %v1725_v31, %v7801_v58 }
 0x202   : > { %v6431_v36 = vpop.eup %6430  ;;  %v1266_v38 = vadd.bf16 1065369472, %v6429_v32  ;;  %v7859_v40 = vpack.c.bf16 %v972_v13, %v968_v10  ;;  %v7861_v23 = vpack.c.bf16 %v1724_v30, %v1720_v18  ;;  %2576 = vmatmul.mubr.bf16.gmra.mrb[116].mxu1 %v7667_v24  ;;  %3324 = vmatmul.mubr.bf16.gmra.mrb[148].mxu0 %v7667_v24 }
 0x203   : > { %v6433_v42 = vpop.eup %6432  ;;  %v2018_v45 = vadd.bf16 1065369472, %v6431_v36  ;;  %v7865_v47 = vpack.c.bf16 %v974_v34, %v970_v43  ;;  %v7867_v51 = vpack.c.bf16 %v1726_v35, %v1722_v26  ;;  %2585 = vmatprep.mubr.bf16.mxu1 %v10364_v50  ;;  %3333 = vmatprep.mubr.bf16.mxu0 %v10364_v50 }
 0x204   : > { %v6435_v52 = vpop.eup %6434  ;;  %6444 = vrcp.bf16 %v1266_v38  ;;  %v1267_v60 = vadd.bf16 1065369472, %v6433_v42  ;;  %v5620_v4 = vmul.bf16 3216621497, %v7859_v40  ;;  %v5668_v6 = vmul.bf16 3216621497, %v7861_v23 }
 0x205   : > { %6446 = vrcp.bf16 %v2018_v45  ;;  %v2019_v53 = vadd.bf16 1065369472, %v6435_v52  ;;  %v5621_v7 = vmul.bf16 3216621497, %v7865_v47  ;;  %v977_v12 = vpop.f32.mrb[12].mxu1  ;;  %v1729_v14 = vpop.f32.mrb[44].mxu0 }
 0x206   : > { %6448 = vrcp.bf16 %v1267_v60  ;;  %v5669_v19 = vmul.bf16 3216621497, %v7867_v51  ;;  %v979_v15 = vpop.f32.mrb[13].mxu1  ;;  %v1731_v10 = vpop.f32.mrb[45].mxu0  ;;  %v978_v18 = vadd.f32 %v977_v12, %v7792_v37  ;;  %v1730_v21 = vadd.f32 %v1729_v14, %v7795_v59 }
 0x207   : > { %6450 = vrcp.bf16 %v2019_v53  ;;  %v980_v27 = vadd.f32 %v979_v15, %v7798_v0  ;;  %v981_v43 = vpop.f32.mrb[14].mxu1  ;;  %v1733_v13 = vpop.f32.mrb[46].mxu0  ;;  %v1732_v8 = vadd.f32 %v1731_v10, %v7801_v58 }
 0x208   : > { %6452 = vpow.bf16 %v5620_v4  ;;  %v982_v31 = vadd.f32 %v981_v43, %v7792_v37  ;;  %v1734_v32 = vadd.f32 %v1733_v13, %v7795_v59  ;;  %v983_v26 = vpop.f32.mrb[15].mxu1  ;;  %v1735_v34 = vpop.f32.mrb[47].mxu0 }
 0x209   : > { %v6437_v30 = vpop.eup %6436  ;;  %6454 = vpow.bf16 %v5668_v6  ;;  %v984_v38 = vadd.f32 %v983_v26, %v7798_v0  ;;  %v1736_v42 = vadd.f32 %v1735_v34, %v7801_v58 }
 0x20a   : > { %v6439_v35 = vpop.eup %6438  ;;  %v1268_v36 = vadd.bf16 1065369472, %v6437_v30  ;;  %6456 = vpow.bf16 %v5621_v7  ;;  %2586 = vmatmul.mubr.bf16.gmra.mrb[120].mxu1 %v7674_v25  ;;  %3334 = vmatmul.mubr.bf16.gmra.mrb[152].mxu0 %v7674_v25  ;;  %v7885_v60 = vpack.c.bf16 %v982_v31, %v978_v18  ;;  %v7887_v4 = vpack.c.bf16 %v1734_v32, %v1730_v21 }
 0x20b   : > { %v6441_v45 = vpop.eup %6440  ;;  %v2020_v52 = vadd.bf16 1065369472, %v6439_v35  ;;  %6458 = vpow.bf16 %v5669_v19  ;;  %2595 = vmatprep.mubr.bf16.mxu1 %v10364_v50  ;;  %3343 = vmatprep.mubr.bf16.mxu0 %v10364_v50  ;;  %v7891_v7 = vpack.c.bf16 %v984_v38, %v980_v27  ;;  %v7893_v12 = vpack.c.bf16 %v1736_v42, %v1732_v8 }
 0x20c   : > { %v6443_v53 = vpop.eup %6442  ;;  %6460 = vrcp.bf16 %v1268_v36  ;;  %v1269_v6 = vadd.bf16 1065369472, %v6441_v45  ;;  %v5622_v15 = vmul.bf16 3216621497, %v7885_v60  ;;  %v5670_v19 = vmul.bf16 3216621497, %v7887_v4 }
 0x20d   : > { %6462 = vrcp.bf16 %v2020_v52  ;;  %v2021_v14 = vadd.bf16 1065369472, %v6443_v53  ;;  %v5623_v10 = vmul.bf16 3216621497, %v7891_v7  ;;  %v987_v18 = vpop.f32.mrb[16].mxu1  ;;  %v1739_v21 = vpop.f32.mrb[48].mxu0 }
 0x20e   : > { %6464 = vrcp.bf16 %v1269_v6  ;;  %v5671_v13 = vmul.bf16 3216621497, %v7893_v12  ;;  %v988_v27 = vadd.f32 %v987_v18, %v7792_v37  ;;  %v7901_v30 = vadd.f32 %v1739_v21, %v7795_v59  ;;  %v989_v8 = vpop.f32.mrb[17].mxu1  ;;  %v1741_v31 = vpop.f32.mrb[49].mxu0 }
 0x20f   : > { %v6445_v43 = vpop.eup %6444  ;;  %6466 = vrcp.bf16 %v2021_v14  ;;  %v7904_v34 = vadd.f32 %v989_v8, %v7798_v0  ;;  %v7907_v35 = vadd.f32 %v1741_v31, %v7801_v58  ;;  %v991_v36 = vpop.f32.mrb[18].mxu1 }
 0x210   : > { %v6447_v32 = vpop.eup %6446  ;;  %v1299_v26 = vmul.bf16 1065369472, %v6445_v43  ;;  %6468 = vpow.bf16 %v5622_v15  ;;  %v1743_v38 = vpop.f32.mrb[50].mxu0  ;;  %v992_v52 = vadd.f32 %v991_v36, %v7792_v37 }
 0x211   : > { %v6449_v42 = vpop.eup %6448  ;;  %v2051_v45 = vmul.bf16 1065369472, %v6447_v32  ;;  %6470 = vpow.bf16 %v5670_v19  ;;  %v1744_v53 = vadd.f32 %v1743_v38, %v7795_v59  ;;  %v993_v6 = vpop.f32.mrb[19].mxu1 }
 0x212   : > { %v7911_v14 = vpop.f32.mrb[51].mxu0  ;;  %v6451_v18 = vpop.eup %6450  ;;  %v1362_v15 = vmul.bf16 %v1299_v26, %v7811_v22  ;;  %v1301_v21 = vmul.bf16 1065369472, %v6449_v42  ;;  %6472 = vpow.bf16 %v5623_v10  ;;  %v994_v43 = vadd.f32 %v993_v6, %v7798_v0  ;;  %2596 = vmatmul.mubr.bf16.gmra.mrb[124].mxu1 %v7681_v29  ;;  %3344 = vmatmul.mubr.bf16.gmra.mrb[156].mxu0 %v7681_v29 }
 0x213   : > { %v6453_v8 = vpop.eup %6452  ;;  %v2114_v19 = vmul.bf16 %v2051_v45, %v7813_v16  ;;  %v2053_v31 = vmul.bf16 1065369472, %v6451_v18  ;;  %6474 = vpow.bf16 %v5671_v13  ;;  %v7918_v32 = vpack.c.bf16 %v992_v52, %v988_v27  ;;  %3941 = vmatprep.mubr.bf16.mxu1 %v10364_v50 }
 0x214   : > { %v6455_v36 = vpop.eup %6454  ;;  %v1395_v38 = vunpack.c.l.bf16 %v1362_v15  ;;  %v1397_v22 = vunpack.c.h.bf16 %v1362_v15  ;;  %v1363_v10 = vmul.bf16 %v1301_v21, %v7817_v62  ;;  %v1270_v26 = vadd.bf16 1065369472, %v6453_v8 }
 0x215   : > { %v6457_v42 = vpop.eup %6456  ;;  %v2147_v6 = vunpack.c.l.bf16 %v2114_v19  ;;  %v2149_v48 = vunpack.c.h.bf16 %v2114_v19  ;;  %v2115_v55 = vmul.bf16 %v2053_v31, %v7819_v46  ;;  %v2022_v39 = vadd.bf16 1065369472, %v6455_v36  ;;  %v7923_v11 = vpop.f32.mrb[20].mxu1 }
 0x216   : > { %v7925_v16 = vpop.f32.mrb[52].mxu0  ;;  %v6459_v13 = vpop.eup %6458  ;;  %v1459_v27 = vadd.f32 %v1397_v22, %v1395_v38  ;;  %v1396_v45 = vunpack.c.l.bf16 %v1363_v10  ;;  %v1398_v52 = vunpack.c.h.bf16 %v1363_v10  ;;  %6476 = vrcp.bf16 %v1270_v26 }
 0x217   : > { %v7927_v18 = vpop.f32.mrb[21].mxu1  ;;  %v7929_v15 = vpop.f32.mrb[53].mxu0  ;;  %v2211_v21 = vadd.f32 %v2149_v48, %v2147_v6  ;;  %v2148_v8 = vunpack.c.l.bf16 %v2115_v55  ;;  %v2150_v19 = vunpack.c.h.bf16 %v2115_v55  ;;  %6478 = vrcp.bf16 %v2022_v39 }
 0x218   : > { %v6461_v62 = vpop.eup %6460  ;;  %v7931_v46 = vpop.f32.mrb[22].mxu1  ;;  %v1496_v50 = vadd.f32 %v1398_v52, %v1396_v45  ;;  %v1271_v38 = vadd.bf16 1065369472, %v6457_v42  ;;  %v2023_v22 = vadd.bf16 1065369472, %v6459_v13  ;;  %v7937_v20 = vpack.c.bf16 %v1744_v53, %v7901_v30 }
 0x219   : > { %v7933_v31 = vpop.f32.mrb[54].mxu0  ;;  %v6463_v36 = vpop.eup %6462  ;;  %v1303_v29 = vmul.bf16 1065369472, %v6461_v62  ;;  %v2248_v26 = vadd.f32 %v2150_v19, %v2148_v8  ;;  %v5624_v24 = vmul.bf16 3216621497, %v7918_v32  ;;  %v7945_v42 = vpack.c.bf16 %v994_v43, %v7904_v34 }
 0x21a   : > { %v6465_v10 = vpop.eup %6464  ;;  %v2055_v25 = vmul.bf16 1065369472, %v6463_v36  ;;  %v7939_v48 = vpop.f32.mrb[23].mxu1  ;;  %6480 = vrcp.bf16 %v1271_v38  ;;  %3942 = vmatmul.mubr.bf16.vlgmr.msra.gmra.mrb[128].mxu1 %v7449_v56  ;;  %v5672_v30 = vmul.bf16 3216621497, %v7937_v20  ;;  %v10399_v53 = vmov 0  }
 0x21b   : > { %v7941_v39 = vpop.f32.mrb[55].mxu0  ;;  %v6467_v55 = vpop.eup %6466  ;;  %v1364_v6 = vmul.bf16 %v1303_v29, %v7835_v61  ;;  %v1305_v54 = vmul.bf16 1065369472, %v6465_v10  ;;  %6482 = vrcp.bf16 %v2023_v22  ;;  %3951 = vmatprep.mubr.bf16.mxu1 %v10399_v53 }
 0x21c   : > { %v6469_v13 = vpop.eup %6468  ;;  %v2116_v45 = vmul.bf16 %v2055_v25, %v7837_v1  ;;  %v2057_v52 = vmul.bf16 1065369472, %v6467_v55 }
 0x21d   : > { %v6471_v62 = vpop.eup %6470  ;;  %v1399_v8 = vunpack.c.l.bf16 %v1364_v6  ;;  %v1401_v19 = vunpack.c.h.bf16 %v1364_v6  ;;  %v1365_v29 = vmul.bf16 %v1305_v54, %v7841_v2  ;;  %v1272_v61 = vadd.bf16 1065369472, %v6469_v13  ;;  %v7953_v10 = vpop.f32.mrb[24].mxu1 }
 0x21e   : > { %v6473_v36 = vpop.eup %6472  ;;  %v2151_v34 = vunpack.c.l.bf16 %v2116_v45  ;;  %v2153_v43 = vunpack.c.h.bf16 %v2116_v45  ;;  %v2117_v56 = vmul.bf16 %v2057_v52, %v7843_v3  ;;  %v2024_v38 = vadd.bf16 1065369472, %v6471_v62  ;;  %v7955_v25 = vpop.f32.mrb[56].mxu0 }
 0x21f   : > { %v6475_v1 = vpop.eup %6474  ;;  %v1460_v22 = vadd.f32 %v1459_v27, %v1399_v8  ;;  %v1400_v55 = vunpack.c.l.bf16 %v1365_v29  ;;  %v1402_v5 = vunpack.c.h.bf16 %v1365_v29  ;;  %6484 = vrcp.bf16 %v1272_v61  ;;  %v7957_v63 = vpop.f32.mrb[25].mxu1 }
 0x220   : > { %v7959_v6 = vpop.f32.mrb[57].mxu0  ;;  %v2212_v54 = vadd.f32 %v2211_v21, %v2151_v34  ;;  %v2152_v2 = vunpack.c.l.bf16 %v2117_v56  ;;  %v2154_v13 = vunpack.c.h.bf16 %v2117_v56  ;;  %6486 = vrcp.bf16 %v2024_v38  ;;  %v7961_v45 = vpop.f32.mrb[26].mxu1 }
 0x221   : > { %v7963_v3 = vpop.f32.mrb[58].mxu0  ;;  %v1461_v52 = vadd.f32 %v1460_v22, %v1401_v19  ;;  %v1497_v62 = vadd.f32 %v1496_v50, %v1400_v55  ;;  %v1273_v57 = vadd.bf16 1065369472, %v6473_v36  ;;  %v2025_v49 = vadd.bf16 1065369472, %v6475_v1  ;;  %v7965_v27 = vpop.f32.mrb[27].mxu1 }
 0x222   : > { %v7967_v8 = vpop.f32.mrb[59].mxu0  ;;  %v6477_v29 = vpop.eup %6476  ;;  %v2213_v61 = vadd.f32 %v2212_v54, %v2153_v43  ;;  %v2249_v41 = vadd.f32 %v2248_v26, %v2152_v2  ;;  %6488 = vpow.bf16 %v5624_v24  ;;  %v5625_v21 = vmul.bf16 3216621497, %v7945_v42  ;;  %3952 = vmatmul.mubr.bf16.gmra.mrb[132].mxu1 %v7483_v17 }
 0x223   : > { %v6479_v34 = vpop.eup %6478  ;;  %v1498_v56 = vadd.f32 %v1497_v62, %v1402_v5  ;;  %v1307_v38 = vmul.bf16 1065369472, %v6477_v29  ;;  %6490 = vrcp.bf16 %v1273_v57  ;;  %v1746_v19 = vadd.f32 %v7911_v14, %v7801_v58  ;;  %3961 = vmatprep.mubr.bf16.mxu1 %v10399_v53 }
 0x224   : > { %v2250_v50 = vadd.f32 %v2249_v41, %v2154_v13  ;;  %v2059_v36 = vmul.bf16 1065369472, %v6479_v34  ;;  %6492 = vrcp.bf16 %v2025_v49  ;;  %v998_v1 = vadd.f32 %v7923_v11, %v7792_v37 }
 0x225   : > { %v1366_v24 = vmul.bf16 %v1307_v38, %v7859_v40  ;;  %6494 = vpow.bf16 %v5672_v30  ;;  %v7978_v5 = vpack.c.bf16 %v1746_v19, %v7907_v35  ;;  %v1750_v57 = vadd.f32 %v7925_v16, %v7795_v59  ;;  %v6481_v14 = vpop.eup %6480  ;;  %v7989_v11 = vpop.f32.mrb[28].mxu1 }
 0x226   : > { %v2118_v17 = vmul.bf16 %v2059_v36, %v7861_v23  ;;  %6496 = vpow.bf16 %v5625_v21  ;;  %v1000_v41 = vadd.f32 %v7927_v18, %v7798_v0  ;;  %v7987_v49 = vadd.f32 %v7929_v15, %v7801_v58  ;;  %v7991_v40 = vpop.f32.mrb[60].mxu0  ;;  %v6483_v35 = vpop.eup %6482 }
 0x227   : > { %v1403_v26 = vunpack.c.l.bf16 %v1366_v24  ;;  %v1405_v30 = vunpack.c.h.bf16 %v1366_v24  ;;  %v1309_v43 = vmul.bf16 1065369472, %v6481_v14  ;;  %v5673_v16 = vmul.bf16 3216621497, %v7978_v5  ;;  %v7994_v22 = vpop.f32.mrb[29].mxu1  ;;  %v7996_v23 = vpop.f32.mrb[61].mxu0 }
 0x228   : > { %v2155_v55 = vunpack.c.l.bf16 %v2118_v17  ;;  %v2157_v18 = vunpack.c.h.bf16 %v2118_v17  ;;  %v2061_v54 = vmul.bf16 1065369472, %v6483_v35  ;;  %v1002_v15 = vadd.f32 %v7931_v46, %v7792_v37  ;;  %v8000_v2 = vpop.f32.mrb[30].mxu1  ;;  %v8002_v13 = vpop.f32.mrb[62].mxu0 }
 0x229   : > { %v1462_v62 = vadd.f32 %v1461_v52, %v1403_v26  ;;  %v1367_v29 = vmul.bf16 %v1309_v43, %v7865_v47  ;;  %6498 = vpow.bf16 %v5673_v16  ;;  %v1754_v21 = vadd.f32 %v7933_v31, %v7795_v59  ;;  %v8007_v34 = vpop.f32.mrb[31].mxu1  ;;  %v8009_v38 = vpop.f32.mrb[63].mxu0 }
 0x22a   : > { %10400 = vst [vmem:[#allocation19_spill] sm:$0xff] %v8009_v38  ;;  %v6485_v19 = vpop.eup %6484  ;;  %v2214_v36 = vadd.f32 %v2213_v61, %v2155_v55  ;;  %v2119_v24 = vmul.bf16 %v2061_v54, %v7867_v51  ;;  %v8012_v46 = vpack.c.bf16 %v1002_v15, %v998_v1  ;;  %v1004_v14 = vadd.f32 %v7939_v48, %v7798_v0 }
 0x22b   : > { %v6487_v52 = vpop.eup %6486  ;;  %v1463_v17 = vadd.f32 %v1462_v62, %v1405_v30  ;;  %v1404_v47 = vunpack.c.l.bf16 %v1367_v29  ;;  %v1406_v35 = vunpack.c.h.bf16 %v1367_v29  ;;  %v1311_v26 = vmul.bf16 1065369472, %v6485_v19  ;;  %3962 = vmatmul.mubr.bf16.gmra.mrb[136].mxu1 %v7523_v44 }
 0x22c   : > { %10401 = vst [vmem:[#allocation20_spill] sm:$0xff] %v8012_v46  ;;  %v2215_v31 = vadd.f32 %v2214_v36, %v2157_v18  ;;  %v2156_v43 = vunpack.c.l.bf16 %v2119_v24  ;;  %v2158_v16 = vunpack.c.h.bf16 %v2119_v24  ;;  %v2063_v38 = vmul.bf16 1065369472, %v6487_v52  ;;  %3971 = vmatprep.mubr.bf16.mxu1 %v10399_v53 }
 0x22d   : > { %v6489_v61 = vpop.eup %6488  ;;  %v1499_v51 = vadd.f32 %v1498_v56, %v1404_v47  ;;  %v1368_v1 = vmul.bf16 %v1311_v26, %v7885_v60  ;;  %v5626_v55 = vmul.bf16 3216621497, %v8012_v46  ;;  %v8020_v48 = vpack.c.bf16 %v1754_v21, %v1750_v57  ;;  %v8025_v18 = vpop.f32.mrb[32].mxu1 }
 0x22e   : > { %v6491_v30 = vpop.eup %6490  ;;  %v2251_v54 = vadd.f32 %v2250_v50, %v2156_v43  ;;  %v2120_v15 = vmul.bf16 %v2063_v38, %v7887_v4  ;;  %v1274_v62 = vadd.bf16 1065369472, %v6489_v61  ;;  %v8023_v44 = vpack.c.bf16 %v1004_v14, %v1000_v41  ;;  %v8027_v29 = vpop.f32.mrb[64].mxu0 }
 0x22f   : > { %v6493_v19 = vpop.eup %6492  ;;  %v1500_v36 = vadd.f32 %v1499_v51, %v1406_v35  ;;  %v1407_v56 = vunpack.c.l.bf16 %v1368_v1  ;;  %v1409_v24 = vunpack.c.h.bf16 %v1368_v1  ;;  %v1313_v60 = vmul.bf16 1065369472, %v6491_v30  ;;  %v8029_v52 = vpop.f32.mrb[33].mxu1 }
 0x230   : > { %v8031_v57 = vpop.f32.mrb[65].mxu0  ;;  %v6495_v21 = vpop.eup %6494  ;;  %v2252_v50 = vadd.f32 %v2251_v54, %v2158_v16  ;;  %v2159_v47 = vunpack.c.l.bf16 %v2120_v15  ;;  %v2161_v4 = vunpack.c.h.bf16 %v2120_v15  ;;  %v2065_v38 = vmul.bf16 1065369472, %v6493_v19 }
 0x231   : > { %v8033_v41 = vpop.f32.mrb[34].mxu1  ;;  %v8035_v14 = vpop.f32.mrb[66].mxu0  ;;  %v1464_v43 = vadd.f32 %v1463_v17, %v1407_v56  ;;  %v1369_v35 = vmul.bf16 %v1313_v60, %v7891_v7  ;;  %6500 = vrcp.bf16 %v1274_v62  ;;  %v2026_v61 = vadd.bf16 1065369472, %v6495_v21 }
 0x232   : > { %v6497_v26 = vpop.eup %6496  ;;  %v8038_v51 = vpop.f32.mrb[35].mxu1  ;;  %v2216_v30 = vadd.f32 %v2215_v31, %v2159_v47  ;;  %v2121_v16 = vmul.bf16 %v2065_v38, %v7893_v12  ;;  %6502 = vpow.bf16 %v5626_v55  ;;  %v5674_v12 = vmul.bf16 3216621497, %v8020_v48 }
 0x233   : > { %v8040_v1 = vpop.f32.mrb[67].mxu0  ;;  %v1275_v54 = vadd.bf16 1065369472, %v6497_v26  ;;  %v8043_v15 = vadd.f32 %v1464_v43, %v1409_v24  ;;  %v1408_v19 = vunpack.c.l.bf16 %v1369_v35  ;;  %v1410_v46 = vunpack.c.h.bf16 %v1369_v35  ;;  %3972 = vmatmul.mubr.bf16.gmra.mrb[140].mxu1 %v7563_v9 }
 0x234   : > { %6504 = vrcp.bf16 %v2026_v61  ;;  %v6499_v17 = vpop.eup %6498  ;;  %v8046_v7 = vadd.f32 %v2216_v30, %v2161_v4  ;;  %v2160_v62 = vunpack.c.l.bf16 %v2121_v16  ;;  %v2162_v56 = vunpack.c.h.bf16 %v2121_v16  ;;  %3981 = vmatprep.mubr.bf16.mxu1 %v10399_v53 }
 0x235   : > { %6506 = vrcp.bf16 %v1275_v54  ;;  %v1501_v31 = vadd.f32 %v1500_v36, %v1408_v19  ;;  %v2027_v60 = vadd.bf16 1065369472, %v6499_v17  ;;  %v5627_v55 = vmul.bf16 3216621497, %v8023_v44  ;;  %v8057_v4 = vpop.f32.mrb[36].mxu1  ;;  %v8059_v38 = vpop.f32.mrb[68].mxu0 }
 0x236   : > { %v2253_v24 = vadd.f32 %v2252_v50, %v2160_v62  ;;  %v1756_v21 = vadd.f32 %v7941_v39, %v7801_v58  ;;  %v1008_v9 = vadd.f32 %v7953_v10, %v7792_v37  ;;  %v1760_v47 = vadd.f32 %v7955_v25, %v7795_v59  ;;  %v8067_v39 = vpop.f32.mrb[37].mxu1  ;;  %v8069_v43 = vpop.f32.mrb[69].mxu0 }
 0x237   : > { %v8061_v36 = vadd.f32 %v1501_v31, %v1410_v46  ;;  %6508 = vrcp.bf16 %v2027_v60  ;;  %v1010_v26 = vadd.f32 %v7957_v63, %v7798_v0  ;;  %v1762_v50 = vadd.f32 %v7959_v6, %v7801_v58  ;;  %v8078_v35 = vpop.f32.mrb[38].mxu1  ;;  %v8080_v61 = vpop.f32.mrb[70].mxu0 }
 0x238   : > { %v8071_v10 = vadd.f32 %v2253_v24, %v2162_v56  ;;  %6510 = vpow.bf16 %v5674_v12  ;;  %v8074_v25 = vpack.c.bf16 %v1756_v21, %v7987_v49  ;;  %v1012_v46 = vadd.f32 %v7961_v45, %v7792_v37  ;;  %v8088_v16 = vpop.f32.mrb[39].mxu1  ;;  %v8090_v49 = vpop.f32.mrb[71].mxu0 }
 0x239   : > { %6512 = vpow.bf16 %v5627_v55  ;;  %v1764_v63 = vadd.f32 %v7963_v3, %v7795_v59  ;;  %v1014_v6 = vadd.f32 %v7965_v27, %v7798_v0  ;;  %v1766_v30 = vadd.f32 %v7967_v8, %v7801_v58 }
 0x23a   : > { %v5675_v45 = vmul.bf16 3216621497, %v8074_v25  ;;  %v8093_v54 = vpack.c.bf16 %v1012_v46, %v1008_v9  ;;  %v1018_v19 = vadd.f32 %v7989_v11, %v7792_v37  ;;  %v1770_v3 = vadd.f32 %v7991_v40, %v7795_v59 }
 0x23b   : > { %v8099_v17 = vpack.c.bf16 %v1764_v63, %v1760_v47  ;;  %v8101_v27 = vpack.c.bf16 %v1014_v6, %v1010_v26  ;;  %v8103_v62 = vpack.c.bf16 %v1766_v30, %v1762_v50  ;;  %v1020_v8 = vadd.f32 %v7994_v22, %v7798_v0  ;;  %3982 = vmatmul.mubr.bf16.gmra.mrb[144].mxu1 %v7597_v28 }
 0x23c   : > { %v6501_v56 = vpop.eup %6500  ;;  %6514 = vpow.bf16 %v5675_v45  ;;  %v5628_v31 = vmul.bf16 3216621497, %v8093_v54  ;;  %v8111_v11 = vadd.f32 %v7996_v23, %v7801_v58  ;;  %v1022_v40 = vadd.f32 %v8000_v2, %v7792_v37  ;;  %3991 = vmatprep.mubr.bf16.mxu1 %v10399_v53 }
 0x23d   : > { %v6503_v60 = vpop.eup %6502  ;;  %v1315_v12 = vmul.bf16 1065369472, %v6501_v56  ;;  %v5676_v55 = vmul.bf16 3216621497, %v8099_v17  ;;  %v5629_v22 = vmul.bf16 3216621497, %v8101_v27  ;;  %v1774_v28 = vadd.f32 %v8002_v13, %v7795_v59 }
 0x23e   : > { %v1276_v21 = vadd.bf16 1065369472, %v6503_v60  ;;  %6516 = vpow.bf16 %v5628_v31  ;;  %v5677_v23 = vmul.bf16 3216621497, %v8103_v62  ;;  %v8121_v9 = vpack.c.bf16 %v1022_v40, %v1018_v19  ;;  %v8123_v47 = vpop.f32.mrb[40].mxu1  ;;  %v8125_v2 = vpop.f32.mrb[72].mxu0 }
 0x23f   : > { %v6505_v24 = vpop.eup %6504  ;;  %v1370_v50 = vmul.bf16 %v1315_v12, %v7918_v32  ;;  %6518 = vpow.bf16 %v5676_v55  ;;  %v8128_v63 = vpack.c.bf16 %v1774_v28, %v1770_v3  ;;  %v8130_v6 = vpop.f32.mrb[41].mxu1  ;;  %v1024_v19 = vadd.f32 %v8007_v34, %v7798_v0 }
 0x240   : > { %v6507_v26 = vpop.eup %6506  ;;  %v2067_v46 = vmul.bf16 1065369472, %v6505_v24  ;;  %v8132_v13 = vpop.f32.mrb[73].mxu0  ;;  %6520 = vrcp.bf16 %v1276_v21  ;;  %v5630_v45 = vmul.bf16 3216621497, %v8121_v9 }
 0x241   : > { %v1317_v30 = vmul.bf16 1065369472, %v6507_v26  ;;  %v8137_v56 = vpop.f32.mrb[42].mxu1  ;;  %v8139_v31 = vpop.f32.mrb[74].mxu0  ;;  %v1411_v32 = vunpack.c.l.bf16 %v1370_v50  ;;  %v1413_v40 = vunpack.c.h.bf16 %v1370_v50  ;;  %6522 = vpow.bf16 %v5629_v22 }
 0x242   : > { %10402 = vst [vmem:[#allocation21_spill] sm:$0xff] %v8137_v56  ;;  %10403 = vst [vmem:[#allocation22_spill] sm:$0xff] %v8139_v31  ;;  %v2122_v3 = vmul.bf16 %v2067_v46, %v7937_v20  ;;  %v8142_v60 = vpop.f32.mrb[43].mxu1  ;;  %v8144_v12 = vpop.f32.mrb[75].mxu0  ;;  %6524 = vpow.bf16 %v5677_v23  ;;  %v5678_v24 = vmul.bf16 3216621497, %v8128_v63  ;;  %v8148_v34 = vpack.c.bf16 %v1024_v19, %v1020_v8 }
 0x243   : > { %10404 = vst [vmem:[#allocation23_spill] sm:$0xff] %v8144_v12  ;;  %v6509_v55 = vpop.eup %6508  ;;  %v1371_v28 = vmul.bf16 %v1317_v30, %v7945_v42  ;;  %v1466_v26 = vadd.f32 %v8043_v15, %v1411_v32  ;;  %3992 = vmatmul.mubr.bf16.gmra.mrb[148].mxu1 %v7605_v33  ;;  %6526 = vpow.bf16 %v5630_v45  ;;  %v10405_v33 = vld [vmem:[#allocation19_spill] sm:$0xff] }
 0x244   : > { %v6511_v21 = vpop.eup %6510  ;;  %v2163_v31 = vunpack.c.l.bf16 %v2122_v3  ;;  %v2165_v50 = vunpack.c.h.bf16 %v2122_v3  ;;  %v2069_v56 = vmul.bf16 1065369472, %v6509_v55  ;;  %4001 = vmatprep.mubr.bf16.mxu1 %v10399_v53  ;;  %v5631_v19 = vmul.bf16 3216621497, %v8148_v34 }
 0x245   : > { %v6513_v20 = vpop.eup %6512  ;;  %v1412_v22 = vunpack.c.l.bf16 %v1371_v28  ;;  %v1414_v46 = vunpack.c.h.bf16 %v1371_v28  ;;  %v2028_v12 = vadd.bf16 1065369472, %v6511_v21  ;;  %v8153_v42 = vadd.f32 %v1466_v26, %v1413_v40  ;;  %v8161_v3 = vpop.f32.mrb[44].mxu1 }
 0x246   : > { %v2218_v8 = vadd.f32 %v8046_v7, %v2163_v31  ;;  %v2123_v23 = vmul.bf16 %v2069_v56, %v7978_v5  ;;  %v1277_v30 = vadd.bf16 1065369472, %v6513_v20  ;;  %v1776_v32 = vadd.f32 %v10405_v33, %v7801_v58  ;;  %v8163_v45 = vpop.f32.mrb[76].mxu0  ;;  %v8167_v5 = vpop.f32.mrb[45].mxu1 }
 0x247   : > { %v1503_v15 = vadd.f32 %v8061_v36, %v1412_v22  ;;  %6528 = vrcp.bf16 %v2028_v12  ;;  %v6515_v55 = vpop.eup %6514  ;;  %v8169_v56 = vpop.f32.mrb[77].mxu0  ;;  %v1028_v22 = vadd.f32 %v8025_v18, %v7792_v37  ;;  %v1782_v18 = vadd.f32 %v8031_v57, %v7801_v58 }
 0x248   : > { %v8165_v40 = vadd.f32 %v2218_v8, %v2165_v50  ;;  %v2164_v28 = vunpack.c.l.bf16 %v2123_v23  ;;  %v2166_v7 = vunpack.c.h.bf16 %v2123_v23  ;;  %6530 = vrcp.bf16 %v1277_v30  ;;  %v8176_v21 = vpop.f32.mrb[46].mxu1  ;;  %v8178_v26 = vpop.f32.mrb[78].mxu0 }
 0x249   : > { %v8171_v36 = vadd.f32 %v1503_v15, %v1414_v46  ;;  %v2029_v31 = vadd.bf16 1065369472, %v6515_v55  ;;  %6532 = vpow.bf16 %v5678_v24  ;;  %v8174_v12 = vpack.c.bf16 %v1776_v32, %v8111_v11  ;;  %v6517_v50 = vpop.eup %6516  ;;  %v8185_v8 = vpop.f32.mrb[47].mxu1  ;;  %v10406_v32 = vld [vmem:[#allocation6_spill] sm:$0xff] }
 0x24a   : > { %v2255_v20 = vadd.f32 %v8071_v10, %v2164_v28  ;;  %6534 = vpow.bf16 %v5631_v19  ;;  %v1780_v46 = vadd.f32 %v8027_v29, %v7795_v59  ;;  %v8187_v24 = vpop.f32.mrb[79].mxu0  ;;  %v6519_v11 = vpop.eup %6518  ;;  %v1278_v23 = vadd.bf16 1065369472, %v6517_v50 }
 0x24b   : > { %6536 = vrcp.bf16 %v2029_v31  ;;  %v5679_v30 = vmul.bf16 3216621497, %v8174_v12  ;;  %v1030_v15 = vadd.f32 %v8029_v52, %v7798_v0  ;;  %v6521_v10 = vpop.eup %6520  ;;  %v2030_v33 = vadd.bf16 1065369472, %v6519_v11  ;;  %4002 = vmatmul.mubr.bf16.gmra.mrb[152].mxu1 %v10406_v32 }
 0x24c   : > { %v8192_v19 = vadd.f32 %v2255_v20, %v2166_v7  ;;  %v1032_v29 = vadd.f32 %v8033_v41, %v7792_v37  ;;  %v6523_v55 = vpop.eup %6522  ;;  %v1319_v28 = vmul.bf16 1065369472, %v6521_v10  ;;  %6538 = vrcp.bf16 %v1278_v23  ;;  %4011 = vmatprep.mubr.bf16.mxu1 %v10399_v53  ;;  %v10407_v20 = vld [vmem:[#allocation20_spill] sm:$0xff] }
 0x24d   : > { %v1784_v31 = vadd.f32 %v8035_v14, %v7795_v59  ;;  %v1034_v52 = vadd.f32 %v8038_v51, %v7798_v0  ;;  %v6525_v7 = vpop.eup %6524  ;;  %6540 = vrcp.bf16 %v2030_v33  ;;  %v1279_v50 = vadd.bf16 1065369472, %v6523_v55  ;;  %v8211_v14 = vpop.f32.mrb[48].mxu1 }
 0x24e   : > { %v8204_v57 = vpack.c.bf16 %v1032_v29, %v1028_v22  ;;  %v1786_v41 = vadd.f32 %v8040_v1, %v7801_v58  ;;  %v1372_v11 = vmul.bf16 %v1319_v28, %v10407_v20  ;;  %v2031_v10 = vadd.bf16 1065369472, %v6525_v7  ;;  %10408 = vst [vmem:[#allocation19_spill] sm:$0xff] %v8211_v14  ;;  %v8213_v32 = vpop.f32.mrb[80].mxu0  ;;  %v6527_v51 = vpop.eup %6526 }
 0x24f   : > { %6542 = vpow.bf16 %v5679_v30  ;;  %v8209_v23 = vpack.c.bf16 %v1784_v31, %v1780_v46  ;;  %10409 = vst [vmem:[#allocation6_spill] sm:$0xff] %v8213_v32  ;;  %v8216_v55 = vpack.c.bf16 %v1034_v52, %v1030_v15  ;;  %v8220_v29 = vpop.f32.mrb[49].mxu1  ;;  %v8222_v1 = vpop.f32.mrb[81].mxu0  ;;  %v1280_v46 = vadd.bf16 1065369472, %v6527_v51 }
 0x250   : > { %6544 = vrcp.bf16 %v1279_v50  ;;  %v5632_v33 = vmul.bf16 3216621497, %v8204_v57  ;;  %v8218_v22 = vpack.c.bf16 %v1786_v41, %v1782_v18  ;;  %10410 = vst [vmem:[#allocation20_spill] sm:$0xff] %v8220_v29  ;;  %10411 = vst [vmem:[#allocation24_spill] sm:$0xff] %v8222_v1  ;;  %v1415_v28 = vunpack.c.l.bf16 %v1372_v11  ;;  %v8224_v31 = vpop.f32.mrb[50].mxu1  ;;  %v8226_v7 = vpop.f32.mrb[82].mxu0 }
 0x251   : > { %v1417_v30 = vunpack.c.h.bf16 %v1372_v11  ;;  %6546 = vrcp.bf16 %v2031_v10  ;;  %10412 = vst [vmem:[#allocation25_spill] sm:$0xff] %v8224_v31  ;;  %10413 = vst [vmem:[#allocation26_spill] sm:$0xff] %v8226_v7  ;;  %v5680_v50 = vmul.bf16 3216621497, %v8209_v23  ;;  %v5633_v15 = vmul.bf16 3216621497, %v8216_v55 }
 0x252   : > { %v6529_v20 = vpop.eup %6528  ;;  %6548 = vpow.bf16 %v5632_v33  ;;  %v5681_v18 = vmul.bf16 3216621497, %v8218_v22  ;;  %v1468_v41 = vadd.f32 %v8153_v42, %v1415_v28  ;;  %v1038_v11 = vadd.f32 %v8057_v4, %v7792_v37  ;;  %v8234_v10 = vpop.f32.mrb[51].mxu1  ;;  %v10416_v42 = vld [vmem:[#allocation7_spill] sm:$0xff] }
 0x253   : > { %v6531_v52 = vpop.eup %6530  ;;  %v2071_v1 = vmul.bf16 1065369472, %v6529_v20  ;;  %6550 = vrcp.bf16 %v1280_v46  ;;  %10414 = vst [vmem:[#allocation27_spill] sm:$0xff] %v8234_v10  ;;  %v8236_v51 = vpop.f32.mrb[83].mxu0  ;;  %v8240_v31 = vadd.f32 %v8059_v38, %v7795_v59  ;;  %v8244_v29 = vadd.f32 %v8067_v39, %v7798_v0  ;;  %4012 = vmatmul.mubr.bf16.gmra.mrb[156].mxu1 %v10416_v42 }
 0x254   : > { %10415 = vst [vmem:[#allocation28_spill] sm:$0xff] %v8236_v51  ;;  %v6533_v7 = vpop.eup %6532  ;;  %v1321_v33 = vmul.bf16 1065369472, %v6531_v52  ;;  %6552 = vpow.bf16 %v5680_v50  ;;  %v1469_v46 = vadd.f32 %v1468_v41, %v1417_v30  ;;  %4021 = vmatprep.mubr.bf16.mxu1 %v10399_v53  ;;  %v8252_v38 = vadd.f32 %v8069_v43, %v7801_v58 }
 0x255   : > { %v6535_v28 = vpop.eup %6534  ;;  %v2124_v4 = vmul.bf16 %v2071_v1, %v8020_v48  ;;  %v2032_v20 = vadd.bf16 1065369472, %v6533_v7  ;;  %6554 = vpow.bf16 %v5633_v15  ;;  %v8254_v30 = vpop.f32.mrb[52].mxu1 }
 0x256   : > { %v6537_v52 = vpop.eup %6536  ;;  %v1373_v50 = vmul.bf16 %v1321_v33, %v8023_v44  ;;  %v1281_v51 = vadd.bf16 1065369472, %v6535_v28  ;;  %6556 = vpow.bf16 %v5681_v18  ;;  %10417 = vst [vmem:[#allocation7_spill] sm:$0xff] %v8254_v30  ;;  %v8256_v48 = vpop.f32.mrb[84].mxu0  ;;  %v1042_v44 = vadd.f32 %v8078_v35, %v7792_v37 }
 0x257   : > { %v2167_v39 = vunpack.c.l.bf16 %v2124_v4  ;;  %v2169_v10 = vunpack.c.h.bf16 %v2124_v4  ;;  %v2073_v42 = vmul.bf16 1065369472, %v6537_v52  ;;  %6558 = vrcp.bf16 %v2032_v20  ;;  %10418 = vst [vmem:[#allocation29_spill] sm:$0xff] %v8256_v48  ;;  %v6539_v1 = vpop.eup %6538  ;;  %v8260_v18 = vpop.f32.mrb[53].mxu1 }
 0x258   : > { %v1416_v7 = vunpack.c.l.bf16 %v1373_v50  ;;  %v1418_v15 = vunpack.c.h.bf16 %v1373_v50  ;;  %6560 = vrcp.bf16 %v1281_v51  ;;  %10419 = vst [vmem:[#allocation30_spill] sm:$0xff] %v8260_v18  ;;  %v8262_v41 = vpop.f32.mrb[85].mxu0  ;;  %v6541_v43 = vpop.eup %6540  ;;  %v1323_v4 = vmul.bf16 1065369472, %v6539_v1 }
 0x259   : > { %10420 = vst [vmem:[#allocation31_spill] sm:$0xff] %v8262_v41  ;;  %v2220_v33 = vadd.f32 %v8165_v40, %v2167_v39  ;;  %v2125_v28 = vmul.bf16 %v2073_v42, %v8074_v25  ;;  %v8268_v20 = vadd.f32 %v8080_v61, %v7795_v59  ;;  %v8270_v52 = vpop.f32.mrb[54].mxu1  ;;  %v8272_v51 = vpop.f32.mrb[86].mxu0  ;;  %v2075_v18 = vmul.bf16 1065369472, %v6541_v43 }
 0x25a   : > { %10421 = vst [vmem:[#allocation32_spill] sm:$0xff] %v8270_v52  ;;  %10422 = vst [vmem:[#allocation33_spill] sm:$0xff] %v8272_v51  ;;  %v6543_v50 = vpop.eup %6542  ;;  %v1505_v35 = vadd.f32 %v8171_v36, %v1416_v7  ;;  %v8275_v48 = vpack.c.bf16 %v1042_v44, %v1038_v11  ;;  %v8279_v40 = vadd.f32 %v8088_v16, %v7798_v0  ;;  %v8281_v25 = vpop.f32.mrb[55].mxu1  ;;  %v10425_v44 = vld [vmem:[#allocation8_spill] sm:$0xff] }
 0x25b   : > { %10423 = vst [vmem:[#allocation34_spill] sm:$0xff] %v8281_v25  ;;  %v8283_v39 = vpop.f32.mrb[87].mxu0  ;;  %v6545_v61 = vpop.eup %6544  ;;  %v2221_v42 = vadd.f32 %v2220_v33, %v2169_v10  ;;  %v2168_v1 = vunpack.c.l.bf16 %v2125_v28  ;;  %v2170_v52 = vunpack.c.h.bf16 %v2125_v28  ;;  %v1374_v51 = vmul.bf16 %v1323_v4, %v8093_v54  ;;  %4022 = vmatmul.mubr.bf16.gmra.mrb[160].mxu1 %v10425_v44 }
 0x25c   : > { %10424 = vst [vmem:[#allocation35_spill] sm:$0xff] %v8283_v39  ;;  %v6547_v41 = vpop.eup %6546  ;;  %v1506_v30 = vadd.f32 %v1505_v35, %v1418_v15  ;;  %v2126_v36 = vmul.bf16 %v2075_v18, %v8099_v17  ;;  %v1325_v11 = vmul.bf16 1065369472, %v6545_v61  ;;  %v2033_v7 = vadd.bf16 1065369472, %v6543_v50  ;;  %4031 = vmatprep.mubr.bf16.mxu1 %v10399_v53 }
 0x25d   : > { %v6549_v16 = vpop.eup %6548  ;;  %v2257_v43 = vadd.f32 %v8192_v19, %v2168_v1  ;;  %v1419_v25 = vunpack.c.l.bf16 %v1374_v51  ;;  %v1421_v32 = vunpack.c.h.bf16 %v1374_v51  ;;  %v2077_v39 = vmul.bf16 1065369472, %v6547_v41  ;;  %v8292_v35 = vpop.f32.mrb[56].mxu1 }
 0x25e   : > { %v6551_v10 = vpop.eup %6550  ;;  %v2171_v33 = vunpack.c.l.bf16 %v2126_v36  ;;  %v2173_v28 = vunpack.c.h.bf16 %v2126_v36  ;;  %v1375_v54 = vmul.bf16 %v1325_v11, %v8101_v27  ;;  %6562 = vrcp.bf16 %v2033_v7  ;;  %v8294_v19 = vpop.f32.mrb[88].mxu0 }
 0x25f   : > { %v6553_v15 = vpop.eup %6552  ;;  %v2258_v17 = vadd.f32 %v2257_v43, %v2170_v52  ;;  %v1470_v18 = vadd.f32 %v1469_v46, %v1419_v25  ;;  %v2127_v4 = vmul.bf16 %v2077_v39, %v8103_v62  ;;  %v1327_v50 = vmul.bf16 1065369472, %v6551_v10  ;;  %v8296_v14 = vpop.f32.mrb[57].mxu1 }
 0x260   : > { %v6555_v51 = vpop.eup %6554  ;;  %v2222_v41 = vadd.f32 %v2221_v42, %v2171_v33  ;;  %v1420_v61 = vunpack.c.l.bf16 %v1375_v54  ;;  %v1422_v1 = vunpack.c.h.bf16 %v1375_v54  ;;  %v1282_v44 = vadd.bf16 1065369472, %v6549_v16  ;;  %10426 = vst [vmem:[#allocation8_spill] sm:$0xff] %v8296_v14  ;;  %v8298_v36 = vpop.f32.mrb[89].mxu0 }
 0x261   : > { %10427 = vst [vmem:[#allocation36_spill] sm:$0xff] %v8298_v36  ;;  %v6557_v27 = vpop.eup %6556  ;;  %v1471_v11 = vadd.f32 %v1470_v18, %v1421_v32  ;;  %v2172_v52 = vunpack.c.l.bf16 %v2127_v4  ;;  %v2174_v46 = vunpack.c.h.bf16 %v2127_v4  ;;  %v1376_v62 = vmul.bf16 %v1327_v50, %v8121_v9  ;;  %v8301_v25 = vpop.f32.mrb[58].mxu1 }
 0x262   : > { %10428 = vst [vmem:[#allocation37_spill] sm:$0xff] %v8301_v25  ;;  %v8303_v39 = vpop.f32.mrb[90].mxu0  ;;  %v6559_v7 = vpop.eup %6558  ;;  %v2223_v43 = vadd.f32 %v2222_v41, %v2173_v28  ;;  %v1507_v42 = vadd.f32 %v1506_v30, %v1420_v61  ;;  %6564 = vrcp.bf16 %v1282_v44  ;;  %v2034_v10 = vadd.bf16 1065369472, %v6553_v15  ;;  %v10430_v25 = vld [vmem:[#allocation9_spill] sm:$0xff] }
 0x263   : > { %10429 = vst [vmem:[#allocation38_spill] sm:$0xff] %v8303_v39  ;;  %v8305_v16 = vpop.f32.mrb[59].mxu1  ;;  %v8307_v33 = vpop.f32.mrb[91].mxu0  ;;  %v2259_v36 = vadd.f32 %v2258_v17, %v2172_v52  ;;  %v1423_v32 = vunpack.c.l.bf16 %v1376_v62  ;;  %v1425_v18 = vunpack.c.h.bf16 %v1376_v62  ;;  %v2079_v4 = vmul.bf16 1065369472, %v6559_v7  ;;  %4032 = vmatmul.mubr.bf16.gmra.mrb[164].mxu1 %v10430_v25 }
 0x264   : > { %v6561_v54 = vpop.eup %6560  ;;  %v1508_v14 = vadd.f32 %v1507_v42, %v1422_v1  ;;  %6566 = vrcp.bf16 %v2034_v10  ;;  %v1283_v50 = vadd.bf16 1065369472, %v6555_v51  ;;  %v2035_v15 = vadd.bf16 1065369472, %v6557_v27  ;;  %4041 = vmatprep.mubr.bf16.mxu1 %v10399_v53 }
 0x265   : > { %v1329_v9 = vmul.bf16 1065369472, %v6561_v54  ;;  %v2260_v39 = vadd.f32 %v2259_v36, %v2174_v46  ;;  %v1472_v28 = vadd.f32 %v1471_v11, %v1423_v32  ;;  %v2128_v30 = vmul.bf16 %v2079_v4, %v8128_v63  ;;  %v8320_v36 = vpop.f32.mrb[60].mxu1  ;;  %v8322_v63 = vpop.f32.mrb[92].mxu0 }
 0x266   : > { %6568 = vrcp.bf16 %v1283_v50  ;;  %v5634_v17 = vmul.bf16 3216621497, %v8275_v48  ;;  %v8316_v61 = vpack.c.bf16 %v8268_v20, %v8240_v31  ;;  %v8325_v52 = vpop.f32.mrb[61].mxu1  ;;  %v8327_v46 = vpop.f32.mrb[93].mxu0  ;;  %v8331_v62 = vpack.c.bf16 %v8279_v40, %v8244_v29  ;;  %v10431_v50 = vld [vmem:[#allocation21_spill] sm:$0xff] }
 0x267   : > { %v1377_v41 = vmul.bf16 %v1329_v9, %v8148_v34  ;;  %v8318_v1 = vadd.f32 %v1472_v28, %v1425_v18  ;;  %v2175_v51 = vunpack.c.l.bf16 %v2128_v30  ;;  %v2177_v44 = vunpack.c.h.bf16 %v2128_v30  ;;  %v8337_v42 = vpop.f32.mrb[62].mxu1  ;;  %v8339_v10 = vpop.f32.mrb[94].mxu0  ;;  %v10432_v30 = vld [vmem:[#allocation10_spill] sm:$0xff] }
 0x268   : > { %6570 = vrcp.bf16 %v2035_v15  ;;  %v5682_v34 = vmul.bf16 3216621497, %v8316_v61  ;;  %v1796_v25 = vadd.f32 %v8090_v49, %v7801_v58  ;;  %v1048_v7 = vadd.f32 %v8123_v47, %v7792_v37  ;;  %v8343_v18 = vpop.f32.mrb[63].mxu1  ;;  %v8345_v29 = vpop.f32.mrb[95].mxu0 }
 0x269   : > { %v1424_v27 = vunpack.c.l.bf16 %v1377_v41  ;;  %v1426_v11 = vunpack.c.h.bf16 %v1377_v41  ;;  %6572 = vpow.bf16 %v5634_v17  ;;  %v6563_v31 = vpop.eup %6562  ;;  %v2224_v20 = vadd.f32 %v2223_v43, %v2175_v51  ;;  %v10433_v41 = vld [vmem:[#allocation22_spill] sm:$0xff] }
 0x26a   : > { %v2081_v32 = vmul.bf16 1065369472, %v6563_v31  ;;  %6574 = vpow.bf16 %v5682_v34  ;;  %v1800_v43 = vadd.f32 %v8125_v2, %v7795_v59  ;;  %v5635_v49 = vmul.bf16 3216621497, %v8331_v62  ;;  %v10434_v31 = vld [vmem:[#allocation23_spill] sm:$0xff] }
 0x26b   : > { %v1509_v54 = vadd.f32 %v1508_v14, %v1424_v27  ;;  %v8347_v40 = vadd.f32 %v2224_v20, %v2177_v44  ;;  %v8351_v47 = vpack.c.bf16 %v1796_v25, %v8252_v38  ;;  %v1050_v4 = vadd.f32 %v8130_v6, %v7798_v0  ;;  %4042 = vmatmul.mubr.bf16.gmra.mrb[168].mxu1 %v10432_v30 }
 0x26c   : > { %v2129_v9 = vmul.bf16 %v2081_v32, %v8174_v12  ;;  %v1802_v2 = vadd.f32 %v8132_v13, %v7801_v58  ;;  %v1052_v28 = vadd.f32 %v10431_v50, %v7792_v37  ;;  %6576 = vpow.bf16 %v5635_v49  ;;  %4051 = vmatprep.mubr.bf16.mxu1 %v10399_v53 }
 0x26d   : > { %v8355_v14 = vadd.f32 %v1509_v54, %v1426_v11  ;;  %v6565_v15 = vpop.eup %6564  ;;  %v5683_v38 = vmul.bf16 3216621497, %v8351_v47  ;;  %v1804_v17 = vadd.f32 %v10433_v41, %v7795_v59  ;;  %v1054_v6 = vadd.f32 %v8142_v60, %v7798_v0  ;;  %v8377_v25 = vpop.f32.mrb[64].mxu1 }
 0x26e   : > { %v2176_v12 = vunpack.c.l.bf16 %v2129_v9  ;;  %v2178_v51 = vunpack.c.h.bf16 %v2129_v9  ;;  %v1331_v13 = vmul.bf16 1065369472, %v6565_v15  ;;  %v8369_v44 = vpack.c.bf16 %v1052_v28, %v1048_v7  ;;  %v8379_v54 = vpop.f32.mrb[96].mxu0  ;;  %v8383_v9 = vpop.f32.mrb[65].mxu1 }
 0x26f   : > { %v6567_v27 = vpop.eup %6566  ;;  %6578 = vpow.bf16 %v5683_v38  ;;  %v8371_v11 = vpack.c.bf16 %v1804_v17, %v1800_v43  ;;  %v8373_v34 = vpack.c.bf16 %v1054_v6, %v1050_v4  ;;  %v1806_v20 = vadd.f32 %v10434_v31, %v7801_v58  ;;  %10435 = vst [vmem:[#allocation9_spill] sm:$0xff] %v8383_v9  ;;  %v8385_v50 = vpop.f32.mrb[97].mxu0 }
 0x270   : > { %v2261_v60 = vadd.f32 %v2260_v39, %v2176_v12  ;;  %v1378_v32 = vmul.bf16 %v1331_v13, %v8204_v57  ;;  %v2083_v49 = vmul.bf16 1065369472, %v6567_v27  ;;  %v5636_v7 = vmul.bf16 3216621497, %v8369_v44  ;;  %10436 = vst [vmem:[#allocation21_spill] sm:$0xff] %v8385_v50  ;;  %v8393_v39 = vpop.f32.mrb[66].mxu1 }
 0x271   : > { %v6569_v43 = vpop.eup %6568  ;;  %v5684_v4 = vmul.bf16 3216621497, %v8371_v11  ;;  %v5637_v28 = vmul.bf16 3216621497, %v8373_v34  ;;  %v8389_v30 = vpack.c.bf16 %v1806_v20, %v1802_v2  ;;  %v1058_v15 = vadd.f32 %v8161_v3, %v7792_v37  ;;  %10437 = vst [vmem:[#allocation10_spill] sm:$0xff] %v8393_v39  ;;  %v8395_v57 = vpop.f32.mrb[98].mxu0 }
 0x272   : > { %10438 = vst [vmem:[#allocation22_spill] sm:$0xff] %v8395_v57  ;;  %v2262_v41 = vadd.f32 %v2261_v60, %v2178_v51  ;;  %v1427_v17 = vunpack.c.l.bf16 %v1378_v32  ;;  %v1429_v6 = vunpack.c.h.bf16 %v1378_v32  ;;  %v2130_v12 = vmul.bf16 %v2083_v49, %v8209_v23  ;;  %v8398_v13 = vpop.f32.mrb[67].mxu1  ;;  %v8400_v27 = vpop.f32.mrb[99].mxu0  ;;  %v10440_v51 = vld [vmem:[#allocation11_spill] sm:$0xff] }
 0x273   : > { %v6571_v38 = vpop.eup %6570  ;;  %10439 = vst [vmem:[#allocation23_spill] sm:$0xff] %v8400_v27  ;;  %v1333_v2 = vmul.bf16 1065369472, %v6569_v43  ;;  %6580 = vpow.bf16 %v5636_v7  ;;  %v5685_v3 = vmul.bf16 3216621497, %v8389_v30  ;;  %4052 = vmatmul.mubr.bf16.gmra.mrb[172].mxu1 %v10440_v51  ;;  %v1810_v49 = vadd.f32 %v8163_v45, %v7795_v59 }
 0x274   : > { %v6573_v31 = vpop.eup %6572  ;;  %v2085_v20 = vmul.bf16 1065369472, %v6571_v38  ;;  %v1474_v50 = vadd.f32 %v8318_v1, %v1427_v17  ;;  %v2179_v39 = vunpack.c.l.bf16 %v2130_v12  ;;  %v2181_v57 = vunpack.c.h.bf16 %v2130_v12  ;;  %4061 = vmatprep.mubr.bf16.mxu1 %v10399_v53 }
 0x275   : > { %v1284_v9 = vadd.bf16 1065369472, %v6573_v31  ;;  %v6575_v60 = vpop.eup %6574  ;;  %v1379_v23 = vmul.bf16 %v1333_v2, %v8216_v55  ;;  %6582 = vpow.bf16 %v5684_v4  ;;  %v8413_v51 = vpop.f32.mrb[68].mxu1  ;;  %v1060_v45 = vadd.f32 %v8167_v5, %v7798_v0 }
 0x276   : > { %v2131_v32 = vmul.bf16 %v2085_v20, %v8218_v22  ;;  %v8410_v7 = vadd.f32 %v1474_v50, %v1429_v6  ;;  %v2226_v1 = vadd.f32 %v8347_v40, %v2179_v39  ;;  %v2036_v43 = vadd.bf16 1065369472, %v6575_v60  ;;  %10441 = vst [vmem:[#allocation11_spill] sm:$0xff] %v8413_v51  ;;  %v8415_v55 = vpop.f32.mrb[100].mxu0 }
 0x277   : > { %6584 = vrcp.bf16 %v1284_v9  ;;  %v1428_v38 = vunpack.c.l.bf16 %v1379_v23  ;;  %v1430_v17 = vunpack.c.h.bf16 %v1379_v23  ;;  %10442 = vst [vmem:[#allocation39_spill] sm:$0xff] %v8415_v55  ;;  %v6577_v22 = vpop.eup %6576  ;;  %v1812_v40 = vadd.f32 %v8169_v56, %v7801_v58  ;;  %v8423_v9 = vpop.f32.mrb[69].mxu1 }
 0x278   : > { %v2180_v12 = vunpack.c.l.bf16 %v2131_v32  ;;  %v2182_v31 = vunpack.c.h.bf16 %v2131_v32  ;;  %v8417_v4 = vadd.f32 %v2226_v1, %v2181_v57  ;;  %6586 = vrcp.bf16 %v2036_v43  ;;  %10443 = vst [vmem:[#allocation40_spill] sm:$0xff] %v8423_v9  ;;  %v8425_v50 = vpop.f32.mrb[101].mxu0  ;;  %v8428_v20 = vpop.f32.mrb[70].mxu1 }
 0x279   : > { %10444 = vst [vmem:[#allocation41_spill] sm:$0xff] %v8425_v50  ;;  %v1511_v39 = vadd.f32 %v8355_v14, %v1428_v38  ;;  %v1285_v2 = vadd.bf16 1065369472, %v6577_v22  ;;  %6588 = vpow.bf16 %v5637_v28  ;;  %10445 = vst [vmem:[#allocation42_spill] sm:$0xff] %v8428_v20  ;;  %v8430_v57 = vpop.f32.mrb[102].mxu0  ;;  %v1062_v5 = vadd.f32 %v8176_v21, %v7792_v37  ;;  %v8438_v32 = vpop.f32.mrb[71].mxu1 }
 0x27a   : > { %v2263_v6 = vadd.f32 %v2262_v41, %v2180_v12  ;;  %10446 = vst [vmem:[#allocation43_spill] sm:$0xff] %v8430_v57  ;;  %v6579_v60 = vpop.eup %6578  ;;  %6590 = vpow.bf16 %v5685_v3  ;;  %v1814_v56 = vadd.f32 %v8178_v26, %v7795_v59  ;;  %v1064_v23 = vadd.f32 %v8185_v8, %v7798_v0  ;;  %10447 = vst [vmem:[#allocation44_spill] sm:$0xff] %v8438_v32  ;;  %v8440_v14 = vpop.f32.mrb[103].mxu0  ;;  %v10449_v8 = vld [vmem:[#allocation12_spill] sm:$0xff]  ;;  %v10450_v38 = vld [vmem:[#allocation19_spill] sm:$0xff] }
 0x27b   : > { %10448 = vst [vmem:[#allocation45_spill] sm:$0xff] %v8440_v14  ;;  %v8442_v28 = vadd.f32 %v1511_v39, %v1430_v17  ;;  %6592 = vrcp.bf16 %v1285_v2  ;;  %v2037_v1 = vadd.bf16 1065369472, %v6579_v60  ;;  %v8446_v3 = vpack.c.bf16 %v1062_v5, %v1058_v15  ;;  %4062 = vmatmul.mubr.bf16.gmra.mrb[176].mxu1 %v10449_v8  ;;  %v10451_v12 = vld [vmem:[#allocation6_spill] sm:$0xff]  ;;  %v10452_v22 = vld [vmem:[#allocation20_spill] sm:$0xff] }
 0x27c   : > { %v8444_v41 = vadd.f32 %v2263_v6, %v2182_v31  ;;  %v8448_v43 = vpack.c.bf16 %v1814_v56, %v1810_v49  ;;  %v8450_v21 = vpack.c.bf16 %v1064_v23, %v1060_v45  ;;  %v1816_v26 = vadd.f32 %v8187_v24, %v7801_v58  ;;  %4071 = vmatprep.mubr.bf16.mxu1 %v10399_v53  ;;  %v10453_v60 = vld [vmem:[#allocation24_spill] sm:$0xff]  ;;  %v10454_v56 = vld [vmem:[#allocation25_spill] sm:$0xff] }
 0x27d   : > { %6594 = vrcp.bf16 %v2037_v1  ;;  %v1068_v17 = vadd.f32 %v10450_v38, %v7792_v37  ;;  %v1820_v31 = vadd.f32 %v10451_v12, %v7795_v59  ;;  %v1070_v15 = vadd.f32 %v10452_v22, %v7798_v0  ;;  %v10455_v1 = vld [vmem:[#allocation26_spill] sm:$0xff]  ;;  %v8473_v38 = vpop.f32.mrb[72].mxu1  ;;  %v8475_v12 = vpop.f32.mrb[104].mxu0 }
 0x27e   : > { %v6581_v49 = vpop.eup %6580  ;;  %v5638_v45 = vmul.bf16 3216621497, %v8446_v3  ;;  %v5686_v39 = vmul.bf16 3216621497, %v8448_v43  ;;  %v5639_v24 = vmul.bf16 3216621497, %v8450_v21  ;;  %v8465_v6 = vpack.c.bf16 %v1816_v26, %v1812_v40 }
 0x27f   : > { %v1286_v2 = vadd.bf16 1065369472, %v6581_v49  ;;  %v1822_v5 = vadd.f32 %v10453_v60, %v7801_v58  ;;  %v1072_v23 = vadd.f32 %v10454_v56, %v7792_v37  ;;  %v1824_v8 = vadd.f32 %v10455_v1, %v7795_v59  ;;  %10456 = vst [vmem:[#allocation12_spill] sm:$0xff] %v8473_v38  ;;  %10457 = vst [vmem:[#allocation19_spill] sm:$0xff] %v8475_v12  ;;  %v10458_v40 = vld [vmem:[#allocation27_spill] sm:$0xff]  ;;  %v10459_v49 = vld [vmem:[#allocation28_spill] sm:$0xff] }
 0x280   : > { %v6583_v22 = vpop.eup %6582  ;;  %6596 = vpow.bf16 %v5638_v45  ;;  %v5687_v14 = vmul.bf16 3216621497, %v8465_v6  ;;  %v1074_v26 = vadd.f32 %v10458_v40, %v7798_v0  ;;  %v1826_v60 = vadd.f32 %v10459_v49, %v7801_v58  ;;  %v8482_v32 = vpop.f32.mrb[73].mxu1 }
 0x281   : > { %10460 = vst [vmem:[#allocation6_spill] sm:$0xff] %v8482_v32  ;;  %v8484_v56 = vpop.f32.mrb[105].mxu0  ;;  %6598 = vrcp.bf16 %v1286_v2  ;;  %v2038_v1 = vadd.bf16 1065369472, %v6583_v22  ;;  %v8486_v38 = vpack.c.bf16 %v1072_v23, %v1068_v17  ;;  %v8488_v12 = vpack.c.bf16 %v1824_v8, %v1820_v31  ;;  %v8490_v45 = vpop.f32.mrb[74].mxu1  ;;  %v10466_v23 = vld [vmem:[#allocation7_spill] sm:$0xff] }
 0x282   : > { %10461 = vst [vmem:[#allocation20_spill] sm:$0xff] %v8484_v56  ;;  %v6585_v57 = vpop.eup %6584  ;;  %10462 = vst [vmem:[#allocation24_spill] sm:$0xff] %v8490_v45  ;;  %v8492_v20 = vpop.f32.mrb[106].mxu0  ;;  %6600 = vpow.bf16 %v5686_v39  ;;  %v8494_v40 = vpack.c.bf16 %v1074_v26, %v1070_v15  ;;  %v8496_v49 = vpack.c.bf16 %v1826_v60, %v1822_v5  ;;  %v1078_v8 = vadd.f32 %v10466_v23, %v7792_v37  ;;  %v10467_v5 = vld [vmem:[#allocation13_spill] sm:$0xff] }
 0x283   : > { %10463 = vst [vmem:[#allocation25_spill] sm:$0xff] %v8492_v20  ;;  %v1335_v50 = vmul.bf16 1065369472, %v6585_v57  ;;  %v8498_v32 = vpop.f32.mrb[75].mxu1  ;;  %v8500_v56 = vpop.f32.mrb[107].mxu0  ;;  %6602 = vrcp.bf16 %v2038_v1  ;;  %4072 = vmatmul.mubr.bf16.gmra.mrb[180].mxu1 %v10467_v5 }
 0x284   : > { %10464 = vst [vmem:[#allocation26_spill] sm:$0xff] %v8498_v32  ;;  %10465 = vst [vmem:[#allocation27_spill] sm:$0xff] %v8500_v56  ;;  %v6587_v2 = vpop.eup %6586  ;;  %v5640_v17 = vmul.bf16 3216621497, %v8486_v38  ;;  %v5688_v31 = vmul.bf16 3216621497, %v8488_v12  ;;  %6604 = vpow.bf16 %v5639_v24  ;;  %4081 = vmatprep.mubr.bf16.mxu1 %v10399_v53 }
 0x285   : > { %v6589_v22 = vpop.eup %6588  ;;  %v1380_v57 = vmul.bf16 %v1335_v50, %v8275_v48  ;;  %v2087_v15 = vmul.bf16 1065369472, %v6587_v2  ;;  %v5641_v39 = vmul.bf16 3216621497, %v8494_v40  ;;  %6606 = vpow.bf16 %v5687_v14  ;;  %v10468_v56 = vld [vmem:[#allocation29_spill] sm:$0xff]  ;;  %v10469_v2 = vld [vmem:[#allocation30_spill] sm:$0xff] }
 0x286   : > { %v6591_v26 = vpop.eup %6590  ;;  %v1287_v60 = vadd.bf16 1065369472, %v6589_v22  ;;  %v5689_v1 = vmul.bf16 3216621497, %v8496_v49  ;;  %v1830_v32 = vadd.f32 %v10468_v56, %v7795_v59  ;;  %v8516_v5 = vadd.f32 %v10469_v2, %v7798_v0  ;;  %v10470_v14 = vld [vmem:[#allocation31_spill] sm:$0xff]  ;;  %v8522_v9 = vpop.f32.mrb[76].mxu1 }
 0x287   : > { %v6593_v23 = vpop.eup %6592  ;;  %v1431_v20 = vunpack.c.l.bf16 %v1380_v57  ;;  %v1433_v45 = vunpack.c.h.bf16 %v1380_v57  ;;  %v2132_v48 = vmul.bf16 %v2087_v15, %v8316_v61  ;;  %v2039_v50 = vadd.bf16 1065369472, %v6591_v26  ;;  %10471 = vst [vmem:[#allocation28_spill] sm:$0xff] %v8522_v9  ;;  %v8524_v56 = vpop.f32.mrb[108].mxu0  ;;  %v10474_v2 = vld [vmem:[#allocation32_spill] sm:$0xff] }
 0x288   : > { %v1337_v24 = vmul.bf16 1065369472, %v6593_v23  ;;  %6608 = vrcp.bf16 %v1287_v60  ;;  %v8520_v22 = vadd.f32 %v10470_v14, %v7801_v58  ;;  %10472 = vst [vmem:[#allocation7_spill] sm:$0xff] %v8524_v56  ;;  %v6595_v55 = vpop.eup %6594  ;;  %v8527_v15 = vpop.f32.mrb[77].mxu1  ;;  %v1082_v14 = vadd.f32 %v10474_v2, %v7792_v37 }
 0x289   : > { %v1476_v57 = vadd.f32 %v8410_v7, %v1431_v20  ;;  %v2183_v51 = vunpack.c.l.bf16 %v2132_v48  ;;  %v2185_v61 = vunpack.c.h.bf16 %v2132_v48  ;;  %6610 = vrcp.bf16 %v2039_v50  ;;  %v8529_v26 = vpop.f32.mrb[109].mxu0  ;;  %v8534_v9 = vpop.f32.mrb[78].mxu1  ;;  %v10477_v20 = vld [vmem:[#allocation33_spill] sm:$0xff] }
 0x28a   : > { %10473 = vst [vmem:[#allocation13_spill] sm:$0xff] %v8529_v26  ;;  %v1381_v60 = vmul.bf16 %v1337_v24, %v8331_v62  ;;  %v2089_v23 = vmul.bf16 1065369472, %v6595_v55  ;;  %6612 = vpow.bf16 %v5640_v17  ;;  %10475 = vst [vmem:[#allocation29_spill] sm:$0xff] %v8534_v9  ;;  %v8536_v56 = vpop.f32.mrb[110].mxu0  ;;  %v1834_v48 = vadd.f32 %v10477_v20, %v7795_v59  ;;  %v8541_v50 = vpop.f32.mrb[79].mxu1 }
 0x28b   : > { %10476 = vst [vmem:[#allocation30_spill] sm:$0xff] %v8536_v56  ;;  %v1477_v27 = vadd.f32 %v1476_v57, %v1433_v45  ;;  %v2228_v7 = vadd.f32 %v8417_v4, %v2183_v51  ;;  %6614 = vpow.bf16 %v5688_v31  ;;  %v8543_v26 = vpop.f32.mrb[111].mxu0  ;;  %v6597_v62 = vpop.eup %6596  ;;  %v8546_v45 = vpack.c.bf16 %v1082_v14, %v1078_v8  ;;  %v10479_v51 = vld [vmem:[#allocation14_spill] sm:$0xff] }
 0x28c   : > { %10478 = vst [vmem:[#allocation31_spill] sm:$0xff] %v8543_v26  ;;  %v1432_v55 = vunpack.c.l.bf16 %v1381_v60  ;;  %v1434_v17 = vunpack.c.h.bf16 %v1381_v60  ;;  %v2133_v24 = vmul.bf16 %v2089_v23, %v8351_v47  ;;  %6616 = vpow.bf16 %v5641_v39  ;;  %v6599_v2 = vpop.eup %6598  ;;  %4082 = vmatmul.mubr.bf16.gmra.mrb[184].mxu1 %v10479_v51 }
 0x28d   : > { %v2229_v9 = vadd.f32 %v2228_v7, %v2185_v61  ;;  %v1288_v56 = vadd.bf16 1065369472, %v6597_v62  ;;  %6618 = vpow.bf16 %v5689_v1  ;;  %v6601_v4 = vpop.eup %6600  ;;  %v1339_v26 = vmul.bf16 1065369472, %v6599_v2  ;;  %4091 = vmatprep.mubr.bf16.mxu1 %v10399_v53  ;;  %v8558_v62 = vpop.f32.mrb[112].mxu0 }
 0x28e   : > { %v1513_v31 = vadd.f32 %v8442_v28, %v1432_v55  ;;  %v2184_v57 = vunpack.c.l.bf16 %v2133_v24  ;;  %v2186_v20 = vunpack.c.h.bf16 %v2133_v24  ;;  %v6603_v60 = vpop.eup %6602  ;;  %v2040_v47 = vadd.bf16 1065369472, %v6601_v4  ;;  %v8556_v28 = vpop.f32.mrb[80].mxu1  ;;  %v10480_v24 = vld [vmem:[#allocation34_spill] sm:$0xff] }
 0x28f   : > { %6620 = vrcp.bf16 %v1288_v56  ;;  %v5642_v39 = vmul.bf16 3216621497, %v8546_v45  ;;  %v8552_v61 = vpack.c.bf16 %v1834_v48, %v1830_v32  ;;  %v6605_v1 = vpop.eup %6604  ;;  %v1382_v14 = vmul.bf16 %v1339_v26, %v8369_v44  ;;  %v8563_v48 = vpop.f32.mrb[81].mxu1 }
 0x290   : > { %v1514_v8 = vadd.f32 %v1513_v31, %v1434_v17  ;;  %v2265_v23 = vadd.f32 %v8444_v41, %v2184_v57  ;;  %v2091_v7 = vmul.bf16 1065369472, %v6603_v60  ;;  %v6607_v55 = vpop.eup %6606  ;;  %6622 = vrcp.bf16 %v2040_v47  ;;  %10481 = vst [vmem:[#allocation32_spill] sm:$0xff] %v8563_v48  ;;  %v8565_v17 = vpop.f32.mrb[113].mxu0  ;;  %v10485_v47 = vld [vmem:[#allocation35_spill] sm:$0xff] }
 0x291   : > { %v1289_v53 = vadd.bf16 1065369472, %v6605_v1  ;;  %v5690_v56 = vmul.bf16 3216621497, %v8552_v61  ;;  %v1084_v32 = vadd.f32 %v10480_v24, %v7798_v0  ;;  %10482 = vst [vmem:[#allocation33_spill] sm:$0xff] %v8565_v17  ;;  %v1435_v2 = vunpack.c.l.bf16 %v1382_v14  ;;  %v8568_v51 = vpop.f32.mrb[82].mxu1 }
 0x292   : > { %v2266_v41 = vadd.f32 %v2265_v23, %v2186_v20  ;;  %v1437_v44 = vunpack.c.h.bf16 %v1382_v14  ;;  %v2134_v26 = vmul.bf16 %v2091_v7, %v8371_v11  ;;  %10483 = vst [vmem:[#allocation14_spill] sm:$0xff] %v8568_v51  ;;  %v8570_v4 = vpop.f32.mrb[114].mxu0  ;;  %v2041_v57 = vadd.bf16 1065369472, %v6607_v55  ;;  %v8577_v24 = vpop.f32.mrb[83].mxu1 }
 0x293   : > { %10484 = vst [vmem:[#allocation34_spill] sm:$0xff] %v8570_v4  ;;  %v6609_v31 = vpop.eup %6608  ;;  %6624 = vrcp.bf16 %v1289_v53  ;;  %v8573_v60 = vpack.c.bf16 %v1084_v32, %v8516_v5  ;;  %v1836_v1 = vadd.f32 %v10485_v47, %v7801_v58  ;;  %10486 = vst [vmem:[#allocation35_spill] sm:$0xff] %v8577_v24  ;;  %v8579_v20 = vpop.f32.mrb[115].mxu0  ;;  %v1478_v14 = vadd.f32 %v1477_v27, %v1435_v2  ;;  %v10488_v53 = vld [vmem:[#allocation15_spill] sm:$0xff] }
 0x294   : > { %10487 = vst [vmem:[#allocation46_spill] sm:$0xff] %v8579_v20  ;;  %v6611_v23 = vpop.eup %6610  ;;  %v2187_v11 = vunpack.c.l.bf16 %v2134_v26  ;;  %v2189_v7 = vunpack.c.h.bf16 %v2134_v26  ;;  %v1341_v51 = vmul.bf16 1065369472, %v6609_v31  ;;  %6626 = vrcp.bf16 %v2041_v57  ;;  %4092 = vmatmul.mubr.bf16.gmra.mrb[188].mxu1 %v10488_v53 }
 0x295   : > { %v6613_v17 = vpop.eup %6612  ;;  %v2093_v4 = vmul.bf16 1065369472, %v6611_v23  ;;  %v5643_v55 = vmul.bf16 3216621497, %v8573_v60  ;;  %v8583_v5 = vpack.c.bf16 %v1836_v1, %v8520_v22  ;;  %v1479_v47 = vadd.f32 %v1478_v14, %v1437_v44  ;;  %v8591_v53 = vpop.f32.mrb[84].mxu1 }
 0x296   : > { %v6615_v32 = vpop.eup %6614  ;;  %v2230_v24 = vadd.f32 %v2229_v9, %v2187_v11  ;;  %v1383_v20 = vmul.bf16 %v1341_v51, %v8373_v34  ;;  %v1290_v48 = vadd.bf16 1065369472, %v6613_v17  ;;  %6628 = vpow.bf16 %v5642_v39  ;;  %v8593_v44 = vpop.f32.mrb[116].mxu0 }
 0x297   : > { %v6617_v27 = vpop.eup %6616  ;;  %v2135_v2 = vmul.bf16 %v2093_v4, %v8389_v30  ;;  %v2042_v26 = vadd.bf16 1065369472, %v6615_v32  ;;  %v5691_v31 = vmul.bf16 3216621497, %v8583_v5  ;;  %v8595_v51 = vpop.f32.mrb[85].mxu1  ;;  %v1840_v32 = vadd.f32 %v8294_v19, %v7795_v59  ;;  %v10495_v19 = vld [vmem:[#allocation37_spill] sm:$0xff] }
 0x298   : > { %v6619_v57 = vpop.eup %6618  ;;  %v8589_v23 = vadd.f32 %v2230_v24, %v2189_v7  ;;  %v1436_v22 = vunpack.c.l.bf16 %v1383_v20  ;;  %v1438_v1 = vunpack.c.h.bf16 %v1383_v20  ;;  %6630 = vrcp.bf16 %v1290_v48  ;;  %v8597_v30 = vpop.f32.mrb[117].mxu0 }
 0x299   : > { %v2188_v9 = vunpack.c.l.bf16 %v2135_v2  ;;  %v2190_v34 = vunpack.c.h.bf16 %v2135_v2  ;;  %6632 = vrcp.bf16 %v2042_v26  ;;  %v1291_v17 = vadd.bf16 1065369472, %v6617_v27  ;;  %v8601_v48 = vpop.f32.mrb[86].mxu1  ;;  %v8603_v20 = vpop.f32.mrb[118].mxu0 }
 0x29a   : > { %v6621_v39 = vpop.eup %6620  ;;  %v1515_v4 = vadd.f32 %v1514_v8, %v1436_v22  ;;  %v2043_v14 = vadd.bf16 1065369472, %v6619_v57  ;;  %6634 = vpow.bf16 %v5690_v56  ;;  %v1088_v24 = vadd.f32 %v8292_v35, %v7792_v37  ;;  %10489 = vst [vmem:[#allocation15_spill] sm:$0xff] %v8601_v48  ;;  %10490 = vst [vmem:[#allocation47_spill] sm:$0xff] %v8603_v20  ;;  %v8607_v27 = vpop.f32.mrb[87].mxu1  ;;  %v10493_v56 = vld [vmem:[#allocation8_spill] sm:$0xff] }
 0x29b   : > { %v2267_v11 = vadd.f32 %v2266_v41, %v2188_v9  ;;  %v1343_v7 = vmul.bf16 1065369472, %v6621_v39  ;;  %6636 = vrcp.bf16 %v1291_v17  ;;  %10491 = vst [vmem:[#allocation48_spill] sm:$0xff] %v8607_v27  ;;  %v8609_v2 = vpop.f32.mrb[119].mxu0  ;;  %v6623_v8 = vpop.eup %6622  ;;  %v1090_v35 = vadd.f32 %v10493_v56, %v7798_v0  ;;  %v10494_v57 = vld [vmem:[#allocation36_spill] sm:$0xff] }
 0x29c   : > { %10492 = vst [vmem:[#allocation49_spill] sm:$0xff] %v8609_v2  ;;  %v1516_v26 = vadd.f32 %v1515_v4, %v1438_v1  ;;  %6638 = vrcp.bf16 %v2043_v14  ;;  %v1842_v22 = vadd.f32 %v10494_v57, %v7801_v58  ;;  %v2095_v9 = vmul.bf16 1065369472, %v6623_v8  ;;  %v10496_v2 = vld [vmem:[#allocation38_spill] sm:$0xff] }
 0x29d   : > { %v2268_v20 = vadd.f32 %v2267_v11, %v2190_v34  ;;  %v1384_v41 = vmul.bf16 %v1343_v7, %v8446_v3  ;;  %6640 = vpow.bf16 %v5643_v55  ;;  %v1092_v39 = vadd.f32 %v10495_v19, %v7792_v37  ;;  %v8631_v8 = vpop.f32.mrb[88].mxu1 }
 0x29e   : > { %v6625_v17 = vpop.eup %6624  ;;  %6642 = vpow.bf16 %v5691_v31  ;;  %v1844_v1 = vadd.f32 %v10496_v2, %v7795_v59  ;;  %v1094_v4 = vadd.f32 %v8305_v16, %v7798_v0  ;;  %v2136_v57 = vmul.bf16 %v2095_v9, %v8448_v43  ;;  %10497 = vst [vmem:[#allocation8_spill] sm:$0xff] %v8631_v8  ;;  %v8633_v2 = vpop.f32.mrb[120].mxu0 }
 0x29f   : > { %v1439_v14 = vunpack.c.l.bf16 %v1384_v41  ;;  %v1441_v56 = vunpack.c.h.bf16 %v1384_v41  ;;  %v1345_v34 = vmul.bf16 1065369472, %v6625_v17  ;;  %v6627_v11 = vpop.eup %6626  ;;  %v8623_v3 = vpack.c.bf16 %v1092_v39, %v1088_v24  ;;  %10498 = vst [vmem:[#allocation36_spill] sm:$0xff] %v8633_v2  ;;  %v8636_v9 = vpop.f32.mrb[89].mxu1 }
 0x2a0   : > { %v8625_v55 = vpack.c.bf16 %v1844_v1, %v1840_v32  ;;  %v8627_v31 = vpack.c.bf16 %v1094_v4, %v1090_v35  ;;  %v1846_v7 = vadd.f32 %v8307_v33, %v7801_v58  ;;  %v2191_v19 = vunpack.c.l.bf16 %v2136_v57  ;;  %10499 = vst [vmem:[#allocation37_spill] sm:$0xff] %v8636_v9  ;;  %v8638_v24 = vpop.f32.mrb[121].mxu0  ;;  %v8645_v2 = vpop.f32.mrb[90].mxu1 }
 0x2a1   : > { %v1480_v16 = vadd.f32 %v1479_v47, %v1439_v14  ;;  %v2193_v41 = vunpack.c.h.bf16 %v2136_v57  ;;  %v1385_v43 = vmul.bf16 %v1345_v34, %v8450_v21  ;;  %10500 = vst [vmem:[#allocation38_spill] sm:$0xff] %v8638_v24  ;;  %v6629_v32 = vpop.eup %6628  ;;  %v2097_v17 = vmul.bf16 1065369472, %v6627_v11  ;;  %10501 = vst [vmem:[#allocation50_spill] sm:$0xff] %v8645_v2  ;;  %v8647_v21 = vpop.f32.mrb[122].mxu0 }
 0x2a2   : > { %v5644_v35 = vmul.bf16 3216621497, %v8623_v3  ;;  %v5692_v39 = vmul.bf16 3216621497, %v8625_v55  ;;  %v8642_v33 = vpack.c.bf16 %v1846_v7, %v1842_v22  ;;  %v2232_v47 = vadd.f32 %v8589_v23, %v2191_v19  ;;  %10502 = vst [vmem:[#allocation51_spill] sm:$0xff] %v8647_v21  ;;  %v8650_v8 = vpop.f32.mrb[91].mxu1 }
 0x2a3   : > { %v6631_v1 = vpop.eup %6630  ;;  %v1481_v4 = vadd.f32 %v1480_v16, %v1441_v56  ;;  %v1440_v14 = vunpack.c.l.bf16 %v1385_v43  ;;  %v1442_v57 = vunpack.c.h.bf16 %v1385_v43  ;;  %v2137_v24 = vmul.bf16 %v2097_v17, %v8465_v6  ;;  %10503 = vst [vmem:[#allocation52_spill] sm:$0xff] %v8650_v8  ;;  %v8652_v22 = vpop.f32.mrb[123].mxu0 }
 0x2a4   : > { %v6633_v34 = vpop.eup %6632  ;;  %v1347_v11 = vmul.bf16 1065369472, %v6631_v1  ;;  %v1292_v9 = vadd.bf16 1065369472, %v6629_v32  ;;  %6644 = vpow.bf16 %v5644_v35  ;;  %10504 = vst [vmem:[#allocation53_spill] sm:$0xff] %v8652_v22  ;;  %v2233_v56 = vadd.f32 %v2232_v47, %v2193_v41 }
 0x2a5   : > { %v6635_v7 = vpop.eup %6634  ;;  %v1517_v16 = vadd.f32 %v1516_v26, %v1440_v14  ;;  %v2099_v23 = vmul.bf16 1065369472, %v6633_v34  ;;  %6646 = vpow.bf16 %v5692_v39  ;;  %v2192_v43 = vunpack.c.l.bf16 %v2137_v24  ;;  %v8656_v26 = vpop.f32.mrb[92].mxu1 }
 0x2a6   : > { %v6637_v19 = vpop.eup %6636  ;;  %v2194_v2 = vunpack.c.h.bf16 %v2137_v24  ;;  %v1386_v21 = vmul.bf16 %v1347_v11, %v8486_v38  ;;  %6648 = vrcp.bf16 %v1292_v9  ;;  %v2044_v35 = vadd.bf16 1065369472, %v6635_v7  ;;  %v8658_v39 = vpop.f32.mrb[124].mxu0 }
 0x2a7   : > { %v6639_v27 = vpop.eup %6638  ;;  %v1518_v6 = vadd.f32 %v1517_v16, %v1442_v57  ;;  %v2138_v32 = vmul.bf16 %v2099_v23, %v8488_v12  ;;  %v1349_v17 = vmul.bf16 1065369472, %v6637_v19  ;;  %v2269_v8 = vadd.f32 %v2268_v20, %v2192_v43  ;;  %v8661_v9 = vpop.f32.mrb[93].mxu1 }
 0x2a8   : > { %v6641_v1 = vpop.eup %6640  ;;  %v1443_v22 = vunpack.c.l.bf16 %v1386_v21  ;;  %v1445_v48 = vunpack.c.h.bf16 %v1386_v21  ;;  %v2101_v41 = vmul.bf16 1065369472, %v6639_v27  ;;  %6650 = vrcp.bf16 %v2044_v35  ;;  %v8663_v12 = vpop.f32.mrb[125].mxu0 }
 0x2a9   : > { %v6643_v47 = vpop.eup %6642  ;;  %v2195_v24 = vunpack.c.l.bf16 %v2138_v32  ;;  %v2197_v14 = vunpack.c.h.bf16 %v2138_v32  ;;  %v1387_v38 = vmul.bf16 %v1349_v17, %v8494_v40  ;;  %v2270_v57 = vadd.f32 %v2269_v8, %v2194_v2  ;;  %v8666_v27 = vpop.f32.mrb[94].mxu1 }
 0x2aa   : > { %v1482_v34 = vadd.f32 %v1481_v4, %v1443_v22  ;;  %v2139_v20 = vmul.bf16 %v2101_v41, %v8496_v49  ;;  %v1293_v21 = vadd.bf16 1065369472, %v6641_v1  ;;  %v8668_v11 = vpop.f32.mrb[126].mxu0  ;;  %v2045_v19 = vadd.bf16 1065369472, %v6643_v47  ;;  %v8670_v43 = vpop.f32.mrb[95].mxu1 }
 0x2ab   : > { %v2234_v7 = vadd.f32 %v2233_v56, %v2195_v24  ;;  %v1444_v16 = vunpack.c.l.bf16 %v1387_v38  ;;  %v1446_v23 = vunpack.c.h.bf16 %v1387_v38  ;;  %v8672_v40 = vpop.f32.mrb[127].mxu0  ;;  %v5645_v4 = vmul.bf16 3216621497, %v8627_v31  ;;  %v8695_v24 = vld [vmem:[%s10353_s4 + $0x4] sm:$0x3] }
 0x2ac   : > { %v8674_v32 = vadd.f32 %v1482_v34, %v1445_v48  ;;  %v2196_v17 = vunpack.c.l.bf16 %v2139_v20  ;;  %v2198_v8 = vunpack.c.h.bf16 %v2139_v20  ;;  %6652 = vrcp.bf16 %v1293_v21 }
 0x2ad   : > { %v8676_v2 = vadd.f32 %v2234_v7, %v2197_v14  ;;  %v1519_v49 = vadd.f32 %v1518_v6, %v1444_v16  ;;  %6654 = vrcp.bf16 %v2045_v19  ;;  %v5693_v56 = vmul.bf16 3216621497, %v8642_v33 }
 0x2ae   : > { %v2271_v22 = vadd.f32 %v2270_v57, %v2196_v17  ;;  %v1098_v35 = vadd.f32 %v8320_v36, %v7792_v37  ;;  %v1850_v1 = vadd.f32 %v8322_v63, %v7795_v59  ;;  %6656 = vpow.bf16 %v5645_v4  ;;  %v8708_v57 = vpop.f32.mrb[128].mxu0 }
 0x2af   : > { %v6645_v48 = vpop.eup %6644  ;;  %v8684_v41 = vadd.f32 %v1519_v49, %v1446_v23  ;;  %v1100_v47 = vadd.f32 %v8325_v52, %v7798_v0  ;;  %v8690_v6 = vadd.f32 %v8327_v46, %v7801_v58  ;;  %6658 = vpow.bf16 %v5693_v56  ;;  %v8704_v52 = vld [vmem:[%s10353_s4 + $0x6] sm:$0x3]  ;;  %v8706_v46 = vpop.f32.mrb[96].mxu1 }
 0x2b0   : > { %v6647_v36 = vpop.eup %6646  ;;  %v8697_v14 = vadd.f32 %v2271_v22, %v2198_v8  ;;  %v1294_v63 = vadd.bf16 1065369472, %v6645_v48  ;;  %v1102_v38 = vadd.f32 %v8337_v42, %v7792_v37  ;;  %v1854_v21 = vadd.f32 %v8339_v10, %v7795_v59  ;;  %v8717_v37 = vpop.f32.mrb[97].mxu1  ;;  %v3817_v59 = vld [vmem:[%s10353_s4 + $0x8] sm:$0x3] }
 0x2b1   : > { %v6649_v34 = vpop.eup %6648  ;;  %v2046_v20 = vadd.bf16 1065369472, %v6647_v36  ;;  %v10505_v7 = vlaneseq  ;;  %v10506_v16 = vmov 0  ;;  %v8719_v42 = vpop.f32.mrb[129].mxu0  ;;  %v7150_v17 = vmov 0.0   ;;  %v10512_v22 = vld [vmem:[#allocation17_spill] sm:$0xff] }
 0x2b2   : > { %10509 = vst [vmem:[#allocation55_spill] sm:$0xff] %v8719_v42  ;;  %v1351_v23 = vmul.bf16 1065369472, %v6649_v34  ;;  %6660 = vrcp.bf16 %v1294_v63  ;;  %v8721_v19 = vpack.c.bf16 %v1102_v38, %v1098_v35  ;;  %310 = vst [vmem:[#allocation2] sm:$0xff] %v7150_v17  ;;  %v1104_v8 = vadd.f32 %v8343_v18, %v7798_v0  ;;  %v8730_v10 = vpop.f32.mrb[98].mxu1  ;;  %v8732_v49 = vpop.f32.mrb[130].mxu0 }
 0x2b3   : > { %vm8713_vm1 = vcmp.lt.s32.totalorder %v10505_v7, 256  ;;  %10510 = vst [vmem:[#allocation56_spill] sm:$0xff] %v8730_v10  ;;  %10511 = vst [vmem:[#allocation57_spill] sm:$0xff] %v8732_v49  ;;  %6662 = vrcp.bf16 %v2046_v20  ;;  %v8734_v4 = vpack.c.bf16 %v1854_v21, %v1850_v1  ;;  %v8738_v56 = vrot.slane %v8695_v24, %v10512_v22  ;;  %v8740_v35 = vpop.f32.mrb[99].mxu1  ;;  %v8742_v0 = vpop.f32.mrb[131].mxu0 }
 0x2b4   : > { %v10507_v16 = vsel %vm8713_vm1, 4294967295, %v10506_v16  ;;  %315 = vst.msk [vmem:[#allocation2 + $0x8] sm:$0x3] %vm8713_vm1, %v7150_v17  ;;  %10513 = vst [vmem:[#allocation58_spill] sm:$0xff] %v8740_v35  ;;  %v6651_v18 = vpop.eup %6650  ;;  %v1388_v48 = vmul.bf16 %v1351_v23, %v8546_v45  ;;  %v5646_v36 = vmul.bf16 3216621497, %v8721_v19  ;;  %v8746_v63 = vpack.c.bf16 %v1104_v8, %v1100_v47 }
 0x2b5   : > { %10508 = vst [vmem:[#allocation54_spill] sm:$0xff] %v10507_v16  ;;  %10514 = vst [vmem:[#allocation59_spill] sm:$0xff] %v8742_v0  ;;  %v7151_v38 = vmov 1966171168   ;;  %v2103_v20 = vmul.bf16 1065369472, %v6651_v18  ;;  %v8751_v21 = vrot.slane %v8704_v52, %v10512_v22  ;;  %v8754_v7 = vrot.slane %v3817_v59, %v10512_v22 }
 0x2b6   : > { %v1537_v34 = vunpack.c.l.s4 %v7151_v38  ;;  %v5694_v1 = vmul.bf16 3216621497, %v8734_v4  ;;  %v1447_v17 = vunpack.c.l.bf16 %v1388_v48  ;;  %v1449_v0 = vunpack.c.h.bf16 %v1388_v48  ;;  %v8763_v48 = vpop.f32.mrb[100].mxu1 }
 0x2b7   : > { %10515 = vst [vmem:[#allocation60_spill] sm:$0xff] %v8754_v7  ;;  %6664 = vpow.bf16 %v5646_v36  ;;  %v5647_v45 = vmul.bf16 3216621497, %v8746_v63  ;;  %v6653_v23 = vpop.eup %6652  ;;  %v2140_v47 = vmul.bf16 %v2103_v20, %v8552_v61  ;;  %v1856_v18 = vadd.f32 %v8345_v29, %v7801_v58  ;;  %10516 = vst [vmem:[#allocation61_spill] sm:$0xff] %v8763_v48  ;;  %v8765_v36 = vpop.f32.mrb[132].mxu0  ;;  %v10518_v20 = vld [vmem:[#allocation16_spill] sm:$0xff] }
 0x2b8   : > { %6666 = vpow.bf16 %v5694_v1  ;;  %v1538_v8 = vunpack.c.0.s8 %v1537_v34  ;;  %v6655_v38 = vpop.eup %6654  ;;  %v1484_v35 = vadd.f32 %v8674_v32, %v1447_v17  ;;  %v1353_v49 = vmul.bf16 1065369472, %v6653_v23  ;;  %10517 = vst [vmem:[#allocation62_spill] sm:$0xff] %v8765_v36  ;;  %v8776_v17 = vpop.f32.mrb[101].mxu1 }
 0x2b9   : > { %6668 = vpow.bf16 %v5647_v45  ;;  %v2448_v59 = vadd.f32 %v8377_v25, %v8738_v56  ;;  %v2199_v22 = vunpack.c.l.bf16 %v2140_v47  ;;  %v2201_v7 = vunpack.c.h.bf16 %v2140_v47  ;;  %v6657_v1 = vpop.eup %6656  ;;  %10520 = vst [vmem:[#allocation64_spill] sm:$0xff] %v8776_v17  ;;  %v8778_v45 = vpop.f32.mrb[133].mxu0 }
 0x2ba   : > { %v2105_v61 = vmul.bf16 1065369472, %v6655_v38  ;;  %v8768_v34 = vsub.s32 %v1538_v8, %v10518_v20  ;;  %v1485_v58 = vadd.f32 %v1484_v35, %v1449_v0  ;;  %v1389_v29 = vmul.bf16 %v1353_v49, %v8573_v60  ;;  %10521 = vst [vmem:[#allocation65_spill] sm:$0xff] %v8778_v45  ;;  %v6659_v23 = vpop.eup %6658  ;;  %v10522_v20 = vld [vmem:[#allocation18_spill] sm:$0xff]  ;;  %v8786_v60 = vpop.f32.mrb[102].mxu1 }
 0x2bb   : > { %v8772_v32 = vpack.c.bf16 %v1856_v18, %v8690_v6  ;;  %v3196_v25 = vadd.f32 %v8379_v54, %v8751_v21  ;;  %v2236_v47 = vadd.f32 %v8676_v2, %v2199_v22  ;;  %v1295_v38 = vadd.bf16 1065369472, %v6657_v1  ;;  %10523 = vst [vmem:[#allocation66_spill] sm:$0xff] %v8786_v60  ;;  %v8792_v1 = vpop.f32.mrb[134].mxu0 }
 0x2bc   : > { %10519 = vst [vmem:[#allocation63_spill] sm:$0xff] %v8768_v34  ;;  %v2141_v8 = vmul.bf16 %v2105_v61, %v8583_v5  ;;  %v8784_v35 = vrot.slane %v8695_v24, %v10522_v20  ;;  %v1448_v6 = vunpack.c.l.bf16 %v1389_v29  ;;  %v1450_v49 = vunpack.c.h.bf16 %v1389_v29  ;;  %v10524_v24 = vld [vmem:[#allocation9_spill] sm:$0xff] }
 0x2bd   : > { %v2047_v0 = vadd.bf16 1065369472, %v6659_v23  ;;  %v5695_v54 = vmul.bf16 3216621497, %v8772_v32  ;;  %v6661_v18 = vpop.eup %6660  ;;  %v2237_v17 = vadd.f32 %v2236_v47, %v2201_v7  ;;  %6670 = vrcp.bf16 %v1295_v38  ;;  %10525 = vst [vmem:[#allocation9_spill] sm:$0xff] %v8792_v1 }
 0x2be   : > { %v2200_v45 = vunpack.c.l.bf16 %v2141_v8  ;;  %v2202_v36 = vunpack.c.h.bf16 %v2141_v8  ;;  %v6663_v2 = vpop.eup %6662  ;;  %v1521_v5 = vadd.f32 %v8684_v41, %v1448_v6  ;;  %v1355_v22 = vmul.bf16 1065369472, %v6661_v18  ;;  %v10526_v41 = vld [vmem:[#allocation10_spill] sm:$0xff] }
 0x2bf   : > { %6672 = vrcp.bf16 %v2047_v0  ;;  %v2450_v61 = vadd.f32 %v10524_v24, %v8784_v35  ;;  %v2107_v23 = vmul.bf16 1065369472, %v6663_v2  ;;  %v8797_v7 = vrot.slane %v8704_v52, %v10522_v20  ;;  %v10527_v6 = vld [vmem:[#allocation22_spill] sm:$0xff] }
 0x2c0   : > { %v2273_v29 = vadd.f32 %v8697_v14, %v2200_v45  ;;  %6674 = vpow.bf16 %v5695_v54  ;;  %v8799_v47 = vadd.f32 %v1521_v5, %v1450_v49  ;;  %v1390_v8 = vmul.bf16 %v1355_v22, %v8623_v3  ;;  %v10528_v45 = vld [vmem:[#allocation21_spill] sm:$0xff]  ;;  %v8813_v49 = vpop.f32.mrb[103].mxu1  ;;  %v8815_v3 = vpop.f32.mrb[135].mxu0 }
 0x2c1   : > { %v2452_v38 = vadd.f32 %v10526_v41, %v8738_v56  ;;  %v3200_v0 = vadd.f32 %v10527_v6, %v8751_v21  ;;  %v2142_v14 = vmul.bf16 %v2107_v23, %v8625_v55  ;;  %v3198_v54 = vadd.f32 %v10528_v45, %v8797_v7  ;;  %10529 = vst [vmem:[#allocation10_spill] sm:$0xff] %v8813_v49 }
 0x2c2   : > { %v6665_v18 = vpop.eup %6664  ;;  %v8806_v24 = vadd.f32 %v2273_v29, %v2202_v36  ;;  %v2454_v52 = vadd.f32 %v8398_v13, %v8784_v35  ;;  %10530 = vst [vmem:[#allocation22_spill] sm:$0xff] %v8815_v3  ;;  %v1451_v5 = vunpack.c.l.bf16 %v1390_v8  ;;  %v1453_v22 = vunpack.c.h.bf16 %v1390_v8 }
 0x2c3   : > { %v6667_v2 = vpop.eup %6666  ;;  %v1296_v41 = vadd.bf16 1065369472, %v6665_v18  ;;  %v8817_v6 = vpack.c.bf16 %v2452_v38, %v2448_v59  ;;  %v2203_v29 = vunpack.c.l.bf16 %v2142_v14  ;;  %v2205_v20 = vunpack.c.h.bf16 %v2142_v14  ;;  %v10531_v59 = vld [vmem:[#allocation23_spill] sm:$0xff] }
 0x2c4   : > { %v6669_v36 = vpop.eup %6668  ;;  %v2048_v55 = vadd.bf16 1065369472, %v6667_v2  ;;  %v8819_v23 = vpack.c.bf16 %v3200_v0, %v3196_v25  ;;  %v1486_v45 = vadd.f32 %v1485_v58, %v1451_v5  ;;  %v8823_v60 = vpack.c.bf16 %v2454_v52, %v2450_v61  ;;  %v10532_v25 = vld [vmem:[#allocation11_spill] sm:$0xff]  ;;  %v8836_v2 = vpop.f32.mrb[104].mxu1  ;;  %v10536_v5 = vld [vmem:[#allocation40_spill] sm:$0xff] }
 0x2c5   : > { %6676 = vrcp.bf16 %v1296_v41  ;;  %v1297_v1 = vadd.bf16 1065369472, %v6669_v36  ;;  %v5712_v13 = vmul.bf16 3216621497, %v8817_v6  ;;  %v2238_v49 = vadd.f32 %v2237_v17, %v2203_v29  ;;  %v10533_v17 = vld [vmem:[#allocation39_spill] sm:$0xff]  ;;  %10534 = vst [vmem:[#allocation21_spill] sm:$0xff] %v8836_v2 }
 0x2c6   : > { %6678 = vrcp.bf16 %v2048_v55  ;;  %v5760_v3 = vmul.bf16 3216621497, %v8819_v23  ;;  %v8825_v8 = vadd.f32 %v1486_v45, %v1453_v22  ;;  %v3202_v38 = vadd.f32 %v10531_v59, %v8797_v7  ;;  %v8838_v61 = vpop.f32.mrb[136].mxu0  ;;  %v8846_v41 = vpop.f32.mrb[105].mxu1  ;;  %v10540_v45 = vld [vmem:[#allocation42_spill] sm:$0xff] }
 0x2c7   : > { %6680 = vrcp.bf16 %v1297_v1  ;;  %v2458_v0 = vadd.f32 %v10532_v25, %v8738_v56  ;;  %v8831_v58 = vadd.f32 %v2238_v49, %v2205_v20  ;;  %v5713_v18 = vmul.bf16 3216621497, %v8823_v60  ;;  %10535 = vst [vmem:[#allocation23_spill] sm:$0xff] %v8838_v61  ;;  %v10537_v20 = vld [vmem:[#allocation41_spill] sm:$0xff]  ;;  %10538 = vst [vmem:[#allocation11_spill] sm:$0xff] %v8846_v41  ;;  %v8848_v36 = vpop.f32.mrb[137].mxu0 }
 0x2c8   : > { %6682 = vpow.bf16 %v5712_v13  ;;  %v3206_v14 = vadd.f32 %v10533_v17, %v8751_v21  ;;  %v6671_v52 = vpop.eup %6670  ;;  %v8840_v1 = vpack.c.bf16 %v3202_v38, %v3198_v54  ;;  %v2460_v22 = vadd.f32 %v10536_v5, %v8784_v35  ;;  %10539 = vst [vmem:[#allocation39_spill] sm:$0xff] %v8848_v36  ;;  %v8854_v59 = vpop.f32.mrb[106].mxu1 }
 0x2c9   : > { %6684 = vpow.bf16 %v5760_v3  ;;  %v3208_v49 = vadd.f32 %v10537_v20, %v8797_v7  ;;  %v1357_v55 = vmul.bf16 1065369472, %v6671_v52  ;;  %v2462_v13 = vadd.f32 %v10540_v45, %v8738_v56  ;;  %v10541_v3 = vld [vmem:[#allocation43_spill] sm:$0xff]  ;;  %10542 = vst [vmem:[#allocation40_spill] sm:$0xff] %v8854_v59  ;;  %v8856_v38 = vpop.f32.mrb[138].mxu0  ;;  %v10544_v20 = vld [vmem:[#allocation44_spill] sm:$0xff] }
 0x2ca   : > { %v6673_v29 = vpop.eup %6672  ;;  %6686 = vpow.bf16 %v5713_v18  ;;  %v3210_v54 = vadd.f32 %v10541_v3, %v8751_v21  ;;  %10543 = vst [vmem:[#allocation41_spill] sm:$0xff] %v8856_v38  ;;  %v5761_v5 = vmul.bf16 3216621497, %v8840_v1  ;;  %v2464_v36 = vadd.f32 %v10544_v20, %v8784_v35  ;;  %v10545_v52 = vld [vmem:[#allocation45_spill] sm:$0xff]  ;;  %v8863_v41 = vpop.f32.mrb[107].mxu1 }
 0x2cb   : > { %v6675_v25 = vpop.eup %6674  ;;  %v2109_v17 = vmul.bf16 1065369472, %v6673_v29  ;;  %v3212_v18 = vadd.f32 %v10545_v52, %v8797_v7  ;;  %10546 = vst [vmem:[#allocation42_spill] sm:$0xff] %v8863_v41  ;;  %v8865_v45 = vpop.f32.mrb[139].mxu0  ;;  %v1391_v3 = vmul.bf16 %v1357_v55, %v8627_v31  ;;  %v8868_v59 = vpack.c.bf16 %v2462_v13, %v2458_v0 }
 0x2cc   : > { %10547 = vst [vmem:[#allocation43_spill] sm:$0xff] %v8865_v45  ;;  %v2049_v61 = vadd.bf16 1065369472, %v6675_v25  ;;  %v8870_v38 = vpack.c.bf16 %v3210_v54, %v3206_v14  ;;  %6688 = vpow.bf16 %v5761_v5  ;;  %v8873_v2 = vpack.c.bf16 %v2464_v36, %v2460_v22  ;;  %v10548_v22 = vld [vmem:[#allocation12_spill] sm:$0xff]  ;;  %v10549_v54 = vld [vmem:[#allocation19_spill] sm:$0xff] }
 0x2cd   : > { %v2143_v29 = vmul.bf16 %v2109_v17, %v8642_v33  ;;  %v8875_v20 = vpack.c.bf16 %v3212_v18, %v3208_v49  ;;  %v1452_v48 = vunpack.c.l.bf16 %v1391_v3  ;;  %v1454_v52 = vunpack.c.h.bf16 %v1391_v3 }
 0x2ce   : > { %6690 = vrcp.bf16 %v2049_v61  ;;  %v5714_v41 = vmul.bf16 3216621497, %v8868_v59  ;;  %v5762_v31 = vmul.bf16 3216621497, %v8870_v38  ;;  %v5715_v0 = vmul.bf16 3216621497, %v8873_v2 }
 0x2cf   : > { %v2204_v45 = vunpack.c.l.bf16 %v2143_v29  ;;  %v2206_v10 = vunpack.c.h.bf16 %v2143_v29  ;;  %v1523_v55 = vadd.f32 %v8799_v47, %v1452_v48  ;;  %v5763_v33 = vmul.bf16 3216621497, %v8875_v20  ;;  %v10550_v48 = vld [vmem:[#allocation6_spill] sm:$0xff] }
 0x2d0   : > { %v6677_v14 = vpop.eup %6676  ;;  %6692 = vpow.bf16 %v5714_v41  ;;  %v2468_v49 = vadd.f32 %v10548_v22, %v8738_v56  ;;  %v3216_v25 = vadd.f32 %v10549_v54, %v8751_v21  ;;  %v2470_v47 = vadd.f32 %v10550_v48, %v8784_v35 }
 0x2d1   : > { %v6679_v36 = vpop.eup %6678  ;;  %v2275_v61 = vadd.f32 %v8806_v24, %v2204_v45  ;;  %v1359_v13 = vmul.bf16 1065369472, %v6677_v14  ;;  %6694 = vpow.bf16 %v5762_v31  ;;  %v1524_v5 = vadd.f32 %v1523_v55, %v1454_v52  ;;  %v10551_v14 = vld [vmem:[#allocation20_spill] sm:$0xff] }
 0x2d2   : > { %v6681_v17 = vpop.eup %6680  ;;  %v2111_v18 = vmul.bf16 1065369472, %v6679_v36  ;;  %6696 = vpow.bf16 %v5715_v0  ;;  %v8895_v54 = vadd.f32 %v10551_v14, %v8797_v7  ;;  %v10552_v52 = vld [vmem:[#allocation24_spill] sm:$0xff] }
 0x2d3   : > { %v6683_v41 = vpop.eup %6682  ;;  %v8889_v3 = vadd.f32 %v2275_v61, %v2206_v10  ;;  %v1392_v29 = vmul.bf16 %v1359_v13, %v8721_v19  ;;  %v1361_v22 = vmul.bf16 1065369472, %v6681_v17  ;;  %6698 = vpow.bf16 %v5763_v33 }
 0x2d4   : > { %v6685_v24 = vpop.eup %6684  ;;  %v2144_v45 = vmul.bf16 %v2111_v18, %v8734_v4  ;;  %v2766_v31 = vadd.bf16 1065369472, %v6683_v41  ;;  %v2472_v0 = vadd.f32 %v10552_v52, %v8738_v56 }
 0x2d5   : > { %v6687_v55 = vpop.eup %6686  ;;  %v1455_v36 = vunpack.c.l.bf16 %v1392_v29  ;;  %v1457_v48 = vunpack.c.h.bf16 %v1392_v29  ;;  %v1393_v10 = vmul.bf16 %v1361_v22, %v8746_v63  ;;  %v3514_v61 = vadd.bf16 1065369472, %v6685_v24  ;;  %v10553_v29 = vld [vmem:[#allocation25_spill] sm:$0xff] }
 0x2d6   : > { %v2207_v19 = vunpack.c.l.bf16 %v2144_v45  ;;  %v2209_v13 = vunpack.c.h.bf16 %v2144_v45  ;;  %6700 = vrcp.bf16 %v2766_v31  ;;  %v2767_v33 = vadd.bf16 1065369472, %v6687_v55  ;;  %v10554_v31 = vld [vmem:[#allocation26_spill] sm:$0xff] }
 0x2d7   : > { %v1488_v4 = vadd.f32 %v8825_v8, %v1455_v36  ;;  %v1456_v17 = vunpack.c.l.bf16 %v1393_v10  ;;  %v1458_v18 = vunpack.c.h.bf16 %v1393_v10  ;;  %6702 = vrcp.bf16 %v3514_v61  ;;  %v6689_v41 = vpop.eup %6688 }
 0x2d8   : > { %v2240_v14 = vadd.f32 %v8831_v58, %v2207_v19  ;;  %6704 = vrcp.bf16 %v2767_v33  ;;  %v8902_v52 = vpack.c.bf16 %v2472_v0, %v2468_v49  ;;  %v3220_v42 = vadd.f32 %v10553_v29, %v8751_v21 }
 0x2d9   : > { %v6691_v63 = vpop.eup %6690  ;;  %v1489_v22 = vadd.f32 %v1488_v4, %v1457_v48  ;;  %v1525_v24 = vadd.f32 %v1524_v5, %v1456_v17  ;;  %v3515_v45 = vadd.bf16 1065369472, %v6689_v41  ;;  %v2474_v55 = vadd.f32 %v10554_v31, %v8784_v35  ;;  %v8914_v4 = vpop.f32.mrb[108].mxu1 }
 0x2da   : > { %v2241_v8 = vadd.f32 %v2240_v14, %v2209_v13  ;;  %v2113_v36 = vmul.bf16 1065369472, %v6691_v63  ;;  %v5716_v10 = vmul.bf16 3216621497, %v8902_v52  ;;  %v8909_v61 = vpack.c.bf16 %v3220_v42, %v3216_v25  ;;  %10555 = vst [vmem:[#allocation44_spill] sm:$0xff] %v8914_v4  ;;  %v8916_v13 = vpop.f32.mrb[140].mxu0 }
 0x2db   : > { %v6693_v58 = vpop.eup %6692  ;;  %v1490_v19 = vrot.slane %v1489_v22, 4  ;;  %v1526_v49 = vadd.f32 %v1525_v24, %v1458_v18  ;;  %6706 = vrcp.bf16 %v3515_v45  ;;  %v8911_v0 = vpack.c.bf16 %v2474_v55, %v2470_v47  ;;  %10556 = vst [vmem:[#allocation45_spill] sm:$0xff] %v8916_v13  ;;  %v8919_v18 = vpop.f32.mrb[109].mxu1 }
 0x2dc   : > { %v6695_v33 = vpop.eup %6694  ;;  %v2242_v29 = vrot.slane %v2241_v8, 4  ;;  %v2145_v5 = vmul.bf16 %v2113_v36, %v8772_v32  ;;  %v2768_v48 = vadd.bf16 1065369472, %v6693_v58  ;;  %6708 = vpow.bf16 %v5716_v10  ;;  %10557 = vst [vmem:[#allocation12_spill] sm:$0xff] %v8919_v18  ;;  %v8921_v32 = vpop.f32.mrb[141].mxu0 }
 0x2dd   : > { %v6697_v17 = vpop.eup %6696  ;;  %v1491_v41 = vadd.f32 %v1490_v19, %v1489_v22  ;;  %v1527_v42 = vrot.slane %v1526_v49, 4  ;;  %v3516_v25 = vadd.bf16 1065369472, %v6695_v33  ;;  %v5764_v14 = vmul.bf16 3216621497, %v8909_v61  ;;  %10558 = vst [vmem:[#allocation19_spill] sm:$0xff] %v8921_v32 }
 0x2de   : > { %v6699_v47 = vpop.eup %6698  ;;  %v2243_v63 = vadd.f32 %v2242_v29, %v2241_v8  ;;  %v2208_v24 = vunpack.c.l.bf16 %v2145_v5  ;;  %v2210_v45 = vunpack.c.h.bf16 %v2145_v5  ;;  %6710 = vrcp.bf16 %v2768_v48  ;;  %v8923_v31 = vpop.f32.mrb[110].mxu1 }
 0x2df   : > { %10559 = vst [vmem:[#allocation6_spill] sm:$0xff] %v8923_v31  ;;  %v1492_v55 = vrot.slane %v1491_v41, 2  ;;  %v1528_v36 = vadd.f32 %v1527_v42, %v1526_v49  ;;  %6712 = vrcp.bf16 %v3516_v25  ;;  %v2769_v10 = vadd.bf16 1065369472, %v6697_v17  ;;  %v8925_v22 = vpop.f32.mrb[142].mxu0  ;;  %v8927_v58 = vpop.f32.mrb[111].mxu1 }
 0x2e0   : > { %10560 = vst [vmem:[#allocation20_spill] sm:$0xff] %v8925_v22  ;;  %10561 = vst [vmem:[#allocation24_spill] sm:$0xff] %v8927_v58  ;;  %v2244_v19 = vrot.slane %v2243_v63, 2  ;;  %v2277_v33 = vadd.f32 %v8889_v3, %v2208_v24  ;;  %v3517_v18 = vadd.bf16 1065369472, %v6699_v47  ;;  %6714 = vpow.bf16 %v5764_v14  ;;  %v8930_v8 = vpop.f32.mrb[143].mxu0 }
 0x2e1   : > { %10562 = vst [vmem:[#allocation25_spill] sm:$0xff] %v8930_v8  ;;  %v6701_v29 = vpop.eup %6700  ;;  %v1493_v5 = vadd.f32 %v1492_v55, %v1491_v41  ;;  %v1529_v48 = vrot.slane %v1528_v36, 2  ;;  %6716 = vrcp.bf16 %v2769_v10  ;;  %v5717_v31 = vmul.bf16 3216621497, %v8911_v0  ;;  %v8934_v41 = vpop.f32.mrb[112].mxu1 }
 0x2e2   : > { %v6703_v49 = vpop.eup %6702  ;;  %v2245_v42 = vadd.f32 %v2244_v19, %v2243_v63  ;;  %v2278_v17 = vadd.f32 %v2277_v33, %v2210_v45  ;;  %v2799_v25 = vmul.bf16 1065369472, %v6701_v29  ;;  %6718 = vrcp.bf16 %v3517_v18  ;;  %10563 = vst [vmem:[#allocation26_spill] sm:$0xff] %v8934_v41  ;;  %v8936_v55 = vpop.f32.mrb[144].mxu0  ;;  %v10565_v18 = vld [vmem:[#allocation27_spill] sm:$0xff] }
 0x2e3   : > { %v6705_v22 = vpop.eup %6704  ;;  %v1494_v58 = vrot.slane %v1493_v5, 1  ;;  %v1530_v32 = vadd.f32 %v1529_v48, %v1528_v36  ;;  %v3547_v13 = vmul.bf16 1065369472, %v6703_v49  ;;  %6720 = vpow.bf16 %v5717_v31  ;;  %10564 = vst [vmem:[#allocation67_spill] sm:$0xff] %v8936_v55  ;;  %v8941_v19 = vpop.f32.mrb[113].mxu1 }
 0x2e4   : > { %v2246_v3 = vrot.slane %v2245_v42, 1  ;;  %v2279_v14 = vrot.slane %v2278_v17, 4  ;;  %v2862_v47 = vmul.bf16 %v2799_v25, %v8817_v6  ;;  %v2801_v24 = vmul.bf16 1065369472, %v6705_v22  ;;  %10566 = vst [vmem:[#allocation27_spill] sm:$0xff] %v8941_v19  ;;  %v8943_v36 = vpop.f32.mrb[145].mxu0 }
 0x2e5   : > { %v1495_v10 = vadd.f32 %v1494_v58, %v1493_v5  ;;  %v1531_v8 = vrot.slane %v1530_v32, 1  ;;  %v3610_v63 = vmul.bf16 %v3547_v13, %v8819_v23  ;;  %v3222_v45 = vadd.f32 %v10565_v18, %v8797_v7  ;;  %10567 = vst [vmem:[#allocation68_spill] sm:$0xff] %v8943_v36  ;;  %v8945_v48 = vpop.f32.mrb[114].mxu1  ;;  %v8947_v49 = vpop.f32.mrb[146].mxu0 }
 0x2e6   : > { %v6707_v31 = vpop.eup %6706  ;;  %v2247_v33 = vadd.f32 %v2246_v3, %v2245_v42  ;;  %v2280_v29 = vadd.f32 %v2279_v14, %v2278_v17  ;;  %v2895_v6 = vunpack.c.l.bf16 %v2862_v47  ;;  %v2897_v22 = vunpack.c.h.bf16 %v2862_v47  ;;  %10568 = vst [vmem:[#allocation69_spill] sm:$0xff] %v8945_v48  ;;  %10569 = vst [vmem:[#allocation70_spill] sm:$0xff] %v8947_v49  ;;  %v8950_v18 = vpop.f32.mrb[115].mxu1 }
 0x2e7   : > { %v6709_v58 = vpop.eup %6708  ;;  %v1532_v5 = vadd.f32 %v1531_v8, %v1530_v32  ;;  %v3643_v25 = vunpack.c.l.bf16 %v3610_v63  ;;  %v3645_v23 = vunpack.c.h.bf16 %v3610_v63  ;;  %v2863_v13 = vmul.bf16 %v2801_v24, %v8823_v60  ;;  %10570 = vst [vmem:[#allocation71_spill] sm:$0xff] %v8950_v18  ;;  %v8952_v19 = vpop.f32.mrb[147].mxu0 }
 0x2e8   : > { %10571 = vst [vmem:[#allocation72_spill] sm:$0xff] %v8952_v19  ;;  %v2281_v36 = vrot.slane %v2280_v29, 2  ;;  %v2959_v55 = vadd.f32 %v2897_v22, %v2895_v6  ;;  %v3549_v42 = vmul.bf16 1065369472, %v6707_v31  ;;  %v2770_v17 = vadd.bf16 1065369472, %v6709_v58 }
 0x2e9   : > { %v6711_v3 = vpop.eup %6710  ;;  %v1535_v14 = vcombine.low %v1495_v10, %v1532_v5  ;;  %v3707_v47 = vadd.f32 %v3645_v23, %v3643_v25  ;;  %v2896_v48 = vunpack.c.l.bf16 %v2863_v13  ;;  %v2898_v41 = vunpack.c.h.bf16 %v2863_v13  ;;  %v1394_v22 = vld [vmem:[#allocation2] sm:$0x3] }
 0x2ea   : > { %v6713_v49 = vpop.eup %6712  ;;  %v2282_v4 = vadd.f32 %v2281_v36, %v2280_v29  ;;  %v3611_v32 = vmul.bf16 %v3549_v42, %v8840_v1  ;;  %v2803_v8 = vmul.bf16 1065369472, %v6711_v3  ;;  %6722 = vrcp.bf16 %v2770_v17 }
 0x2eb   : > { %v6715_v60 = vpop.eup %6714  ;;  %v1542_v24 = vrot.slane %v1535_v14, %v8768_v34  ;;  %v2996_v63 = vadd.f32 %v2898_v41, %v2896_v48  ;;  %v3551_v19 = vmul.bf16 1065369472, %v6713_v49  ;;  %v8957_v6 = vpack.c.bf16 %v3222_v45, %v8895_v54 }
 0x2ec   : > { %v6717_v31 = vpop.eup %6716  ;;  %v2283_v10 = vrot.slane %v2282_v4, 1  ;;  %v3644_v58 = vunpack.c.l.bf16 %v3611_v32  ;;  %v3646_v5 = vunpack.c.h.bf16 %v3611_v32  ;;  %v2864_v25 = vmul.bf16 %v2803_v8, %v8868_v59 }
 0x2ed   : > { %v6719_v36 = vpop.eup %6718  ;;  %v1549_v1 = vrot.slane %v1542_v24, %v8768_v34  ;;  %v3612_v29 = vmul.bf16 %v3551_v19, %v8870_v38  ;;  %v2805_v23 = vmul.bf16 1065369472, %v6717_v31  ;;  %v3518_v13 = vadd.bf16 1065369472, %v6715_v60 }
 0x2ee   : > { %v6721_v42 = vpop.eup %6720  ;;  %v2284_v41 = vadd.f32 %v2283_v10, %v2282_v4  ;;  %v3744_v48 = vadd.f32 %v3646_v5, %v3644_v58  ;;  %v2899_v49 = vunpack.c.l.bf16 %v2864_v25  ;;  %v2901_v54 = vunpack.c.h.bf16 %v2864_v25  ;;  %v2146_v10 = vld [vmem:[#allocation2 + $0x2] sm:$0x3] }
 0x2ef   : > { %v1551_v45 = vadd.f32 %v1549_v1, %v1394_v22  ;;  %v3647_v17 = vunpack.c.l.bf16 %v3612_v29  ;;  %v3649_v3 = vunpack.c.h.bf16 %v3612_v29  ;;  %v2865_v14 = vmul.bf16 %v2805_v23, %v8873_v2 }
 0x2f0   : > { %v2287_v32 = vcombine.low %v2247_v33, %v2284_v41  ;;  %v2960_v18 = vadd.f32 %v2959_v55, %v2899_v49  ;;  %v3553_v59 = vmul.bf16 1065369472, %v6719_v36  ;;  %6724 = vrcp.bf16 %v3518_v13  ;;  %v10572_v33 = vld [vmem:[#allocation28_spill] sm:$0xff]  ;;  %v10575_v49 = vld [vmem:[#allocation29_spill] sm:$0xff] }
 0x2f1   : > { %1556 = vst.msk [vmem:[#allocation2] sm:$0x3] %vm8713_vm1, %v1551_v45  ;;  %v3708_v38 = vadd.f32 %v3707_v47, %v3647_v17  ;;  %v2900_v19 = vunpack.c.l.bf16 %v2865_v14  ;;  %v2902_v8 = vunpack.c.h.bf16 %v2865_v14  ;;  %v2771_v60 = vadd.bf16 1065369472, %v6721_v42  ;;  %v10576_v45 = vld [vmem:[#allocation30_spill] sm:$0xff]  ;;  %v10577_v14 = vld [vmem:[#allocation31_spill] sm:$0xff] }
 0x2f2   : > { %v2294_v4 = vrot.slane %v2287_v32, %v8768_v34  ;;  %v2961_v24 = vadd.f32 %v2960_v18, %v2901_v54  ;;  %v3613_v31 = vmul.bf16 %v3553_v59, %v8875_v20  ;;  %v5765_v22 = vmul.bf16 3216621497, %v8957_v6  ;;  %v10573_v20 = vld [vmem:[#allocation7_spill] sm:$0xff]  ;;  %v8991_v59 = vpop.f32.mrb[116].mxu1 }
 0x2f3   : > { %v8968_v2 = vadd.f32 %v3708_v38, %v3649_v3  ;;  %v2997_v55 = vadd.f32 %v2996_v63, %v2900_v19  ;;  %6726 = vrcp.bf16 %v2771_v60  ;;  %v2478_v58 = vadd.f32 %v10572_v33, %v8738_v56  ;;  %v10574_v63 = vld [vmem:[#allocation13_spill] sm:$0xff]  ;;  %v8993_v38 = vpop.f32.mrb[148].mxu0  ;;  %v9004_v60 = vpop.f32.mrb[117].mxu1 }
 0x2f4   : > { %v2301_v47 = vrot.slane %v2294_v4, %v8768_v34  ;;  %v3648_v5 = vunpack.c.l.bf16 %v3613_v31  ;;  %v3650_v25 = vunpack.c.h.bf16 %v3613_v31  ;;  %6728 = vpow.bf16 %v5765_v22  ;;  %v9006_v4 = vpop.f32.mrb[149].mxu0  ;;  %v9016_v33 = vpop.f32.mrb[118].mxu1 }
 0x2f5   : > { %v6723_v36 = vpop.eup %6722  ;;  %v8973_v1 = vadd.f32 %v2997_v55, %v2902_v8  ;;  %v3226_v18 = vadd.f32 %v10573_v20, %v8751_v21  ;;  %v2480_v29 = vadd.f32 %v8527_v15, %v8784_v35  ;;  %v3228_v23 = vadd.f32 %v10574_v63, %v8797_v7 }
 0x2f6   : > { %v2303_v13 = vadd.f32 %v2301_v47, %v2146_v10  ;;  %v3745_v42 = vadd.f32 %v3744_v48, %v3648_v5  ;;  %v2807_v41 = vmul.bf16 1065369472, %v6723_v36  ;;  %v2482_v54 = vadd.f32 %v10575_v49, %v8738_v56  ;;  %v10578_v10 = vld [vmem:[#allocation32_spill] sm:$0xff]  ;;  %v10579_v5 = vld [vmem:[#allocation33_spill] sm:$0xff]  ;;  %v9023_v36 = vpop.f32.mrb[119].mxu1 }
 0x2f7   : > { %v3230_v17 = vadd.f32 %v10576_v45, %v8751_v21  ;;  %v2484_v3 = vadd.f32 %v8541_v50, %v8784_v35  ;;  %v3232_v32 = vadd.f32 %v10577_v14, %v8797_v7  ;;  %v2488_v15 = vadd.f32 %v8556_v28, %v8738_v56 }
 0x2f8   : > { %2304 = vst.msk [vmem:[#allocation2 + $0x2] sm:$0x3] %vm8713_vm1, %v2303_v13  ;;  %v8997_v48 = vadd.f32 %v3745_v42, %v3650_v25  ;;  %v2866_v19 = vmul.bf16 %v2807_v41, %v8902_v52  ;;  %v9000_v8 = vpack.c.bf16 %v2482_v54, %v2478_v58  ;;  %v3236_v50 = vadd.f32 %v8558_v62, %v8751_v21  ;;  %v9018_v52 = vpop.f32.mrb[150].mxu0  ;;  %v10581_v13 = vld [vmem:[#allocation14_spill] sm:$0xff] }
 0x2f9   : > { %v9008_v28 = vpack.c.bf16 %v3230_v17, %v3226_v18  ;;  %v9010_v31 = vpack.c.bf16 %v2484_v3, %v2480_v29  ;;  %v9012_v22 = vpack.c.bf16 %v3232_v32, %v3228_v23  ;;  %v2490_v55 = vadd.f32 %v10578_v10, %v8784_v35  ;;  %v9025_v20 = vpop.f32.mrb[151].mxu0  ;;  %v10582_v54 = vld [vmem:[#allocation34_spill] sm:$0xff]  ;;  %v10583_v3 = vld [vmem:[#allocation35_spill] sm:$0xff] }
 0x2fa   : > { %v2903_v58 = vunpack.c.l.bf16 %v2866_v19  ;;  %v2905_v47 = vunpack.c.h.bf16 %v2866_v19  ;;  %v5718_v62 = vmul.bf16 3216621497, %v9000_v8  ;;  %v3238_v25 = vadd.f32 %v10579_v5, %v8797_v7  ;;  %10580 = vst [vmem:[#allocation28_spill] sm:$0xff] %v9025_v20  ;;  %v10584_v32 = vld [vmem:[#allocation46_spill] sm:$0xff] }
 0x2fb   : > { %v6725_v18 = vpop.eup %6724  ;;  %v5766_v29 = vmul.bf16 3216621497, %v9008_v28  ;;  %v5719_v63 = vmul.bf16 3216621497, %v9010_v31  ;;  %v5767_v23 = vmul.bf16 3216621497, %v9012_v22  ;;  %v2492_v42 = vadd.f32 %v10581_v13, %v8738_v56 }
 0x2fc   : > { %v2962_v41 = vadd.f32 %v2961_v24, %v2903_v58  ;;  %v3555_v49 = vmul.bf16 1065369472, %v6725_v18  ;;  %6730 = vpow.bf16 %v5718_v62  ;;  %v3240_v45 = vadd.f32 %v10582_v54, %v8751_v21 }
 0x2fd   : > { %6732 = vpow.bf16 %v5766_v29  ;;  %v9034_v17 = vpack.c.bf16 %v2492_v42, %v2488_v15  ;;  %v2494_v14 = vadd.f32 %v10583_v3, %v8784_v35  ;;  %v3242_v19 = vadd.f32 %v10584_v32, %v8797_v7  ;;  %v9048_v29 = vpop.f32.mrb[120].mxu1  ;;  %v9050_v42 = vpop.f32.mrb[152].mxu0 }
 0x2fe   : > { %v6727_v10 = vpop.eup %6726  ;;  %v9040_v5 = vadd.f32 %v2962_v41, %v2905_v47  ;;  %v3614_v13 = vmul.bf16 %v3555_v49, %v8909_v61  ;;  %6734 = vpow.bf16 %v5719_v63  ;;  %v9043_v24 = vpack.c.bf16 %v3240_v45, %v3236_v50  ;;  %10585 = vst [vmem:[#allocation7_spill] sm:$0xff] %v9048_v29  ;;  %10586 = vst [vmem:[#allocation13_spill] sm:$0xff] %v9050_v42  ;;  %v9053_v61 = vpop.f32.mrb[121].mxu1 }
 0x2ff   : > { %v6729_v58 = vpop.eup %6728  ;;  %v2809_v62 = vmul.bf16 1065369472, %v6727_v10  ;;  %6736 = vpow.bf16 %v5767_v23  ;;  %v5720_v15 = vmul.bf16 3216621497, %v9034_v17  ;;  %v9046_v18 = vpack.c.bf16 %v2494_v14, %v2490_v55  ;;  %10587 = vst [vmem:[#allocation29_spill] sm:$0xff] %v9053_v61  ;;  %v9055_v50 = vpop.f32.mrb[153].mxu0 }
 0x300   : > { %v3651_v54 = vunpack.c.l.bf16 %v3614_v13  ;;  %v3653_v3 = vunpack.c.h.bf16 %v3614_v13  ;;  %v3519_v47 = vadd.bf16 1065369472, %v6729_v58  ;;  %v5768_v41 = vmul.bf16 3216621497, %v9043_v24  ;;  %10588 = vst [vmem:[#allocation30_spill] sm:$0xff] %v9055_v50  ;;  %v9061_v49 = vpop.f32.mrb[122].mxu1 }
 0x301   : > { %v2867_v63 = vmul.bf16 %v2809_v62, %v8911_v0  ;;  %6738 = vpow.bf16 %v5720_v15  ;;  %v5721_v23 = vmul.bf16 3216621497, %v9046_v18  ;;  %v9059_v55 = vpack.c.bf16 %v3242_v19, %v3238_v25  ;;  %10589 = vst [vmem:[#allocation31_spill] sm:$0xff] %v9061_v49  ;;  %v9063_v45 = vpop.f32.mrb[154].mxu0  ;;  %v9070_v13 = vpop.f32.mrb[123].mxu1  ;;  %v10593_v15 = vld [vmem:[#allocation15_spill] sm:$0xff] }
 0x302   : > { %10590 = vst [vmem:[#allocation32_spill] sm:$0xff] %v9063_v45  ;;  %v3710_v14 = vadd.f32 %v8968_v2, %v3651_v54  ;;  %6740 = vrcp.bf16 %v3519_v47  ;;  %v2498_v32 = vadd.f32 %v8591_v53, %v8738_v56  ;;  %v3246_v10 = vadd.f32 %v8593_v44, %v8751_v21  ;;  %10591 = vst [vmem:[#allocation33_spill] sm:$0xff] %v9070_v13  ;;  %v9072_v0 = vpop.f32.mrb[155].mxu0  ;;  %v10594_v47 = vld [vmem:[#allocation47_spill] sm:$0xff] }
 0x303   : > { %10592 = vst [vmem:[#allocation14_spill] sm:$0xff] %v9072_v0  ;;  %v2904_v58 = vunpack.c.l.bf16 %v2867_v63  ;;  %v2906_v25 = vunpack.c.h.bf16 %v2867_v63  ;;  %6742 = vpow.bf16 %v5768_v41  ;;  %v5769_v19 = vmul.bf16 3216621497, %v9059_v55  ;;  %v10595_v63 = vld [vmem:[#allocation48_spill] sm:$0xff] }
 0x304   : > { %v9075_v62 = vadd.f32 %v3710_v14, %v3653_v3  ;;  %6744 = vpow.bf16 %v5721_v23  ;;  %v2500_v2 = vadd.f32 %v8595_v51, %v8784_v35  ;;  %v3248_v53 = vadd.f32 %v8597_v30, %v8797_v7  ;;  %v10596_v23 = vld [vmem:[#allocation49_spill] sm:$0xff]  ;;  %v10597_v51 = vld [vmem:[#allocation8_spill] sm:$0xff] }
 0x305   : > { %v2999_v44 = vadd.f32 %v8973_v1, %v2904_v58  ;;  %6746 = vpow.bf16 %v5769_v19  ;;  %v2502_v54 = vadd.f32 %v10593_v15, %v8738_v56  ;;  %v3250_v41 = vadd.f32 %v10594_v47, %v8751_v21  ;;  %v10598_v30 = vld [vmem:[#allocation36_spill] sm:$0xff]  ;;  %v10599_v47 = vld [vmem:[#allocation37_spill] sm:$0xff] }
 0x306   : > { %v2504_v3 = vadd.f32 %v10595_v63, %v8784_v35  ;;  %v3252_v14 = vadd.f32 %v10596_v23, %v8797_v7  ;;  %v2508_v16 = vadd.f32 %v10597_v51, %v8738_v56  ;;  %v3256_v34 = vadd.f32 %v10598_v30, %v8751_v21  ;;  %v10600_v51 = vld [vmem:[#allocation38_spill] sm:$0xff] }
 0x307   : > { %v6731_v1 = vpop.eup %6730  ;;  %v9094_v58 = vadd.f32 %v2999_v44, %v2906_v25  ;;  %v9096_v19 = vpack.c.bf16 %v2502_v54, %v2498_v32  ;;  %v9098_v15 = vpack.c.bf16 %v3250_v41, %v3246_v10  ;;  %v2510_v0 = vadd.f32 %v10599_v47, %v8784_v35  ;;  %v10601_v10 = vld [vmem:[#allocation50_spill] sm:$0xff] }
 0x308   : > { %v6733_v63 = vpop.eup %6732  ;;  %v2772_v13 = vadd.bf16 1065369472, %v6731_v1  ;;  %v9102_v45 = vpack.c.bf16 %v2504_v3, %v2500_v2  ;;  %v9104_v23 = vpack.c.bf16 %v3252_v14, %v3248_v53  ;;  %v3258_v49 = vadd.f32 %v10600_v51, %v8797_v7  ;;  %v10602_v1 = vld [vmem:[#allocation51_spill] sm:$0xff]  ;;  %v10603_v51 = vld [vmem:[#allocation52_spill] sm:$0xff] }
 0x309   : > { %v6735_v30 = vpop.eup %6734  ;;  %v3520_v50 = vadd.bf16 1065369472, %v6733_v63  ;;  %v5722_v25 = vmul.bf16 3216621497, %v9096_v19  ;;  %v5770_v32 = vmul.bf16 3216621497, %v9098_v15  ;;  %v2512_v44 = vadd.f32 %v10601_v10, %v8738_v56 }
 0x30a   : > { %v6737_v54 = vpop.eup %6736  ;;  %6748 = vrcp.bf16 %v2772_v13  ;;  %v2773_v41 = vadd.bf16 1065369472, %v6735_v30  ;;  %v5723_v2 = vmul.bf16 3216621497, %v9102_v45  ;;  %v5771_v53 = vmul.bf16 3216621497, %v9104_v23 }
 0x30b   : > { %6750 = vrcp.bf16 %v3520_v50  ;;  %v3521_v3 = vadd.bf16 1065369472, %v6737_v54  ;;  %v9114_v14 = vpack.c.bf16 %v2512_v44, %v2508_v16  ;;  %v3260_v47 = vadd.f32 %v10602_v1, %v8751_v21  ;;  %v10604_v10 = vld [vmem:[#allocation53_spill] sm:$0xff] }
 0x30c   : > { %v6739_v63 = vpop.eup %6738  ;;  %6752 = vrcp.bf16 %v2773_v41  ;;  %v2514_v61 = vadd.f32 %v10603_v51, %v8784_v35  ;;  %v3262_v13 = vadd.f32 %v10604_v10, %v8797_v7  ;;  %v2518_v30 = vadd.f32 %v8656_v26, %v8738_v56 }
 0x30d   : > { %v6741_v42 = vpop.eup %6740  ;;  %6754 = vrcp.bf16 %v3521_v3  ;;  %v2774_v50 = vadd.bf16 1065369472, %v6739_v63  ;;  %v5724_v16 = vmul.bf16 3216621497, %v9114_v14  ;;  %v9125_v44 = vpack.c.bf16 %v3260_v47, %v3256_v34 }
 0x30e   : > { %v6743_v54 = vpop.eup %6742  ;;  %v3557_v1 = vmul.bf16 1065369472, %v6741_v42  ;;  %6756 = vpow.bf16 %v5722_v25  ;;  %v9127_v41 = vpack.c.bf16 %v2514_v61, %v2510_v0  ;;  %v9129_v29 = vpack.c.bf16 %v3262_v13, %v3258_v49  ;;  %v9136_v25 = vpop.f32.mrb[124].mxu1 }
 0x30f   : > { %v6745_v51 = vpop.eup %6744  ;;  %6758 = vrcp.bf16 %v2774_v50  ;;  %v3522_v10 = vadd.bf16 1065369472, %v6743_v54  ;;  %v5772_v20 = vmul.bf16 3216621497, %v9125_v44  ;;  %v3266_v26 = vadd.f32 %v8658_v39, %v8751_v21  ;;  %v9138_v61 = vpop.f32.mrb[156].mxu0 }
 0x310   : > { %v6747_v3 = vpop.eup %6746  ;;  %v3615_v63 = vmul.bf16 %v3557_v1, %v8957_v6  ;;  %v2775_v34 = vadd.bf16 1065369472, %v6745_v51  ;;  %6760 = vpow.bf16 %v5770_v32  ;;  %v5725_v42 = vmul.bf16 3216621497, %v9127_v41  ;;  %v9143_v13 = vpop.f32.mrb[125].mxu1 }
 0x311   : > { %6762 = vrcp.bf16 %v3522_v10  ;;  %v3523_v49 = vadd.bf16 1065369472, %v6747_v3  ;;  %v5773_v0 = vmul.bf16 3216621497, %v9129_v29  ;;  %v2520_v47 = vadd.f32 %v8661_v9, %v8784_v35  ;;  %v9145_v39 = vpop.f32.mrb[157].mxu0  ;;  %v9149_v54 = vpop.f32.mrb[126].mxu1 }
 0x312   : > { %v3652_v6 = vunpack.c.l.bf16 %v3615_v63  ;;  %v3654_v50 = vunpack.c.h.bf16 %v3615_v63  ;;  %6764 = vrcp.bf16 %v2775_v34  ;;  %v3268_v32 = vadd.f32 %v8663_v12, %v8797_v7  ;;  %10605 = vst [vmem:[#allocation34_spill] sm:$0xff] %v9149_v54  ;;  %v9151_v1 = vpop.f32.mrb[158].mxu0  ;;  %v9159_v3 = vpop.f32.mrb[127].mxu1 }
 0x313   : > { %10606 = vst [vmem:[#allocation35_spill] sm:$0xff] %v9151_v1  ;;  %6766 = vrcp.bf16 %v3523_v49  ;;  %v2522_v51 = vadd.f32 %v8666_v27, %v8738_v56  ;;  %v3270_v9 = vadd.f32 %v8668_v11, %v8751_v21  ;;  %v2524_v10 = vadd.f32 %v8670_v43, %v8784_v35  ;;  %10607 = vst [vmem:[#allocation46_spill] sm:$0xff] %v9159_v3  ;;  %v9161_v63 = vpop.f32.mrb[159].mxu0 }
 0x314   : > { %10608 = vst [vmem:[#allocation15_spill] sm:$0xff] %v9161_v63  ;;  %v3747_v12 = vadd.f32 %v8997_v48, %v3652_v6  ;;  %6768 = vpow.bf16 %v5723_v2  ;;  %v3272_v34 = vadd.f32 %v8672_v40, %v8797_v7  ;;  %v9168_v49 = vadd.f32 %v8706_v46, %v8738_v56 }
 0x315   : > { %v6749_v27 = vpop.eup %6748  ;;  %6770 = vpow.bf16 %v5771_v53  ;;  %v9170_v11 = vpack.c.bf16 %v2522_v51, %v2518_v30  ;;  %v9172_v1 = vpack.c.bf16 %v3270_v9, %v3266_v26  ;;  %v9174_v43 = vpack.c.bf16 %v2524_v10, %v2520_v47  ;;  %v9182_v51 = vpop.f32.mrb[128].mxu1 }
 0x316   : > { %v6751_v3 = vpop.eup %6750  ;;  %v3748_v63 = vadd.f32 %v3747_v12, %v3654_v50  ;;  %v2811_v54 = vmul.bf16 1065369472, %v6749_v27  ;;  %6772 = vpow.bf16 %v5724_v16  ;;  %v9176_v48 = vpack.c.bf16 %v3272_v34, %v3268_v32  ;;  %10609 = vst [vmem:[#allocation47_spill] sm:$0xff] %v9182_v51  ;;  %v9186_v9 = vpop.f32.mrb[129].mxu1 }
 0x317   : > { %v6753_v2 = vpop.eup %6752  ;;  %v3559_v40 = vmul.bf16 1065369472, %v6751_v3  ;;  %6774 = vpow.bf16 %v5772_v20  ;;  %10610 = vst [vmem:[#allocation48_spill] sm:$0xff] %v9186_v9 }
 0x318   : > { %v6755_v53 = vpop.eup %6754  ;;  %v2868_v30 = vmul.bf16 %v2811_v54, %v9000_v8  ;;  %v2813_v26 = vmul.bf16 1065369472, %v6753_v2  ;;  %6776 = vpow.bf16 %v5725_v42  ;;  %v9189_v42 = vpop.f32.mrb[130].mxu1 }
 0x319   : > { %v6757_v50 = vpop.eup %6756  ;;  %v3616_v16 = vmul.bf16 %v3559_v40, %v9008_v28  ;;  %v3561_v32 = vmul.bf16 1065369472, %v6755_v53  ;;  %6778 = vpow.bf16 %v5773_v0  ;;  %10611 = vst [vmem:[#allocation49_spill] sm:$0xff] %v9189_v42  ;;  %v6284_v0 = vld [vmem:[%s10354_s5 + $0x40] sm:$0xff]   ;;  %v9195_v40 = vpop.f32.mrb[131].mxu1 }
 0x31a   : > { %v6759_v10 = vpop.eup %6758  ;;  %v2907_v3 = vunpack.c.l.bf16 %v2868_v30  ;;  %v2909_v12 = vunpack.c.h.bf16 %v2868_v30  ;;  %v2869_v8 = vmul.bf16 %v2813_v26, %v9010_v31  ;;  %v2776_v54 = vadd.bf16 1065369472, %v6757_v50  ;;  %10612 = vst [vmem:[#allocation8_spill] sm:$0xff] %v9195_v40  ;;  %5942 = vmatprep.subr.bf16.mxu0 %v6284_v0  ;;  %v9206_v51 = vpop.f32.mrb[132].mxu1 }
 0x31b   : > { %v6761_v34 = vpop.eup %6760  ;;  %v3655_v27 = vunpack.c.l.bf16 %v3616_v16  ;;  %v3657_v2 = vunpack.c.h.bf16 %v3616_v16  ;;  %v3617_v47 = vmul.bf16 %v3561_v32, %v9012_v22  ;;  %v2815_v28 = vmul.bf16 1065369472, %v6759_v10  ;;  %v6285_v32 = vld [vmem:[%s10354_s5] sm:$0xff]  }
 0x31c   : > { %v6763_v53 = vpop.eup %6762  ;;  %v2964_v30 = vadd.f32 %v9040_v5, %v2907_v3  ;;  %v2908_v20 = vunpack.c.l.bf16 %v2869_v8  ;;  %v2910_v31 = vunpack.c.h.bf16 %v2869_v8  ;;  %6780 = vrcp.bf16 %v2776_v54  ;;  %5943 = vmatpush3.bf16.msra.mxu0 %v6285_v32 }
 0x31d   : > { %v6765_v26 = vpop.eup %6764  ;;  %v3712_v50 = vadd.f32 %v9075_v62, %v3655_v27  ;;  %v3656_v6 = vunpack.c.l.bf16 %v3617_v47  ;;  %v3658_v16 = vunpack.c.h.bf16 %v3617_v47  ;;  %v2870_v22 = vmul.bf16 %v2815_v28, %v9034_v17 }
 0x31e   : > { %v6767_v10 = vpop.eup %6766  ;;  %v2965_v46 = vadd.f32 %v2964_v30, %v2909_v12  ;;  %v3001_v40 = vadd.f32 %v9094_v58, %v2908_v20  ;;  %v3563_v5 = vmul.bf16 1065369472, %v6763_v53  ;;  %v2817_v3 = vmul.bf16 1065369472, %v6765_v26  ;;  %v9208_v26 = vpop.f32.mrb[133].mxu1 }
 0x31f   : > { %v6769_v8 = vpop.eup %6768  ;;  %v3713_v54 = vadd.f32 %v3712_v50, %v3657_v2  ;;  %v3749_v9 = vadd.f32 %v3748_v63, %v3656_v6  ;;  %v2911_v42 = vunpack.c.l.bf16 %v2870_v22  ;;  %v2913_v62 = vunpack.c.h.bf16 %v2870_v22  ;;  %10613 = vst [vmem:[#allocation36_spill] sm:$0xff] %v9208_v26 }
 0x320   : > { %v6771_v47 = vpop.eup %6770  ;;  %v3002_v27 = vadd.f32 %v3001_v40, %v2910_v31  ;;  %v3618_v17 = vmul.bf16 %v3563_v5, %v9043_v24  ;;  %v2871_v28 = vmul.bf16 %v2817_v3, %v9046_v18  ;;  %v3565_v0 = vmul.bf16 1065369472, %v6767_v10  ;;  %v9210_v40 = vpop.f32.mrb[134].mxu1 }
 0x321   : > { %v6773_v12 = vpop.eup %6772  ;;  %v3750_v30 = vadd.f32 %v3749_v9, %v3658_v16  ;;  %v2966_v58 = vadd.f32 %v2965_v46, %v2911_v42  ;;  %v3524_v20 = vadd.bf16 1065369472, %v6761_v34  ;;  %v2777_v53 = vadd.bf16 1065369472, %v6769_v8  ;;  %10614 = vst [vmem:[#allocation37_spill] sm:$0xff] %v9210_v40  ;;  %v9213_v10 = vpop.f32.mrb[135].mxu1 }
 0x322   : > { %v6775_v63 = vpop.eup %6774  ;;  %v3659_v6 = vunpack.c.l.bf16 %v3618_v17  ;;  %v3661_v2 = vunpack.c.h.bf16 %v3618_v17  ;;  %v2912_v50 = vunpack.c.l.bf16 %v2871_v28  ;;  %v2914_v22 = vunpack.c.h.bf16 %v2871_v28  ;;  %10615 = vst [vmem:[#allocation38_spill] sm:$0xff] %v9213_v10 }
 0x323   : > { %v6777_v24 = vpop.eup %6776  ;;  %v2967_v31 = vadd.f32 %v2966_v58, %v2913_v62  ;;  %v3619_v18 = vmul.bf16 %v3565_v0, %v9059_v55  ;;  %6782 = vrcp.bf16 %v3524_v20  ;;  %v3525_v32 = vadd.bf16 1065369472, %v6771_v47 }
 0x324   : > { %v6779_v46 = vpop.eup %6778  ;;  %v3714_v9 = vadd.f32 %v3713_v54, %v3659_v6  ;;  %v3003_v42 = vadd.f32 %v3002_v27, %v2912_v50  ;;  %6784 = vrcp.bf16 %v2777_v53  ;;  %v2778_v34 = vadd.bf16 1065369472, %v6773_v12  ;;  %v10616_v12 = vld [vmem:[#allocation55_spill] sm:$0xff]  ;;  %v10617_v53 = vld [vmem:[#allocation56_spill] sm:$0xff]  ;;  %v10620_v50 = vld [vmem:[#allocation58_spill] sm:$0xff] }
 0x325   : > { %v3660_v16 = vunpack.c.l.bf16 %v3619_v18  ;;  %v3662_v5 = vunpack.c.h.bf16 %v3619_v18  ;;  %6786 = vrcp.bf16 %v3525_v32  ;;  %v3526_v3 = vadd.bf16 1065369472, %v6775_v63 }
 0x326   : > { %v9215_v8 = vadd.f32 %v3714_v9, %v3661_v2  ;;  %v9217_v17 = vadd.f32 %v3003_v42, %v2914_v22  ;;  %6788 = vrcp.bf16 %v2778_v34  ;;  %v2779_v62 = vadd.bf16 1065369472, %v6777_v24  ;;  %v10621_v22 = vld [vmem:[#allocation59_spill] sm:$0xff]  ;;  %v10623_v9 = vld [vmem:[#allocation61_spill] sm:$0xff] }
 0x327   : > { %v6781_v55 = vpop.eup %6780  ;;  %v3751_v28 = vadd.f32 %v3750_v30, %v3660_v16  ;;  %6790 = vrcp.bf16 %v3526_v3  ;;  %v3527_v47 = vadd.bf16 1065369472, %v6779_v46  ;;  %v3276_v54 = vadd.f32 %v8708_v57, %v8751_v21  ;;  %v10618_v30 = vld [vmem:[#allocation57_spill] sm:$0xff]  ;;  %v9251_v3 = vpop.f32.mrb[136].mxu1 }
 0x328   : > { %v2819_v27 = vmul.bf16 1065369472, %v6781_v55  ;;  %6792 = vrcp.bf16 %v2779_v62  ;;  %v2530_v0 = vadd.f32 %v8717_v37, %v8784_v35  ;;  %v3278_v58 = vadd.f32 %v10616_v12, %v8797_v7  ;;  %10625 = vst [vmem:[#allocation50_spill] sm:$0xff] %v9251_v3 }
 0x329   : > { %v9225_v20 = vadd.f32 %v3751_v28, %v3662_v5  ;;  %6794 = vrcp.bf16 %v3527_v47  ;;  %v2532_v63 = vadd.f32 %v10617_v53, %v8738_v56  ;;  %v3280_v6 = vadd.f32 %v10618_v30, %v8751_v21  ;;  %v9259_v47 = vpop.f32.mrb[137].mxu1 }
 0x32a   : > { %v2872_v2 = vmul.bf16 %v2819_v27, %v9096_v19  ;;  %v10619_v57 = vmul.bf16 3216621497, %v9170_v11  ;;  %v2534_v37 = vadd.f32 %v10620_v50, %v8784_v35  ;;  %v3282_v24 = vadd.f32 %v10621_v22, %v8797_v7  ;;  %10627 = vst [vmem:[#allocation51_spill] sm:$0xff] %v9259_v47  ;;  %v10631_v50 = vld [vmem:[#allocation65_spill] sm:$0xff] }
 0x32b   : > { %v10622_v18 = vmul.bf16 3216621497, %v9172_v1  ;;  %v9241_v32 = vpack.c.bf16 %v2532_v63, %v9168_v49  ;;  %v9243_v46 = vpack.c.bf16 %v3280_v6, %v3276_v54  ;;  %v2538_v19 = vadd.f32 %v10623_v9, %v8738_v56  ;;  %v10629_v63 = vld [vmem:[#allocation64_spill] sm:$0xff]  ;;  %v9270_v6 = vpop.f32.mrb[138].mxu1  ;;  %v10633_v9 = vld [vmem:[#allocation66_spill] sm:$0xff] }
 0x32c   : > { %6796 = vpow.bf16 %v10619_v57  ;;  %v2915_v42 = vunpack.c.l.bf16 %v2872_v2  ;;  %v2917_v34 = vunpack.c.h.bf16 %v2872_v2  ;;  %v10624_v16 = vmul.bf16 3216621497, %v9174_v43  ;;  %10630 = vst [vmem:[#allocation52_spill] sm:$0xff] %v9270_v6 }
 0x32d   : > { %6798 = vpow.bf16 %v10622_v18  ;;  %v9249_v5 = vpack.c.bf16 %v2534_v37, %v2530_v0  ;;  %v10626_v62 = vmul.bf16 3216621497, %v9176_v48  ;;  %v5728_v49 = vmul.bf16 3216621497, %v9241_v32  ;;  %v10628_v0 = vld [vmem:[#allocation62_spill] sm:$0xff]  ;;  %v9277_v37 = vpop.f32.mrb[139].mxu1 }
 0x32e   : > { %6800 = vpow.bf16 %v10624_v16  ;;  %v5776_v55 = vmul.bf16 3216621497, %v9243_v46  ;;  %v9257_v28 = vpack.c.bf16 %v3282_v24, %v3278_v58  ;;  %v6783_v54 = vpop.eup %6782  ;;  %v2968_v27 = vadd.f32 %v2967_v31, %v2915_v42  ;;  %10632 = vst [vmem:[#allocation53_spill] sm:$0xff] %v9277_v37 }
 0x32f   : > { %6802 = vpow.bf16 %v10626_v62  ;;  %v5729_v12 = vmul.bf16 3216621497, %v9249_v5  ;;  %v9264_v53 = vadd.f32 %v10628_v0, %v8751_v21  ;;  %v9268_v30 = vadd.f32 %v10629_v63, %v8784_v35  ;;  %v6785_v2 = vpop.eup %6784 }
 0x330   : > { %v3567_v57 = vmul.bf16 1065369472, %v6783_v54  ;;  %6804 = vpow.bf16 %v5728_v49  ;;  %v5777_v58 = vmul.bf16 3216621497, %v9257_v28  ;;  %v9275_v31 = vadd.f32 %v10631_v50, %v8797_v7  ;;  %v6787_v22 = vpop.eup %6786  ;;  %v10634_v49 = vld [vmem:[#allocation9_spill] sm:$0xff] }
 0x331   : > { %v2969_v24 = vadd.f32 %v2968_v27, %v2917_v34  ;;  %v2821_v18 = vmul.bf16 1065369472, %v6785_v2  ;;  %6806 = vpow.bf16 %v5776_v55  ;;  %v2542_v42 = vadd.f32 %v10633_v9, %v8738_v56  ;;  %v6789_v16 = vpop.eup %6788 }
 0x332   : > { %v3620_v62 = vmul.bf16 %v3567_v57, %v9098_v15  ;;  %v3569_v54 = vmul.bf16 1065369472, %v6787_v22  ;;  %6808 = vpow.bf16 %v5729_v12  ;;  %v9284_v0 = vadd.f32 %v10634_v49, %v8751_v21  ;;  %v6791_v63 = vpop.eup %6790 }
 0x333   : > { %v2873_v50 = vmul.bf16 %v2821_v18, %v9102_v45  ;;  %v2823_v37 = vmul.bf16 1065369472, %v6789_v16  ;;  %6810 = vpow.bf16 %v5777_v58  ;;  %v9287_v34 = vpack.c.bf16 %v2542_v42, %v2538_v19  ;;  %v6793_v55 = vpop.eup %6792  ;;  %v6286_v45 = vld [vmem:[%s10354_s5 + $0x48] sm:$0xff]   ;;  %v9294_v18 = vpop.f32.mrb[140].mxu1 }
 0x334   : > { %v3663_v27 = vunpack.c.l.bf16 %v3620_v62  ;;  %v3665_v2 = vunpack.c.h.bf16 %v3620_v62  ;;  %v3621_v9 = vmul.bf16 %v3569_v54, %v9104_v23  ;;  %v3571_v6 = vmul.bf16 1065369472, %v6791_v63  ;;  %v6795_v15 = vpop.eup %6794  ;;  %10635 = vst [vmem:[#allocation55_spill] sm:$0xff] %v9294_v18  ;;  %v9298_v62 = vpop.f32.mrb[141].mxu1  ;;  %5944 = vmatprep.subr.bf16.mxu0 %v6286_v45 }
 0x335   : > { %v2916_v57 = vunpack.c.l.bf16 %v2873_v50  ;;  %v2918_v12 = vunpack.c.h.bf16 %v2873_v50  ;;  %v2874_v22 = vmul.bf16 %v2823_v37, %v9114_v14  ;;  %v2825_v49 = vmul.bf16 1065369472, %v6793_v55  ;;  %10636 = vst [vmem:[#allocation56_spill] sm:$0xff] %v9298_v62  ;;  %v9302_v55 = vpop.f32.mrb[142].mxu1 }
 0x336   : > { %v3716_v58 = vadd.f32 %v9215_v8, %v3663_v27  ;;  %v3664_v42 = vunpack.c.l.bf16 %v3621_v9  ;;  %v3666_v16 = vunpack.c.h.bf16 %v3621_v9  ;;  %v3622_v23 = vmul.bf16 %v3571_v6, %v9125_v44  ;;  %10637 = vst [vmem:[#allocation57_spill] sm:$0xff] %v9302_v55  ;;  %v9305_v3 = vpop.f32.mrb[143].mxu1 }
 0x337   : > { %v6797_v19 = vpop.eup %6796  ;;  %v3005_v63 = vadd.f32 %v9217_v17, %v2916_v57  ;;  %v2919_v14 = vunpack.c.l.bf16 %v2874_v22  ;;  %v2921_v37 = vunpack.c.h.bf16 %v2874_v22  ;;  %v2875_v50 = vmul.bf16 %v2825_v49, %v9127_v41  ;;  %10638 = vst [vmem:[#allocation58_spill] sm:$0xff] %v9305_v3 }
 0x338   : > { %v6799_v54 = vpop.eup %6798  ;;  %v3717_v47 = vadd.f32 %v3716_v58, %v3665_v2  ;;  %v3753_v8 = vadd.f32 %v9225_v20, %v3664_v42  ;;  %v3667_v27 = vunpack.c.l.bf16 %v3622_v23  ;;  %v3669_v9 = vunpack.c.h.bf16 %v3622_v23 }
 0x339   : > { %v6801_v18 = vpop.eup %6800  ;;  %v3006_v6 = vadd.f32 %v3005_v63, %v2918_v12  ;;  %v2970_v62 = vadd.f32 %v2969_v24, %v2919_v14  ;;  %v2920_v10 = vunpack.c.l.bf16 %v2875_v50  ;;  %v2922_v17 = vunpack.c.h.bf16 %v2875_v50 }
 0x33a   : > { %v6803_v44 = vpop.eup %6802  ;;  %v3754_v57 = vadd.f32 %v3753_v8, %v3666_v16  ;;  %v3718_v22 = vadd.f32 %v3717_v47, %v3667_v27  ;;  %v3573_v40 = vmul.bf16 1065369472, %v6795_v15  ;;  %v2780_v41 = vadd.bf16 1065369472, %v6797_v19  ;;  %v9314_v19 = vpop.f32.mrb[144].mxu1  ;;  %v10643_v27 = vld [vmem:[#allocation22_spill] sm:$0xff] }
 0x33b   : > { %v6805_v49 = vpop.eup %6804  ;;  %v9307_v45 = vadd.f32 %v2970_v62, %v2921_v37  ;;  %v3007_v55 = vadd.f32 %v3006_v6, %v2920_v10  ;;  %v3528_v2 = vadd.bf16 1065369472, %v6799_v54  ;;  %v2781_v58 = vadd.bf16 1065369472, %v6801_v18  ;;  %10639 = vst [vmem:[#allocation59_spill] sm:$0xff] %v9314_v19  ;;  %v9316_v54 = vpop.f32.mrb[145].mxu1 }
 0x33c   : > { %v6807_v20 = vpop.eup %6806  ;;  %v9309_v42 = vadd.f32 %v3718_v22, %v3669_v9  ;;  %v3623_v23 = vmul.bf16 %v3573_v40, %v9129_v29  ;;  %6812 = vrcp.bf16 %v2780_v41  ;;  %v3529_v12 = vadd.bf16 1065369472, %v6803_v44  ;;  %10640 = vst [vmem:[#allocation61_spill] sm:$0xff] %v9316_v54  ;;  %v9323_v37 = vpop.f32.mrb[146].mxu1 }
 0x33d   : > { %v6809_v24 = vpop.eup %6808  ;;  %v9312_v63 = vadd.f32 %v3007_v55, %v2922_v17  ;;  %6814 = vrcp.bf16 %v3528_v2  ;;  %v2782_v47 = vadd.bf16 1065369472, %v6805_v49  ;;  %v3530_v15 = vadd.bf16 1065369472, %v6807_v20  ;;  %10641 = vst [vmem:[#allocation62_spill] sm:$0xff] %v9323_v37  ;;  %v10642_v55 = vld [vmem:[#allocation10_spill] sm:$0xff] }
 0x33e   : > { %v6811_v16 = vpop.eup %6810  ;;  %v3668_v62 = vunpack.c.l.bf16 %v3623_v23  ;;  %v3670_v10 = vunpack.c.h.bf16 %v3623_v23  ;;  %6816 = vrcp.bf16 %v2781_v58  ;;  %v2783_v18 = vadd.bf16 1065369472, %v6809_v24  ;;  %v9329_v44 = vpop.f32.mrb[147].mxu1  ;;  %v10645_v17 = vld [vmem:[#allocation21_spill] sm:$0xff]  ;;  %v10647_v2 = vld [vmem:[#allocation11_spill] sm:$0xff] }
 0x33f   : > { %6818 = vrcp.bf16 %v3529_v12  ;;  %v3531_v14 = vadd.bf16 1065369472, %v6811_v16  ;;  %v5730_v29 = vmul.bf16 3216621497, %v9287_v34  ;;  %v9321_v40 = vpack.c.bf16 %v9284_v0, %v9264_v53  ;;  %10644 = vst [vmem:[#allocation64_spill] sm:$0xff] %v9329_v44  ;;  %v10646_v53 = vld [vmem:[#allocation23_spill] sm:$0xff] }
 0x340   : > { %v3755_v50 = vadd.f32 %v3754_v57, %v3668_v62  ;;  %6820 = vrcp.bf16 %v2782_v47  ;;  %v2544_v8 = vadd.f32 %v10642_v55, %v8784_v35  ;;  %v3292_v9 = vadd.f32 %v10643_v27, %v8797_v7  ;;  %v10648_v20 = vld [vmem:[#allocation39_spill] sm:$0xff]  ;;  %v10649_v12 = vld [vmem:[#allocation40_spill] sm:$0xff]  ;;  %v9366_v55 = vpop.f32.mrb[148].mxu1 }
 0x341   : > { %6822 = vrcp.bf16 %v3530_v15  ;;  %v5778_v6 = vmul.bf16 3216621497, %v9321_v40  ;;  %v2548_v22 = vadd.f32 %v10645_v17, %v8738_v56  ;;  %v3296_v0 = vadd.f32 %v10646_v53, %v8751_v21  ;;  %v6293_v62 = vld [vmem:[%s10354_s5 + $0x1c0] sm:$0xff]   ;;  %10653 = vst [vmem:[#allocation65_spill] sm:$0xff] %v9366_v55  ;;  %v9381_v53 = vpop.f32.mrb[149].mxu1  ;;  %v6298_v55 = vld [vmem:[%s10354_s5 + $0x1d0] sm:$0xff]  }
 0x342   : > { %v9336_v41 = vadd.f32 %v3755_v50, %v3670_v10  ;;  %6824 = vrcp.bf16 %v2783_v18  ;;  %v9339_v57 = vpack.c.bf16 %v2544_v8, %v9268_v30  ;;  %v9342_v49 = vpack.c.bf16 %v3292_v9, %v9275_v31  ;;  %v10650_v30 = vld [vmem:[#allocation41_spill] sm:$0xff]  ;;  %v10651_v18 = vld [vmem:[#allocation42_spill] sm:$0xff]  ;;  %v10654_v9 = vld [vmem:[#allocation44_spill] sm:$0xff]  ;;  %10656 = vst [vmem:[#allocation66_spill] sm:$0xff] %v9381_v53  ;;  %6008 = vmatprep.subr.bf16.mxu1 %v6293_v62 }
 0x343   : > { %6826 = vrcp.bf16 %v3531_v14  ;;  %v2550_v58 = vadd.f32 %v10647_v2, %v8784_v35  ;;  %v3298_v23 = vadd.f32 %v10648_v20, %v8797_v7  ;;  %v2552_v24 = vadd.f32 %v10649_v12, %v8738_v56  ;;  %v6287_v31 = vld [vmem:[%s10354_s5 + $0x8] sm:$0xff]   ;;  %v6295_v8 = vld [vmem:[%s10354_s5 + $0x180] sm:$0xff]  }
 0x344   : > { %6828 = vpow.bf16 %v5730_v29  ;;  %v5731_v47 = vmul.bf16 3216621497, %v9339_v57  ;;  %v5779_v15 = vmul.bf16 3216621497, %v9342_v49  ;;  %v3300_v16 = vadd.f32 %v10650_v30, %v8751_v21  ;;  %v10652_v29 = vld [vmem:[#allocation43_spill] sm:$0xff]  ;;  %v10655_v17 = vld [vmem:[#allocation45_spill] sm:$0xff]  ;;  %5945 = vmatpush3.bf16.msra.mxu0 %v6287_v31  ;;  %6009 = vmatpush3.bf16.msra.mxu1 %v6295_v8 }
 0x345   : > { %6830 = vpow.bf16 %v5778_v6  ;;  %v9360_v10 = vpack.c.bf16 %v2552_v24, %v2548_v22  ;;  %v2554_v14 = vadd.f32 %v10651_v18, %v8784_v35  ;;  %v3302_v50 = vadd.f32 %v10652_v29, %v8797_v7  ;;  %v6288_v24 = vld [vmem:[%s10354_s5 + $0x50] sm:$0xff]   ;;  %v10658_v62 = vld [vmem:[#allocation12_spill] sm:$0xff] }
 0x346   : > { %6832 = vpow.bf16 %v5731_v47  ;;  %v9371_v27 = vpack.c.bf16 %v3300_v16, %v3296_v0  ;;  %v9375_v6 = vadd.f32 %v10654_v9, %v8738_v56  ;;  %v9379_v22 = vadd.f32 %v10655_v17, %v8751_v21  ;;  %v9391_v47 = vpop.f32.mrb[150].mxu1  ;;  %5946 = vmatprep.subr.bf16.mxu0 %v6288_v24 }
 0x347   : > { %v6813_v2 = vpop.eup %6812  ;;  %6834 = vpow.bf16 %v5779_v15  ;;  %v5732_v20 = vmul.bf16 3216621497, %v9360_v10  ;;  %v9384_v12 = vpack.c.bf16 %v2554_v14, %v2550_v58  ;;  %v9386_v0 = vpack.c.bf16 %v3302_v50, %v3298_v23  ;;  %10657 = vst [vmem:[#allocation9_spill] sm:$0xff] %v9391_v47  ;;  %v10659_v58 = vld [vmem:[#allocation19_spill] sm:$0xff]  ;;  %v9405_v14 = vpop.f32.mrb[151].mxu1 }
 0x348   : > { %v6815_v30 = vpop.eup %6814  ;;  %v2827_v16 = vmul.bf16 1065369472, %v6813_v2  ;;  %v5780_v31 = vmul.bf16 3216621497, %v9371_v27  ;;  %v9396_v15 = vadd.f32 %v10658_v62, %v8784_v35  ;;  %v9400_v18 = vadd.f32 %v10659_v58, %v8797_v7  ;;  %v6289_v23 = vld [vmem:[%s10354_s5 + $0x10] sm:$0xff]   ;;  %10660 = vst [vmem:[#allocation10_spill] sm:$0xff] %v9405_v14 }
 0x349   : > { %v6817_v29 = vpop.eup %6816  ;;  %v3575_v50 = vmul.bf16 1065369472, %v6815_v30  ;;  %6836 = vpow.bf16 %v5732_v20  ;;  %v5733_v8 = vmul.bf16 3216621497, %v9384_v12  ;;  %v10661_v58 = vld [vmem:[#allocation6_spill] sm:$0xff]  ;;  %5947 = vmatpush3.bf16.msra.mxu0 %v6289_v23 }
 0x34a   : > { %v6819_v17 = vpop.eup %6818  ;;  %v2876_v2 = vmul.bf16 %v2827_v16, %v9170_v11  ;;  %v2829_v62 = vmul.bf16 1065369472, %v6817_v29  ;;  %6838 = vpow.bf16 %v5780_v31  ;;  %v9412_v47 = vadd.f32 %v10661_v58, %v8738_v56  ;;  %v6296_v30 = vld [vmem:[%s10354_s5 + $0x1c8] sm:$0xff]   ;;  %v10662_v11 = vld [vmem:[#allocation20_spill] sm:$0xff] }
 0x34b   : > { %v6297_v20 = vld [vmem:[%s10354_s5 + $0x188] sm:$0xff]   ;;  %v6821_v9 = vpop.eup %6820  ;;  %v3624_v24 = vmul.bf16 %v3575_v50, %v9172_v1  ;;  %v3577_v14 = vmul.bf16 1065369472, %v6819_v17  ;;  %6840 = vpow.bf16 %v5733_v8  ;;  %v9423_v16 = vadd.f32 %v10662_v11, %v8751_v21  ;;  %6010 = vmatprep.subr.bf16.mxu1 %v6296_v30  ;;  %v9430_v17 = vpop.f32.mrb[152].mxu1 }
 0x34c   : > { %v6823_v31 = vpop.eup %6822  ;;  %v2923_v29 = vunpack.c.l.bf16 %v2876_v2  ;;  %v2925_v23 = vunpack.c.h.bf16 %v2876_v2  ;;  %v2877_v58 = vmul.bf16 %v2829_v62, %v9174_v43  ;;  %v2831_v53 = vmul.bf16 1065369472, %v6821_v9  ;;  %6011 = vmatpush3.bf16.msra.mxu1 %v6297_v20  ;;  %10663 = vst [vmem:[#allocation22_spill] sm:$0xff] %v9430_v17  ;;  %v6299_v2 = vld [vmem:[%s10354_s5 + $0x190] sm:$0xff]   ;;  %v9437_v54 = vpop.f32.mrb[153].mxu1  ;;  %v6290_v17 = vld [vmem:[%s10354_s5 + $0x58] sm:$0xff]  }
 0x34d   : > { %v6825_v44 = vpop.eup %6824  ;;  %v3671_v37 = vunpack.c.l.bf16 %v3624_v24  ;;  %v3673_v1 = vunpack.c.h.bf16 %v3624_v24  ;;  %v3625_v50 = vmul.bf16 %v3577_v14, %v9176_v48  ;;  %v3579_v8 = vmul.bf16 1065369472, %v6823_v31  ;;  %10664 = vst [vmem:[#allocation21_spill] sm:$0xff] %v9437_v54  ;;  %6012 = vmatprep.subr.bf16.mxu1 %v6298_v55  ;;  %v9444_v19 = vpop.f32.mrb[154].mxu1  ;;  %5948 = vmatprep.subr.bf16.mxu0 %v6290_v17 }
 0x34e   : > { %v6827_v43 = vpop.eup %6826  ;;  %v2972_v9 = vadd.f32 %v9307_v45, %v2923_v29  ;;  %v2924_v62 = vunpack.c.l.bf16 %v2877_v58  ;;  %v2926_v30 = vunpack.c.h.bf16 %v2877_v58  ;;  %v2878_v11 = vmul.bf16 %v2831_v53, %v9241_v32  ;;  %10665 = vst [vmem:[#allocation23_spill] sm:$0xff] %v9444_v19 }
 0x34f   : > { %v6829_v24 = vpop.eup %6828  ;;  %v3720_v48 = vadd.f32 %v9309_v42, %v3671_v37  ;;  %v3672_v14 = vunpack.c.l.bf16 %v3625_v50  ;;  %v3674_v20 = vunpack.c.h.bf16 %v3625_v50  ;;  %v3626_v31 = vmul.bf16 %v3579_v8, %v9243_v46  ;;  %v6291_v42 = vld [vmem:[%s10354_s5 + $0x18] sm:$0xff]   ;;  %v9450_v37 = vpop.f32.mrb[155].mxu1 }
 0x350   : > { %v6831_v45 = vpop.eup %6830  ;;  %v2973_v29 = vadd.f32 %v2972_v9, %v2925_v23  ;;  %v3009_v32 = vadd.f32 %v9312_v63, %v2924_v62  ;;  %v2927_v53 = vunpack.c.l.bf16 %v2878_v11  ;;  %v2929_v58 = vunpack.c.h.bf16 %v2878_v11  ;;  %10666 = vst [vmem:[#allocation11_spill] sm:$0xff] %v9450_v37  ;;  %v6300_v46 = vld [vmem:[%s10354_s5 + $0x1d8] sm:$0xff]   ;;  %6013 = vmatpush3.bf16.msra.mxu1 %v6299_v2  ;;  %5949 = vmatpush3.bf16.msra.mxu0 %v6291_v42 }
 0x351   : > { %v6833_v55 = vpop.eup %6832  ;;  %v3721_v50 = vadd.f32 %v3720_v48, %v3673_v1  ;;  %v3757_v8 = vadd.f32 %v9336_v41, %v3672_v14  ;;  %v3675_v19 = vunpack.c.l.bf16 %v3626_v31  ;;  %v3677_v23 = vunpack.c.h.bf16 %v3626_v31  ;;  %v6301_v63 = vld [vmem:[%s10354_s5 + $0x198] sm:$0xff]   ;;  %6014 = vmatprep.subr.bf16.mxu1 %v6300_v46  ;;  %v6292_v41 = vld [vmem:[%s10354_s5 + $0x60] sm:$0xff]  }
 0x352   : > { %v6835_v9 = vpop.eup %6834  ;;  %v3010_v62 = vadd.f32 %v3009_v32, %v2926_v30  ;;  %v2974_v11 = vadd.f32 %v2973_v29, %v2927_v53  ;;  %v2833_v37 = vmul.bf16 1065369472, %v6825_v44  ;;  %v3581_v54 = vmul.bf16 1065369472, %v6827_v43  ;;  %v6294_v44 = vld [vmem:[%s10354_s5 + $0x20] sm:$0xff]   ;;  %5950 = vmatprep.subr.bf16.mxu0 %v6292_v41 }
 0x353   : > { %v3758_v3 = vadd.f32 %v3757_v8, %v3674_v20  ;;  %v3722_v26 = vadd.f32 %v3721_v50, %v3675_v19  ;;  %v2784_v1 = vadd.bf16 1065369472, %v6829_v24  ;;  %v3532_v48 = vadd.bf16 1065369472, %v6831_v45  ;;  %v6303_v19 = vld [vmem:[%s10354_s5 + $0x1e0] sm:$0xff]  }
 0x354   : > { %v6837_v17 = vpop.eup %6836  ;;  %v9462_v2 = vadd.f32 %v2974_v11, %v2929_v58  ;;  %v2879_v14 = vmul.bf16 %v2833_v37, %v9249_v5  ;;  %v3627_v30 = vmul.bf16 %v3581_v54, %v9257_v28  ;;  %v2785_v31 = vadd.bf16 1065369472, %v6833_v55  ;;  %6015 = vmatpush3.bf16.msra.mxu1 %v6301_v63  ;;  %v9474_v5 = vpop.f32.mrb[156].mxu1  ;;  %v6305_v28 = vld [vmem:[%s10354_s5 + $0x1a0] sm:$0xff]   ;;  %5951 = vmatpush3.bf16.msra.mxu0 %v6294_v44  ;;  %v6302_v55 = vld [vmem:[%s10354_s5 + $0x68] sm:$0xff]  }
 0x355   : > { %v6839_v43 = vpop.eup %6838  ;;  %v9472_v24 = vadd.f32 %v3722_v26, %v3677_v23  ;;  %6842 = vrcp.bf16 %v2784_v1  ;;  %v3533_v20 = vadd.bf16 1065369472, %v6835_v9  ;;  %v2786_v45 = vadd.bf16 1065369472, %v6837_v17  ;;  %v9479_v42 = vpop.f32.mrb[157].mxu1  ;;  %6016 = vmatprep.subr.bf16.mxu1 %v6303_v19  ;;  %v6304_v9 = vld [vmem:[%s10354_s5 + $0x28] sm:$0xff]   ;;  %5952 = vmatprep.subr.bf16.mxu0 %v6302_v55 }
 0x356   : > { %v6841_v54 = vpop.eup %6840  ;;  %v2928_v29 = vunpack.c.l.bf16 %v2879_v14  ;;  %v2930_v32 = vunpack.c.h.bf16 %v2879_v14  ;;  %v3676_v53 = vunpack.c.l.bf16 %v3627_v30  ;;  %v3678_v58 = vunpack.c.h.bf16 %v3627_v30  ;;  %v9488_v50 = vpop.f32.mrb[158].mxu1  ;;  %v10668_v1 = vld [vmem:[#allocation25_spill] sm:$0xff]  ;;  %v6308_v19 = vld [vmem:[%s10354_s5 + $0x70] sm:$0xff]  }
 0x357   : > { %6844 = vrcp.bf16 %v3532_v48  ;;  %v3534_v26 = vadd.bf16 1065369472, %v6839_v43  ;;  %v2787_v37 = vadd.bf16 1065369472, %v6841_v54  ;;  %v9483_v46 = vpack.c.bf16 %v9412_v47, %v9375_v6  ;;  %v9497_v11 = vpop.f32.mrb[159].mxu1  ;;  %v6306_v6 = vld [vmem:[%s10354_s5 + $0x1e8] sm:$0xff]  }
 0x358   : > { %v3011_v8 = vadd.f32 %v3010_v62, %v2928_v29  ;;  %v3759_v23 = vadd.f32 %v3758_v3, %v3676_v53  ;;  %6846 = vrcp.bf16 %v2785_v31  ;;  %v9492_v63 = vpack.c.bf16 %v9423_v16, %v9379_v22  ;;  %v10667_v3 = vld [vmem:[#allocation24_spill] sm:$0xff]  ;;  %6017 = vmatpush3.bf16.msra.mxu1 %v6305_v28  ;;  %v6307_v16 = vld [vmem:[%s10354_s5 + $0x1a8] sm:$0xff]   ;;  %5953 = vmatpush3.bf16.msra.mxu0 %v6304_v9  ;;  %v10670_v43 = vld [vmem:[#allocation67_spill] sm:$0xff]  ;;  %v9544_v55 = vpop.f32.mrb[160].mxu1 }
 0x359   : > { %6848 = vrcp.bf16 %v3533_v20  ;;  %v5734_v47 = vmul.bf16 3216621497, %v9483_v46  ;;  %v2564_v62 = vadd.f32 %v10667_v3, %v8784_v35  ;;  %v3312_v22 = vadd.f32 %v10668_v1, %v8797_v7  ;;  %6018 = vmatprep.subr.bf16.mxu1 %v6306_v6  ;;  %v10669_v31 = vld [vmem:[#allocation26_spill] sm:$0xff]  ;;  %5954 = vmatprep.subr.bf16.mxu0 %v6308_v19  ;;  %v10676_v6 = vld [vmem:[#allocation71_spill] sm:$0xff] }
 0x35a   : > { %v9510_v48 = vadd.f32 %v3011_v8, %v2930_v32  ;;  %v9512_v41 = vadd.f32 %v3759_v23, %v3678_v58  ;;  %6850 = vrcp.bf16 %v2786_v45  ;;  %v5782_v17 = vmul.bf16 3216621497, %v9492_v63  ;;  %v10671_v45 = vld [vmem:[#allocation27_spill] sm:$0xff]  ;;  %v10675_v23 = vld [vmem:[#allocation70_spill] sm:$0xff] }
 0x35b   : > { %6852 = vrcp.bf16 %v3534_v26  ;;  %v9516_v14 = vpack.c.bf16 %v2564_v62, %v9396_v15  ;;  %v9519_v30 = vpack.c.bf16 %v3312_v22, %v9400_v18  ;;  %v2568_v44 = vadd.f32 %v10669_v31, %v8738_v56  ;;  %v10672_v15 = vld [vmem:[#allocation68_spill] sm:$0xff]  ;;  %v6309_v18 = vld [vmem:[%s10354_s5 + $0x30] sm:$0xff]   ;;  %v10674_v26 = vld [vmem:[#allocation69_spill] sm:$0xff]  ;;  %v9555_v22 = vpop.f32.mrb[161].mxu1 }
 0x35c   : > { %6854 = vrcp.bf16 %v2787_v37  ;;  %v3316_v20 = vadd.f32 %v10670_v43, %v8751_v21  ;;  %v2570_v28 = vadd.f32 %v10671_v45, %v8784_v35  ;;  %v3318_v54 = vadd.f32 %v10672_v15, %v8797_v7  ;;  %v6310_v29 = vld [vmem:[%s10354_s5 + $0x1f0] sm:$0xff]   ;;  %6019 = vmatpush3.bf16.msra.mxu1 %v6307_v16  ;;  %v10677_v62 = vld [vmem:[#allocation72_spill] sm:$0xff]  ;;  %5955 = vmatpush3.bf16.msra.mxu0 %v6309_v18  ;;  %v9565_v19 = vpop.f32.mrb[162].mxu1 }
 0x35d   : > { %v10673_v32 = vmul.bf16 3216621497, %v9386_v0  ;;  %v5735_v53 = vmul.bf16 3216621497, %v9516_v14  ;;  %v5783_v58 = vmul.bf16 3216621497, %v9519_v30  ;;  %v2572_v37 = vadd.f32 %v10674_v26, %v8738_v56  ;;  %6020 = vmatprep.subr.bf16.mxu1 %v6310_v29 }
 0x35e   : > { %v6311_v8 = vld [vmem:[%s10354_s5 + $0x1b0] sm:$0xff]   ;;  %v3320_v9 = vadd.f32 %v10675_v23, %v8751_v21  ;;  %v2574_v3 = vadd.f32 %v10676_v6, %v8784_v35  ;;  %v3322_v1 = vadd.f32 %v10677_v62, %v8797_v7  ;;  %v2578_v31 = vadd.f32 %v8991_v59, %v8738_v56  ;;  %v6312_v43 = vld [vmem:[%s10354_s5 + $0x78] sm:$0xff]   ;;  %v9576_v18 = vpop.f32.mrb[163].mxu1  ;;  %v6316_v6 = vld [vmem:[%s10354_s5 + $0xc0] sm:$0xff]  }
 0x35f   : > { %6856 = vpow.bf16 %v10673_v32  ;;  %v9557_v16 = vpack.c.bf16 %v2572_v37, %v2568_v44  ;;  %10678 = vst [vmem:[#allocation39_spill] sm:$0xff] %v9576_v18  ;;  %v6313_v59 = vld [vmem:[%s10354_s5 + $0x38] sm:$0xff]   ;;  %5956 = vmatprep.subr.bf16.mxu0 %v6312_v43 }
 0x360   : > { %6858 = vpow.bf16 %v5734_v47  ;;  %v9563_v47 = vadd.f32 %v8993_v38, %v8751_v21  ;;  %v6843_v45 = vpop.eup %6842  ;;  %v9570_v15 = vpack.c.bf16 %v3320_v9, %v3316_v20  ;;  %v9574_v44 = vpack.c.bf16 %v3322_v1, %v3318_v54  ;;  %v6314_v38 = vld [vmem:[%s10354_s5 + $0x1f8] sm:$0xff]   ;;  %6021 = vmatpush3.bf16.msra.mxu1 %v6311_v8  ;;  %5957 = vmatpush3.bf16.msra.mxu0 %v6313_v59 }
 0x361   : > { %6860 = vpow.bf16 %v5782_v17  ;;  %v9572_v17 = vpack.c.bf16 %v2574_v3, %v2570_v28  ;;  %v2835_v29 = vmul.bf16 1065369472, %v6843_v45  ;;  %v5736_v32 = vmul.bf16 3216621497, %v9557_v16  ;;  %v6315_v28 = vld [vmem:[%s10354_s5 + $0x1b8] sm:$0xff]   ;;  %6022 = vmatprep.subr.bf16.mxu1 %v6314_v38  ;;  %v9614_v38 = vpop.f32.mrb[164].mxu1  ;;  %5964 = vmatprep.subr.bf16.mxu0 %v6316_v6 }
 0x362   : > { %6862 = vpow.bf16 %v5735_v53  ;;  %v9587_v20 = vadd.f32 %v9004_v60, %v8784_v35  ;;  %v6845_v54 = vpop.eup %6844  ;;  %v5784_v53 = vmul.bf16 3216621497, %v9570_v15  ;;  %v2582_v9 = vadd.f32 %v9016_v33, %v8738_v56  ;;  %10679 = vst [vmem:[#allocation40_spill] sm:$0xff] %v9614_v38 }
 0x363   : > { %6864 = vpow.bf16 %v5783_v58  ;;  %v5737_v26 = vmul.bf16 3216621497, %v9572_v17  ;;  %v9597_v58 = vadd.f32 %v9006_v4, %v8797_v7  ;;  %v6847_v60 = vpop.eup %6846  ;;  %v2880_v8 = vmul.bf16 %v2835_v29, %v9287_v34 }
 0x364   : > { %v3583_v23 = vmul.bf16 1065369472, %v6845_v54  ;;  %6866 = vpow.bf16 %v5736_v32  ;;  %v6849_v3 = vpop.eup %6848  ;;  %v2837_v62 = vmul.bf16 1065369472, %v6847_v60  ;;  %v9607_v4 = vadd.f32 %v9018_v52, %v8751_v21  ;;  %6023 = vmatpush3.bf16.msra.mxu1 %v6315_v28 }
 0x365   : > { %6868 = vpow.bf16 %v5784_v53  ;;  %v9611_v1 = vadd.f32 %v9023_v36, %v8784_v35  ;;  %v6851_v34 = vpop.eup %6850  ;;  %v2931_v43 = vunpack.c.l.bf16 %v2880_v8  ;;  %v2933_v45 = vunpack.c.h.bf16 %v2880_v8  ;;  %v9619_v53 = vpop.f32.mrb[165].mxu1 }
 0x366   : > { %v3628_v33 = vmul.bf16 %v3583_v23, %v9321_v40  ;;  %v3585_v59 = vmul.bf16 1065369472, %v6849_v3  ;;  %v6853_v29 = vpop.eup %6852  ;;  %v2881_v32 = vmul.bf16 %v2837_v62, %v9339_v57  ;;  %v2839_v54 = vmul.bf16 1065369472, %v6851_v34  ;;  %10680 = vst [vmem:[#allocation41_spill] sm:$0xff] %v9619_v53  ;;  %v9623_v28 = vpop.f32.mrb[166].mxu1 }
 0x367   : > { %6870 = vpow.bf16 %v5737_v26  ;;  %v9617_v52 = vpack.c.bf16 %v2582_v9, %v2578_v31  ;;  %v6855_v36 = vpop.eup %6854  ;;  %v2976_v60 = vadd.f32 %v9462_v2, %v2931_v43  ;;  %10681 = vst [vmem:[#allocation42_spill] sm:$0xff] %v9623_v28  ;;  %v3587_v62 = vmul.bf16 1065369472, %v6853_v29  ;;  %v9626_v26 = vpop.f32.mrb[167].mxu1 }
 0x368   : > { %v3679_v8 = vunpack.c.l.bf16 %v3628_v33  ;;  %v3681_v37 = vunpack.c.h.bf16 %v3628_v33  ;;  %v3629_v40 = vmul.bf16 %v3585_v59, %v9342_v49  ;;  %v2932_v6 = vunpack.c.l.bf16 %v2881_v32  ;;  %10682 = vst [vmem:[#allocation43_spill] sm:$0xff] %v9626_v26 }
 0x369   : > { %v2934_v3 = vunpack.c.h.bf16 %v2881_v32  ;;  %v2882_v57 = vmul.bf16 %v2839_v54, %v9360_v10  ;;  %v2977_v9 = vadd.f32 %v2976_v60, %v2933_v45  ;;  %v3630_v28 = vmul.bf16 %v3587_v62, %v9371_v27 }
 0x36a   : > { %v6857_v23 = vpop.eup %6856  ;;  %v3724_v34 = vadd.f32 %v9472_v24, %v3679_v8  ;;  %v3680_v53 = vunpack.c.l.bf16 %v3629_v40  ;;  %v3682_v2 = vunpack.c.h.bf16 %v3629_v40  ;;  %v3013_v33 = vadd.f32 %v9510_v48, %v2932_v6  ;;  %v9635_v6 = vpop.f32.mrb[168].mxu1 }
 0x36b   : > { %v6859_v31 = vpop.eup %6858  ;;  %v2935_v49 = vunpack.c.l.bf16 %v2882_v57  ;;  %v2937_v59 = vunpack.c.h.bf16 %v2882_v57  ;;  %v2841_v29 = vmul.bf16 1065369472, %v6855_v36  ;;  %v3535_v54 = vadd.bf16 1065369472, %v6857_v23  ;;  %v9639_v36 = vpop.f32.mrb[169].mxu1 }
 0x36c   : > { %v6861_v43 = vpop.eup %6860  ;;  %v3725_v32 = vadd.f32 %v3724_v34, %v3681_v37  ;;  %v3761_v10 = vadd.f32 %v9512_v41, %v3680_v53  ;;  %v3014_v18 = vadd.f32 %v3013_v33, %v2934_v3  ;;  %v3683_v60 = vunpack.c.l.bf16 %v3630_v28 }
 0x36d   : > { %v6863_v38 = vpop.eup %6862  ;;  %v2978_v45 = vadd.f32 %v2977_v9, %v2935_v49  ;;  %v3685_v24 = vunpack.c.h.bf16 %v3630_v28  ;;  %v2883_v40 = vmul.bf16 %v2841_v29, %v9384_v12  ;;  %6872 = vrcp.bf16 %v3535_v54  ;;  %v9641_v9 = vpop.f32.mrb[170].mxu1  ;;  %v10684_v54 = vld [vmem:[#allocation7_spill] sm:$0xff] }
 0x36e   : > { %v6865_v26 = vpop.eup %6864  ;;  %v9632_v8 = vadd.f32 %v3761_v10, %v3682_v2  ;;  %v2788_v48 = vadd.bf16 1065369472, %v6859_v31  ;;  %v3726_v37 = vadd.f32 %v3725_v32, %v3683_v60  ;;  %v3536_v41 = vadd.bf16 1065369472, %v6861_v43  ;;  %v9645_v2 = vpop.f32.mrb[171].mxu1  ;;  %v10683_v32 = vld [vmem:[#allocation28_spill] sm:$0xff] }
 0x36f   : > { %v6867_v27 = vpop.eup %6866  ;;  %v9637_v57 = vadd.f32 %v2978_v45, %v2937_v59  ;;  %v2789_v53 = vadd.bf16 1065369472, %v6863_v38  ;;  %v2936_v3 = vunpack.c.l.bf16 %v2883_v40  ;;  %v2938_v62 = vunpack.c.h.bf16 %v2883_v40  ;;  %v10686_v60 = vld [vmem:[#allocation29_spill] sm:$0xff]  ;;  %v10687_v40 = vld [vmem:[#allocation30_spill] sm:$0xff] }
 0x370   : > { %v6869_v23 = vpop.eup %6868  ;;  %6874 = vrcp.bf16 %v2788_v48  ;;  %v3537_v28 = vadd.bf16 1065369472, %v6865_v26  ;;  %v9643_v12 = vadd.f32 %v3726_v37, %v3685_v24  ;;  %v2790_v31 = vadd.bf16 1065369472, %v6867_v27  ;;  %v10688_v27 = vld [vmem:[#allocation31_spill] sm:$0xff] }
 0x371   : > { %6876 = vrcp.bf16 %v3536_v41  ;;  %v3538_v34 = vadd.bf16 1065369472, %v6869_v23  ;;  %v3015_v49 = vadd.f32 %v3014_v18, %v2936_v3  ;;  %v5738_v38 = vmul.bf16 3216621497, %v9617_v52  ;;  %v9675_v41 = vpop.f32.mrb[172].mxu1  ;;  %v10690_v23 = vld [vmem:[#allocation32_spill] sm:$0xff] }
 0x372   : > { %v6871_v33 = vpop.eup %6870  ;;  %6878 = vrcp.bf16 %v2789_v53  ;;  %v9650_v43 = vpack.c.bf16 %v9607_v4, %v9563_v47  ;;  %v9654_v59 = vpack.c.bf16 %v9611_v1, %v9587_v20  ;;  %v3332_v10 = vadd.f32 %v10683_v32, %v8797_v7  ;;  %v10685_v20 = vld [vmem:[#allocation13_spill] sm:$0xff] }
 0x373   : > { %6880 = vrcp.bf16 %v3537_v28  ;;  %v2791_v26 = vadd.bf16 1065369472, %v6871_v33  ;;  %v9658_v29 = vadd.f32 %v3015_v49, %v2938_v62  ;;  %v2588_v45 = vadd.f32 %v10684_v54, %v8738_v56  ;;  %v10691_v62 = vld [vmem:[#allocation33_spill] sm:$0xff]  ;;  %v10693_v33 = vld [vmem:[#allocation14_spill] sm:$0xff] }
 0x374   : > { %6882 = vrcp.bf16 %v2790_v31  ;;  %v5786_v18 = vmul.bf16 3216621497, %v9650_v43  ;;  %v5739_v47 = vmul.bf16 3216621497, %v9654_v59  ;;  %v9665_v4 = vpack.c.bf16 %v3332_v10, %v9597_v58  ;;  %v9684_v31 = vpop.f32.mrb[173].mxu1 }
 0x375   : > { %6884 = vrcp.bf16 %v3538_v34  ;;  %v3336_v1 = vadd.f32 %v10685_v20, %v8751_v21  ;;  %v2590_v24 = vadd.f32 %v10686_v60, %v8784_v35  ;;  %v3338_v48 = vadd.f32 %v10687_v40, %v8797_v7  ;;  %10692 = vst [vmem:[#allocation44_spill] sm:$0xff] %v9684_v31  ;;  %v9692_v32 = vpop.f32.mrb[174].mxu1 }
 0x376   : > { %6886 = vrcp.bf16 %v2791_v26  ;;  %v2592_v37 = vadd.f32 %v10688_v27, %v8738_v56  ;;  %v10689_v53 = vmul.bf16 3216621497, %v9574_v44  ;;  %v5787_v58 = vmul.bf16 3216621497, %v9665_v4  ;;  %10694 = vst [vmem:[#allocation45_spill] sm:$0xff] %v9692_v32 }
 0x377   : > { %v3340_v3 = vadd.f32 %v10690_v23, %v8751_v21  ;;  %v2594_v28 = vadd.f32 %v10691_v62, %v8784_v35  ;;  %v3342_v49 = vadd.f32 %v10693_v33, %v8797_v7  ;;  %v2598_v26 = vadd.f32 %v9136_v25, %v8738_v56 }
 0x378   : > { %6888 = vpow.bf16 %v10689_v53  ;;  %v9686_v34 = vpack.c.bf16 %v2592_v37, %v2588_v45  ;;  %v6873_v10 = vpop.eup %6872  ;;  %v9700_v60 = vadd.f32 %v9138_v61, %v8751_v21 }
 0x379   : > { %6890 = vpow.bf16 %v5738_v38  ;;  %v9694_v54 = vpack.c.bf16 %v3340_v3, %v3336_v1  ;;  %v9696_v20 = vpack.c.bf16 %v2594_v28, %v2590_v24  ;;  %v9702_v38 = vpop.f32.mrb[175].mxu1  ;;  %v3589_v45 = vmul.bf16 1065369472, %v6873_v10  ;;  %v10696_v3 = vld [vmem:[#allocation34_spill] sm:$0xff] }
 0x37a   : > { %6892 = vpow.bf16 %v5786_v18  ;;  %10695 = vst [vmem:[#allocation12_spill] sm:$0xff] %v9702_v38  ;;  %v5740_v40 = vmul.bf16 3216621497, %v9686_v34  ;;  %v9705_v27 = vpack.c.bf16 %v3342_v49, %v3338_v48  ;;  %v9711_v24 = vadd.f32 %v9143_v13, %v8784_v35  ;;  %v9722_v10 = vpop.f32.mrb[176].mxu1 }
 0x37b   : > { %6894 = vpow.bf16 %v5739_v47  ;;  %v6875_v25 = vpop.eup %6874  ;;  %v5788_v18 = vmul.bf16 3216621497, %v9694_v54  ;;  %v5741_v1 = vmul.bf16 3216621497, %v9696_v20  ;;  %v3631_v37 = vmul.bf16 %v3589_v45, %v9386_v0  ;;  %10697 = vst [vmem:[#allocation19_spill] sm:$0xff] %v9722_v10 }
 0x37c   : > { %6896 = vpow.bf16 %v5787_v58  ;;  %v6877_v61 = vpop.eup %6876  ;;  %v2843_v53 = vmul.bf16 1065369472, %v6875_v25  ;;  %v9717_v58 = vadd.f32 %v9145_v39, %v8797_v7  ;;  %v2602_v62 = vadd.f32 %v10696_v3, %v8738_v56  ;;  %v9727_v39 = vpop.f32.mrb[177].mxu1 }
 0x37d   : > { %6898 = vpow.bf16 %v5740_v40  ;;  %v6879_v23 = vpop.eup %6878  ;;  %v3591_v48 = vmul.bf16 1065369472, %v6877_v61  ;;  %v3684_v13 = vunpack.c.l.bf16 %v3631_v37  ;;  %v3686_v33 = vunpack.c.h.bf16 %v3631_v37  ;;  %10698 = vst [vmem:[#allocation6_spill] sm:$0xff] %v9727_v39 }
 0x37e   : > { %6900 = vpow.bf16 %v5788_v18  ;;  %v6881_v28 = vpop.eup %6880  ;;  %v2884_v49 = vmul.bf16 %v2843_v53, %v9483_v46  ;;  %v2845_v0 = vmul.bf16 1065369472, %v6879_v23  ;;  %v9725_v18 = vpack.c.bf16 %v2602_v62, %v2598_v26  ;;  %v9731_v46 = vpop.f32.mrb[178].mxu1 }
 0x37f   : > { %v6883_v45 = vpop.eup %6882  ;;  %v3632_v40 = vmul.bf16 %v3591_v48, %v9492_v63  ;;  %v3593_v25 = vmul.bf16 1065369472, %v6881_v28  ;;  %6902 = vpow.bf16 %v5741_v1  ;;  %v3763_v56 = vadd.f32 %v9632_v8, %v3684_v13  ;;  %10699 = vst [vmem:[#allocation20_spill] sm:$0xff] %v9731_v46  ;;  %v9734_v1 = vpop.f32.mrb[179].mxu1 }
 0x380   : > { %v6885_v61 = vpop.eup %6884  ;;  %v2939_v3 = vunpack.c.l.bf16 %v2884_v49  ;;  %v2941_v47 = vunpack.c.h.bf16 %v2884_v49  ;;  %v2885_v37 = vmul.bf16 %v2845_v0, %v9516_v14  ;;  %v2847_v48 = vmul.bf16 1065369472, %v6883_v45  ;;  %10700 = vst [vmem:[#allocation24_spill] sm:$0xff] %v9734_v1 }
 0x381   : > { %v6887_v53 = vpop.eup %6886  ;;  %v3687_v23 = vunpack.c.l.bf16 %v3632_v40  ;;  %v3689_v10 = vunpack.c.h.bf16 %v3632_v40  ;;  %v3633_v63 = vmul.bf16 %v3593_v25, %v9519_v30  ;;  %v3764_v62 = vadd.f32 %v3763_v56, %v3686_v33 }
 0x382   : > { %v2980_v28 = vadd.f32 %v9637_v57, %v2939_v3  ;;  %v2940_v39 = vunpack.c.l.bf16 %v2885_v37  ;;  %v2942_v8 = vunpack.c.h.bf16 %v2885_v37  ;;  %v2886_v46 = vmul.bf16 %v2847_v48, %v9557_v16 }
 0x383   : > { %v6889_v26 = vpop.eup %6888  ;;  %v3728_v49 = vadd.f32 %v9643_v12, %v3687_v23  ;;  %v3688_v14 = vunpack.c.l.bf16 %v3633_v63  ;;  %v3690_v0 = vunpack.c.h.bf16 %v3633_v63  ;;  %v3595_v45 = vmul.bf16 1065369472, %v6885_v61  ;;  %v9742_v63 = vpop.f32.mrb[180].mxu1 }
 0x384   : > { %v6891_v13 = vpop.eup %6890  ;;  %v2981_v40 = vadd.f32 %v2980_v28, %v2941_v47  ;;  %v3017_v30 = vadd.f32 %v9658_v29, %v2940_v39  ;;  %v2849_v25 = vmul.bf16 1065369472, %v6887_v53  ;;  %v2943_v56 = vunpack.c.l.bf16 %v2886_v46 }
 0x385   : > { %v6893_v38 = vpop.eup %6892  ;;  %v3729_v31 = vadd.f32 %v3728_v49, %v3689_v10  ;;  %v3765_v33 = vadd.f32 %v3764_v62, %v3688_v14  ;;  %v2945_v57 = vunpack.c.h.bf16 %v2886_v46  ;;  %v3634_v32 = vmul.bf16 %v3595_v45, %v9570_v15 }
 0x386   : > { %v6895_v1 = vpop.eup %6894  ;;  %v3018_v37 = vadd.f32 %v3017_v30, %v2942_v8  ;;  %v2887_v12 = vmul.bf16 %v2849_v25, %v9572_v17  ;;  %v3539_v23 = vadd.bf16 1065369472, %v6889_v26  ;;  %v2982_v29 = vadd.f32 %v2981_v40, %v2943_v56  ;;  %v10701_v30 = vld [vmem:[#allocation35_spill] sm:$0xff]  ;;  %v10704_v56 = vld [vmem:[#allocation60_spill] sm:$0xff] }
 0x387   : > { %v6897_v3 = vpop.eup %6896  ;;  %v9744_v47 = vadd.f32 %v3765_v33, %v3690_v0  ;;  %v2792_v39 = vadd.bf16 1065369472, %v6891_v13  ;;  %v3540_v61 = vadd.bf16 1065369472, %v6893_v38  ;;  %v3691_v10 = vunpack.c.l.bf16 %v3634_v32  ;;  %v10703_v25 = vld [vmem:[#allocation15_spill] sm:$0xff] }
 0x388   : > { %v6899_v16 = vpop.eup %6898  ;;  %v3693_v48 = vunpack.c.h.bf16 %v3634_v32  ;;  %v2944_v62 = vunpack.c.l.bf16 %v2887_v12  ;;  %v2946_v46 = vunpack.c.h.bf16 %v2887_v12  ;;  %v9746_v28 = vadd.f32 %v2982_v29, %v2945_v57  ;;  %v10705_v57 = vld [vmem:[#allocation47_spill] sm:$0xff]  ;;  %v7068_v12 = vld [vmem:[%s10353_s4 + $0x8] sm:$0x3] }
 0x389   : > { %v6901_v53 = vpop.eup %6900  ;;  %6904 = vrcp.bf16 %v3539_v23  ;;  %v2793_v15 = vadd.bf16 1065369472, %v6895_v1  ;;  %v3541_v8 = vadd.bf16 1065369472, %v6897_v3  ;;  %v3730_v26 = vadd.f32 %v3729_v31, %v3691_v10  ;;  %v10702_v1 = vld [vmem:[#allocation46_spill] sm:$0xff] }
 0x38a   : > { %v6903_v17 = vpop.eup %6902  ;;  %v3019_v49 = vadd.f32 %v3018_v37, %v2944_v62  ;;  %6906 = vrcp.bf16 %v2792_v39  ;;  %v2794_v14 = vadd.bf16 1065369472, %v6899_v16  ;;  %v3542_v0 = vadd.bf16 1065369472, %v6901_v53  ;;  %v10706_v23 = vld [vmem:[#allocation18_spill] sm:$0xff]  ;;  %v10707_v16 = vld [vmem:[#allocation49_spill] sm:$0xff] }
 0x38b   : > { %6908 = vrcp.bf16 %v3540_v61  ;;  %v2795_v40 = vadd.bf16 1065369472, %v6903_v17  ;;  %v5742_v38 = vmul.bf16 3216621497, %v9725_v18  ;;  %v9749_v13 = vadd.f32 %v3730_v26, %v3693_v48  ;;  %v10708_v61 = vld [vmem:[#allocation48_spill] sm:$0xff]  ;;  %v10712_v17 = vld [vmem:[#allocation37_spill] sm:$0xff] }
 0x38c   : > { %v9751_v32 = vadd.f32 %v3019_v49, %v2946_v46  ;;  %6910 = vrcp.bf16 %v2793_v15  ;;  %v3350_v45 = vadd.f32 %v10701_v30, %v8751_v21  ;;  %v2604_v31 = vadd.f32 %v10702_v1, %v8784_v35  ;;  %v10711_v15 = vld [vmem:[#allocation36_spill] sm:$0xff]  ;;  %v10715_v1 = vld [vmem:[#allocation51_spill] sm:$0xff] }
 0x38d   : > { %6912 = vrcp.bf16 %v3541_v8  ;;  %v3352_v33 = vadd.f32 %v10703_v25, %v8797_v7  ;;  %v3944_v3 = vadd.f32 %v10705_v57, %v10704_v56  ;;  %v9768_v21 = vrot.slane %v7068_v12, %v10706_v23  ;;  %v10716_v25 = vld [vmem:[#allocation52_spill] sm:$0xff] }
 0x38e   : > { %6914 = vrcp.bf16 %v2794_v14  ;;  %v9762_v37 = vpack.c.bf16 %v3350_v45, %v9700_v60  ;;  %v3948_v35 = vadd.f32 %v10707_v16, %v10704_v56  ;;  %v9773_v7 = vpack.c.bf16 %v2604_v31, %v9711_v24  ;;  %v10713_v14 = vld [vmem:[#allocation38_spill] sm:$0xff] }
 0x38f   : > { %6916 = vrcp.bf16 %v3542_v0  ;;  %v9776_v29 = vpack.c.bf16 %v3352_v33, %v9717_v58  ;;  %v3954_v60 = vadd.f32 %v9206_v51, %v10704_v56  ;;  %v3946_v53 = vadd.f32 %v10708_v61, %v9768_v21  ;;  %v10710_v58 = vld [vmem:[#allocation8_spill] sm:$0xff] }
 0x390   : > { %6918 = vrcp.bf16 %v2795_v40  ;;  %v5790_v39 = vmul.bf16 3216621497, %v9762_v37  ;;  %v9783_v10 = vpack.c.bf16 %v3948_v35, %v3944_v3  ;;  %v10709_v48 = vmul.bf16 3216621497, %v9705_v27  ;;  %v10714_v40 = vld [vmem:[#allocation50_spill] sm:$0xff] }
 0x391   : > { %v5743_v24 = vmul.bf16 3216621497, %v9773_v7  ;;  %v5791_v62 = vmul.bf16 3216621497, %v9776_v29  ;;  %v3950_v46 = vadd.f32 %v10710_v58, %v9768_v21  ;;  %v3956_v8 = vadd.f32 %v10711_v15, %v9768_v21 }
 0x392   : > { %6920 = vpow.bf16 %v10709_v48  ;;  %v5808_v51 = vmul.bf16 3216621497, %v9783_v10  ;;  %v3958_v26 = vadd.f32 %v10712_v17, %v10704_v56  ;;  %v3960_v0 = vadd.f32 %v10713_v14, %v9768_v21 }
 0x393   : > { %6922 = vpow.bf16 %v5742_v38  ;;  %v9796_v49 = vpack.c.bf16 %v3950_v46, %v3946_v53  ;;  %v3964_v30 = vadd.f32 %v10714_v40, %v10704_v56  ;;  %v9806_v31 = vadd.f32 %v10715_v1, %v9768_v21  ;;  %v9821_v40 = vpop.f32.mrb[181].mxu1 }
 0x394   : > { %6924 = vpow.bf16 %v5790_v39  ;;  %v6905_v45 = vpop.eup %6904  ;;  %v9802_v38 = vpack.c.bf16 %v3958_v26, %v3954_v60  ;;  %v3968_v33 = vadd.f32 %v10716_v25, %v10704_v56  ;;  %v9811_v16 = vpack.c.bf16 %v3960_v0, %v3956_v8 }
 0x395   : > { %6926 = vpow.bf16 %v5743_v24  ;;  %v6907_v57 = vpop.eup %6906  ;;  %v3597_v3 = vmul.bf16 1065369472, %v6905_v45  ;;  %v5809_v12 = vmul.bf16 3216621497, %v9796_v49 }
 0x396   : > { %6928 = vpow.bf16 %v5791_v62  ;;  %v6909_v35 = vpop.eup %6908  ;;  %v2851_v39 = vmul.bf16 1065369472, %v6907_v57  ;;  %v5810_v60 = vmul.bf16 3216621497, %v9802_v38  ;;  %v9814_v61 = vpack.c.bf16 %v3968_v33, %v3964_v30 }
 0x397   : > { %6930 = vpow.bf16 %v5808_v51  ;;  %v6911_v53 = vpop.eup %6910  ;;  %v3635_v48 = vmul.bf16 %v3597_v3, %v9574_v44  ;;  %v3599_v24 = vmul.bf16 1065369472, %v6909_v35 }
 0x398   : > { %6932 = vpow.bf16 %v5809_v12  ;;  %v6913_v46 = vpop.eup %6912  ;;  %v2888_v62 = vmul.bf16 %v2851_v39, %v9617_v52  ;;  %v2853_v15 = vmul.bf16 1065369472, %v6911_v53 }
 0x399   : > { %6934 = vpow.bf16 %v5810_v60  ;;  %v6915_v17 = vpop.eup %6914  ;;  %v3692_v51 = vunpack.c.l.bf16 %v3635_v48  ;;  %v3694_v26 = vunpack.c.h.bf16 %v3635_v48  ;;  %v3636_v14 = vmul.bf16 %v3599_v24, %v9650_v43  ;;  %v9828_v48 = vpop.f32.mrb[182].mxu1 }
 0x39a   : > { %v3601_v0 = vmul.bf16 1065369472, %v6913_v46  ;;  %v6917_v44 = vpop.eup %6916  ;;  %v2947_v30 = vunpack.c.l.bf16 %v2888_v62  ;;  %v2949_v45 = vunpack.c.h.bf16 %v2888_v62  ;;  %v2889_v1 = vmul.bf16 %v2853_v15, %v9654_v59  ;;  %10717 = vst [vmem:[#allocation25_spill] sm:$0xff] %v9828_v48 }
 0x39b   : > { %v2855_v25 = vmul.bf16 1065369472, %v6915_v17  ;;  %v6919_v33 = vpop.eup %6918  ;;  %v3767_v52 = vadd.f32 %v9744_v47, %v3692_v51  ;;  %v3695_v57 = vunpack.c.l.bf16 %v3636_v14  ;;  %v3697_v3 = vunpack.c.h.bf16 %v3636_v14 }
 0x39c   : > { %v3637_v12 = vmul.bf16 %v3601_v0, %v9665_v4  ;;  %v2984_v39 = vadd.f32 %v9746_v28, %v2947_v30  ;;  %v2948_v43 = vunpack.c.l.bf16 %v2889_v1  ;;  %v2950_v60 = vunpack.c.h.bf16 %v2889_v1 }
 0x39d   : > { %v6921_v35 = vpop.eup %6920  ;;  %v2890_v53 = vmul.bf16 %v2855_v25, %v9686_v34  ;;  %v3768_v46 = vadd.f32 %v3767_v52, %v3694_v26  ;;  %v3732_v59 = vadd.f32 %v9749_v13, %v3695_v57  ;;  %v3603_v1 = vmul.bf16 1065369472, %v6917_v44  ;;  %v9832_v52 = vpop.f32.mrb[183].mxu1 }
 0x39e   : > { %v6923_v24 = vpop.eup %6922  ;;  %v3696_v62 = vunpack.c.l.bf16 %v3637_v12  ;;  %v3698_v15 = vunpack.c.h.bf16 %v3637_v12  ;;  %v2985_v17 = vadd.f32 %v2984_v39, %v2949_v45  ;;  %v3021_v51 = vadd.f32 %v9751_v32, %v2948_v43  ;;  %10718 = vst [vmem:[#allocation26_spill] sm:$0xff] %v9832_v52  ;;  %v9838_v39 = vpop.f32.mrb[184].mxu1 }
 0x39f   : > { %v6925_v47 = vpop.eup %6924  ;;  %v2951_v4 = vunpack.c.l.bf16 %v2890_v53  ;;  %v2953_v14 = vunpack.c.h.bf16 %v2890_v53  ;;  %v3733_v28 = vadd.f32 %v3732_v59, %v3697_v3  ;;  %v2857_v8 = vmul.bf16 1065369472, %v6919_v33  ;;  %10719 = vst [vmem:[#allocation67_spill] sm:$0xff] %v9838_v39 }
 0x3a0   : > { %v6927_v0 = vpop.eup %6926  ;;  %v3769_v30 = vadd.f32 %v3768_v46, %v3696_v62  ;;  %v3022_v25 = vadd.f32 %v3021_v51, %v2950_v60  ;;  %v3543_v48 = vadd.bf16 1065369472, %v6921_v35  ;;  %v2796_v26 = vadd.bf16 1065369472, %v6923_v24  ;;  %v9842_v35 = vpop.f32.mrb[185].mxu1  ;;  %v10724_v51 = vld [vmem:[#allocation55_spill] sm:$0xff] }
 0x3a1   : > { %v6929_v34 = vpop.eup %6928  ;;  %v2986_v58 = vadd.f32 %v2985_v17, %v2951_v4  ;;  %v3638_v45 = vmul.bf16 %v3603_v1, %v9694_v54  ;;  %v2891_v32 = vmul.bf16 %v2857_v8, %v9696_v20  ;;  %v3544_v12 = vadd.bf16 1065369472, %v6925_v47  ;;  %10720 = vst [vmem:[#allocation27_spill] sm:$0xff] %v9842_v35  ;;  %v9844_v62 = vpop.f32.mrb[186].mxu1 }
 0x3a2   : > { %v6931_v13 = vpop.eup %6930  ;;  %v9834_v57 = vadd.f32 %v3769_v30, %v3698_v15  ;;  %6936 = vrcp.bf16 %v3543_v48  ;;  %v2797_v33 = vadd.bf16 1065369472, %v6927_v0  ;;  %v3545_v43 = vadd.bf16 1065369472, %v6929_v34  ;;  %10721 = vst [vmem:[#allocation68_spill] sm:$0xff] %v9844_v62  ;;  %v9848_v17 = vpop.f32.mrb[187].mxu1 }
 0x3a3   : > { %v6933_v3 = vpop.eup %6932  ;;  %v9840_v44 = vadd.f32 %v2986_v58, %v2953_v14  ;;  %v3699_v53 = vunpack.c.l.bf16 %v3638_v45  ;;  %v3701_v24 = vunpack.c.h.bf16 %v3638_v45  ;;  %v2952_v46 = vunpack.c.l.bf16 %v2891_v32  ;;  %v10722_v58 = vld [vmem:[#allocation53_spill] sm:$0xff]  ;;  %10723 = vst [vmem:[#allocation69_spill] sm:$0xff] %v9848_v17  ;;  %v10725_v14 = vld [vmem:[#allocation56_spill] sm:$0xff]  ;;  %v9856_v34 = vpop.f32.mrb[188].mxu1 }
 0x3a4   : > { %v6935_v60 = vpop.eup %6934  ;;  %v2954_v59 = vunpack.c.h.bf16 %v2891_v32  ;;  %6938 = vrcp.bf16 %v2796_v26  ;;  %v4262_v54 = vadd.bf16 1065369472, %v6931_v13  ;;  %v4263_v20 = vadd.bf16 1065369472, %v6933_v3  ;;  %v10726_v30 = vld [vmem:[#allocation57_spill] sm:$0xff]  ;;  %10727 = vst [vmem:[#allocation70_spill] sm:$0xff] %v9856_v34 }
 0x3a5   : > { %v4264_v8 = vadd.bf16 1065369472, %v6935_v60  ;;  %v3734_v15 = vadd.f32 %v3733_v28, %v3699_v53  ;;  %v3023_v47 = vadd.f32 %v3022_v25, %v2952_v46  ;;  %6940 = vrcp.bf16 %v3544_v12  ;;  %v9865_v13 = vpop.f32.mrb[189].mxu1  ;;  %v10729_v32 = vld [vmem:[#allocation58_spill] sm:$0xff]  ;;  %v10730_v3 = vld [vmem:[#allocation59_spill] sm:$0xff] }
 0x3a6   : > { %v3970_v48 = vadd.f32 %v10722_v58, %v9768_v21  ;;  %6942 = vrcp.bf16 %v2797_v33  ;;  %v3974_v4 = vadd.f32 %v10724_v51, %v10704_v56  ;;  %v3976_v0 = vadd.f32 %v10725_v14, %v9768_v21  ;;  %10728 = vst [vmem:[#allocation71_spill] sm:$0xff] %v9865_v13  ;;  %v9873_v60 = vpop.f32.mrb[190].mxu1 }
 0x3a7   : > { %v3978_v1 = vadd.f32 %v10726_v30, %v10704_v56  ;;  %v9858_v28 = vadd.f32 %v3734_v15, %v3701_v24  ;;  %v9860_v25 = vadd.f32 %v3023_v47, %v2954_v59  ;;  %6944 = vrcp.bf16 %v3545_v43  ;;  %10731 = vst [vmem:[#allocation72_spill] sm:$0xff] %v9873_v60  ;;  %v10732_v43 = vld [vmem:[#allocation61_spill] sm:$0xff]  ;;  %v10733_v24 = vld [vmem:[#allocation62_spill] sm:$0xff]  ;;  %v10734_v15 = vld [vmem:[#allocation64_spill] sm:$0xff] }
 0x3a8   : > { %v9863_v26 = vpack.c.bf16 %v3970_v48, %v9806_v31  ;;  %6946 = vrcp.bf16 %v4262_v54  ;;  %v3980_v12 = vadd.f32 %v10729_v32, %v9768_v21  ;;  %v3984_v33 = vadd.f32 %v10730_v3, %v10704_v56  ;;  %v10736_v48 = vld [vmem:[#allocation65_spill] sm:$0xff] }
 0x3a9   : > { %v9867_v45 = vpack.c.bf16 %v3978_v1, %v3974_v4  ;;  %6948 = vrcp.bf16 %v4263_v20  ;;  %v3986_v31 = vadd.f32 %v10732_v43, %v9768_v21  ;;  %v3988_v46 = vadd.f32 %v10733_v24, %v10704_v56  ;;  %v10737_v4 = vld [vmem:[#allocation66_spill] sm:$0xff]  ;;  %v10739_v1 = vld [vmem:[#allocation9_spill] sm:$0xff] }
 0x3aa   : > { %v5813_v53 = vmul.bf16 3216621497, %v9863_v26  ;;  %6950 = vrcp.bf16 %v4264_v8  ;;  %v9881_v54 = vpack.c.bf16 %v3980_v12, %v3976_v0  ;;  %v3990_v47 = vadd.f32 %v10734_v15, %v9768_v21  ;;  %v10741_v24 = vld [vmem:[#allocation22_spill] sm:$0xff] }
 0x3ab   : > { %v5814_v59 = vmul.bf16 3216621497, %v9867_v45  ;;  %v10735_v58 = vmul.bf16 3216621497, %v9811_v16  ;;  %v9887_v20 = vpack.c.bf16 %v3988_v46, %v3984_v33  ;;  %v3994_v51 = vadd.f32 %v10736_v48, %v10704_v56  ;;  %v10740_v33 = vld [vmem:[#allocation10_spill] sm:$0xff] }
 0x3ac   : > { %v3996_v14 = vadd.f32 %v10737_v4, %v9768_v21  ;;  %v10738_v8 = vmul.bf16 3216621497, %v9814_v61  ;;  %v5815_v0 = vmul.bf16 3216621497, %v9881_v54  ;;  %v9896_v30 = vpack.c.bf16 %v3990_v47, %v3986_v31 }
 0x3ad   : > { %6952 = vpow.bf16 %v10735_v58  ;;  %v3998_v32 = vadd.f32 %v10739_v1, %v10704_v56  ;;  %v6937_v12 = vpop.eup %6936  ;;  %v5816_v3 = vmul.bf16 3216621497, %v9887_v20  ;;  %v4000_v43 = vadd.f32 %v10740_v33, %v9768_v21 }
 0x3ae   : > { %6954 = vpow.bf16 %v10738_v8  ;;  %v4004_v46 = vadd.f32 %v10741_v24, %v10704_v56  ;;  %v3605_v15 = vmul.bf16 1065369472, %v6937_v12  ;;  %v5817_v58 = vmul.bf16 3216621497, %v9896_v30  ;;  %v10743_v8 = vld [vmem:[#allocation23_spill] sm:$0xff] }
 0x3af   : > { %6956 = vpow.bf16 %v5813_v53  ;;  %v9906_v48 = vpack.c.bf16 %v3998_v32, %v3994_v51  ;;  %v6939_v31 = vpop.eup %6938  ;;  %v9908_v47 = vpack.c.bf16 %v4000_v43, %v3996_v14  ;;  %v10742_v53 = vld [vmem:[#allocation21_spill] sm:$0xff]  ;;  %v4008_v1 = vadd.f32 %v10743_v8, %v10704_v56  ;;  %v9918_v51 = vpop.f32.mrb[191].mxu1 }
 0x3b0   : > { %6958 = vpow.bf16 %v5814_v59  ;;  %v9912_v4 = vadd.f32 %v10742_v53, %v9768_v21  ;;  %v6941_v33 = vpop.eup %6940  ;;  %v3639_v24 = vmul.bf16 %v3605_v15, %v9705_v27  ;;  %v2859_v12 = vmul.bf16 1065369472, %v6939_v31  ;;  %10744 = vst [vmem:[#allocation28_spill] sm:$0xff] %v9918_v51 }
 0x3b1   : > { %6960 = vpow.bf16 %v5815_v0  ;;  %v5818_v59 = vmul.bf16 3216621497, %v9906_v48  ;;  %v6943_v32 = vpop.eup %6942  ;;  %v3607_v0 = vmul.bf16 1065369472, %v6941_v33  ;;  %v9921_v43 = vpack.c.bf16 %v4008_v1, %v4004_v46 }
 0x3b2   : > { %6962 = vpow.bf16 %v5816_v3  ;;  %v6945_v53 = vpop.eup %6944  ;;  %v3700_v60 = vunpack.c.l.bf16 %v3639_v24  ;;  %v3702_v13 = vunpack.c.h.bf16 %v3639_v24  ;;  %v2892_v8 = vmul.bf16 %v2859_v12, %v9725_v18 }
 0x3b3   : > { %6964 = vpow.bf16 %v5817_v58  ;;  %v2861_v34 = vmul.bf16 1065369472, %v6943_v32  ;;  %v6947_v27 = vpop.eup %6946  ;;  %v3640_v3 = vmul.bf16 %v3607_v0, %v9762_v37  ;;  %v3609_v15 = vmul.bf16 1065369472, %v6945_v53 }
 0x3b4   : > { %6966 = vpow.bf16 %v5818_v59  ;;  %v6949_v51 = vpop.eup %6948  ;;  %v3771_v58 = vadd.f32 %v9834_v57, %v3700_v60  ;;  %v2955_v33 = vunpack.c.l.bf16 %v2892_v8  ;;  %v2957_v14 = vunpack.c.h.bf16 %v2892_v8 }
 0x3b5   : > { %v2893_v46 = vmul.bf16 %v2861_v34, %v9773_v7  ;;  %v6951_v1 = vpop.eup %6950  ;;  %v3703_v17 = vunpack.c.l.bf16 %v3640_v3  ;;  %v3705_v24 = vunpack.c.h.bf16 %v3640_v3  ;;  %v3641_v18 = vmul.bf16 %v3609_v15, %v9776_v29 }
 0x3b6   : > { %v4295_v12 = vmul.bf16 1065369472, %v6947_v27  ;;  %v3772_v62 = vadd.f32 %v3771_v58, %v3702_v13  ;;  %v2988_v37 = vadd.f32 %v9840_v44, %v2955_v33  ;;  %v4297_v35 = vmul.bf16 1065369472, %v6949_v51 }
 0x3b7   : > { %v2956_v59 = vunpack.c.l.bf16 %v2893_v46  ;;  %v2958_v0 = vunpack.c.h.bf16 %v2893_v46  ;;  %v3736_v31 = vadd.f32 %v9858_v28, %v3703_v17  ;;  %v3704_v57 = vunpack.c.l.bf16 %v3641_v18 }
 0x3b8   : > { %v6953_v32 = vpop.eup %6952  ;;  %v3706_v60 = vunpack.c.h.bf16 %v3641_v18  ;;  %v4358_v8 = vmul.bf16 %v4295_v12, %v9783_v10  ;;  %v2989_v34 = vadd.f32 %v2988_v37, %v2957_v14  ;;  %v4299_v29 = vmul.bf16 1065369472, %v6951_v1 }
 0x3b9   : > { %v6955_v53 = vpop.eup %6954  ;;  %v3025_v3 = vadd.f32 %v9860_v25, %v2956_v59  ;;  %v3737_v15 = vadd.f32 %v3736_v31, %v3705_v24  ;;  %v3773_v13 = vadd.f32 %v3772_v62, %v3704_v57  ;;  %v4359_v17 = vmul.bf16 %v4297_v35, %v9796_v49 }
 0x3ba   : > { %v6957_v7 = vpop.eup %6956  ;;  %v4391_v58 = vunpack.c.l.bf16 %v4358_v8  ;;  %v4393_v44 = vunpack.c.h.bf16 %v4358_v8  ;;  %v2990_v46 = vrot.slane %v2989_v34, 4  ;;  %v4360_v28 = vmul.bf16 %v4299_v29, %v9802_v38 }
 0x3bb   : > { %v6959_v27 = vpop.eup %6958  ;;  %v3026_v39 = vadd.f32 %v3025_v3, %v2958_v0  ;;  %v3738_v10 = vrot.slane %v3737_v15, 4  ;;  %v3774_v12 = vadd.f32 %v3773_v13, %v3706_v60  ;;  %v4265_v37 = vadd.bf16 1065369472, %v6953_v32 }
 0x3bc   : > { %v6961_v33 = vpop.eup %6960  ;;  %v4455_v14 = vadd.f32 %v4393_v44, %v4391_v58  ;;  %v2991_v51 = vadd.f32 %v2990_v46, %v2989_v34  ;;  %v4392_v59 = vunpack.c.l.bf16 %v4359_v17  ;;  %v4394_v31 = vunpack.c.h.bf16 %v4359_v17 }
 0x3bd   : > { %v6963_v18 = vpop.eup %6962  ;;  %v3027_v1 = vrot.slane %v3026_v39, 4  ;;  %v3739_v62 = vadd.f32 %v3738_v10, %v3737_v15  ;;  %v3775_v24 = vrot.slane %v3774_v12, 4  ;;  %v4395_v57 = vunpack.c.l.bf16 %v4360_v28 }
 0x3be   : > { %v6965_v25 = vpop.eup %6964  ;;  %v4397_v8 = vunpack.c.h.bf16 %v4360_v28  ;;  %v2992_v0 = vrot.slane %v2991_v51, 2  ;;  %v9935_v49 = vadd.f32 %v4394_v31, %v4392_v59  ;;  %6968 = vrcp.bf16 %v4265_v37  ;;  %v10745_v31 = vld [vmem:[#allocation11_spill] sm:$0xff] }
 0x3bf   : > { %v6967_v52 = vpop.eup %6966  ;;  %v3028_v3 = vadd.f32 %v3027_v1, %v3026_v39  ;;  %v3740_v38 = vrot.slane %v3739_v62, 2  ;;  %v3776_v35 = vadd.f32 %v3775_v24, %v3774_v12  ;;  %v4456_v60 = vadd.f32 %v4455_v14, %v4395_v57 }
 0x3c0   : > { %v4266_v29 = vadd.bf16 1065369472, %v6955_v53  ;;  %v2993_v32 = vadd.f32 %v2992_v0, %v2991_v51  ;;  %v4267_v34 = vadd.bf16 1065369472, %v6957_v7  ;;  %v4268_v58 = vadd.bf16 1065369472, %v6959_v27 }
 0x3c1   : > { %v3029_v13 = vrot.slane %v3028_v3, 2  ;;  %v3741_v44 = vadd.f32 %v3740_v38, %v3739_v62  ;;  %v3777_v46 = vrot.slane %v3776_v35, 2  ;;  %v9937_v15 = vadd.f32 %v4456_v60, %v4397_v8 }
 0x3c2   : > { %6970 = vrcp.bf16 %v4266_v29  ;;  %v2994_v17 = vrot.slane %v2993_v32, 1  ;;  %v4269_v39 = vadd.bf16 1065369472, %v6961_v33  ;;  %v4270_v37 = vadd.bf16 1065369472, %v6963_v18 }
 0x3c3   : > { %v3030_v28 = vadd.f32 %v3029_v13, %v3028_v3  ;;  %6972 = vrcp.bf16 %v4267_v34  ;;  %v3742_v10 = vrot.slane %v3741_v44, 1  ;;  %v3778_v1 = vadd.f32 %v3777_v46, %v3776_v35  ;;  %v2894_v13 = vld [vmem:[#allocation2 + $0x4] sm:$0x3] }
 0x3c4   : > { %6974 = vrcp.bf16 %v4268_v58  ;;  %v2995_v12 = vadd.f32 %v2994_v17, %v2993_v32  ;;  %v4271_v53 = vadd.bf16 1065369472, %v6965_v25  ;;  %v4272_v27 = vadd.bf16 1065369472, %v6967_v52  ;;  %v3642_v17 = vld [vmem:[#allocation2 + $0x6] sm:$0x3] }
 0x3c5   : > { %v3031_v14 = vrot.slane %v3030_v28, 1  ;;  %6976 = vrcp.bf16 %v4269_v39  ;;  %v3743_v51 = vadd.f32 %v3742_v10, %v3741_v44  ;;  %v3779_v7 = vrot.slane %v3778_v1, 1 }
 0x3c6   : > { %6978 = vrcp.bf16 %v4270_v37  ;;  %v4010_v62 = vadd.f32 %v10745_v31, %v9768_v21  ;;  %v4014_v33 = vadd.f32 %v9474_v5, %v10704_v56  ;;  %v4016_v18 = vadd.f32 %v9479_v42, %v9768_v21 }
 0x3c7   : > { %v3032_v59 = vadd.f32 %v3031_v14, %v3030_v28  ;;  %6980 = vrcp.bf16 %v4271_v53  ;;  %v3780_v24 = vadd.f32 %v3779_v7, %v3778_v1  ;;  %v4018_v25 = vadd.f32 %v9488_v50, %v10704_v56  ;;  %v10748_v50 = vld [vmem:[#allocation63_spill] sm:$0xff] }
 0x3c8   : > { %6982 = vrcp.bf16 %v4272_v27  ;;  %v10746_v8 = vmul.bf16 3216621497, %v9908_v47  ;;  %v9950_v52 = vpack.c.bf16 %v4010_v62, %v9912_v4  ;;  %v4020_v0 = vadd.f32 %v9497_v11, %v9768_v21 }
 0x3c9   : > { %v3035_v57 = vcombine.low %v2995_v12, %v3032_v59  ;;  %v6969_v3 = vpop.eup %6968  ;;  %v3783_v5 = vcombine.low %v3743_v51, %v3780_v24  ;;  %v10747_v38 = vmul.bf16 3216621497, %v9921_v43  ;;  %v9956_v35 = vpack.c.bf16 %v4018_v25, %v4014_v33 }
 0x3ca   : > { %6984 = vpow.bf16 %v10746_v8  ;;  %v4024_v42 = vadd.f32 %v9544_v55, %v10704_v56  ;;  %v4301_v29 = vmul.bf16 1065369472, %v6969_v3  ;;  %v5821_v32 = vmul.bf16 3216621497, %v9950_v52 }
 0x3cb   : > { %6986 = vpow.bf16 %v10747_v38  ;;  %v3042_v60 = vrot.slane %v3035_v57, %v10748_v50  ;;  %v9962_v4 = vpack.c.bf16 %v4020_v0, %v4016_v18  ;;  %v3790_v11 = vrot.slane %v3783_v5, %v10748_v50 }
 0x3cc   : > { %v5822_v34 = vmul.bf16 3216621497, %v9956_v35  ;;  %v9968_v58 = vadd.f32 %v9555_v22, %v9768_v21  ;;  %v4028_v44 = vadd.f32 %v9565_v19, %v10704_v56  ;;  %v4361_v28 = vmul.bf16 %v4301_v29, %v9811_v16 }
 0x3cd   : > { %v6971_v55 = vpop.eup %6970  ;;  %v3049_v46 = vrot.slane %v3042_v60, %v10748_v50  ;;  %6988 = vpow.bf16 %v5821_v32  ;;  %v5823_v39 = vmul.bf16 3216621497, %v9962_v4  ;;  %v3797_v1 = vrot.slane %v3790_v11, %v10748_v50 }
 0x3ce   : > { %v6973_v10 = vpop.eup %6972  ;;  %v4303_v37 = vmul.bf16 1065369472, %v6971_v55  ;;  %6990 = vpow.bf16 %v5822_v34  ;;  %v9976_v12 = vpack.c.bf16 %v4028_v44, %v4024_v42  ;;  %v4396_v53 = vunpack.c.l.bf16 %v4361_v28 }
 0x3cf   : > { %v6975_v22 = vpop.eup %6974  ;;  %v3051_v14 = vadd.f32 %v3049_v46, %v2894_v13  ;;  %v4398_v19 = vunpack.c.h.bf16 %v4361_v28  ;;  %v4305_v51 = vmul.bf16 1065369472, %v6973_v10  ;;  %v3799_v27 = vadd.f32 %v3797_v1, %v3642_v17 }
 0x3d0   : > { %v6977_v7 = vpop.eup %6976  ;;  %v4362_v59 = vmul.bf16 %v4303_v37, %v9814_v61  ;;  %v4307_v16 = vmul.bf16 1065369472, %v6975_v22  ;;  %6992 = vpow.bf16 %v5823_v39  ;;  %v4493_v33 = vadd.f32 %v9935_v49, %v4396_v53 }
 0x3d1   : > { %v6979_v31 = vpop.eup %6978  ;;  %3052 = vst.msk [vmem:[#allocation2 + $0x4] sm:$0x3] %vm8713_vm1, %v3051_v14  ;;  %v4363_v24 = vmul.bf16 %v4305_v51, %v9863_v26  ;;  %v4309_v18 = vmul.bf16 1065369472, %v6977_v7  ;;  %v5824_v25 = vmul.bf16 3216621497, %v9976_v12 }
 0x3d2   : > { %v6981_v57 = vpop.eup %6980  ;;  %3800 = vst.msk [vmem:[#allocation2 + $0x6] sm:$0x3] %vm8713_vm1, %v3799_v27  ;;  %v4399_v8 = vunpack.c.l.bf16 %v4362_v59  ;;  %v4401_v0 = vunpack.c.h.bf16 %v4362_v59  ;;  %v4364_v61 = vmul.bf16 %v4307_v16, %v9867_v45  ;;  %v4311_v3 = vmul.bf16 1065369472, %v6979_v31 }
 0x3d3   : > { %v6983_v5 = vpop.eup %6982  ;;  %v4494_v38 = vadd.f32 %v4493_v33, %v4398_v19  ;;  %v4400_v42 = vunpack.c.l.bf16 %v4363_v24  ;;  %v4402_v60 = vunpack.c.h.bf16 %v4363_v24  ;;  %v4365_v49 = vmul.bf16 %v4309_v18, %v9881_v54 }
 0x3d4   : > { %v4458_v26 = vadd.f32 %v9937_v15, %v4399_v8  ;;  %v4403_v32 = vunpack.c.l.bf16 %v4364_v61  ;;  %v4405_v13 = vunpack.c.h.bf16 %v4364_v61  ;;  %v4366_v11 = vmul.bf16 %v4311_v3, %v9887_v20  ;;  %v10750_v20 = vld [vmem:[#allocation39_spill] sm:$0xff]  ;;  %v10751_v61 = vld [vmem:[#allocation40_spill] sm:$0xff] }
 0x3d5   : > { %v6985_v29 = vpop.eup %6984  ;;  %v4495_v44 = vadd.f32 %v4494_v38, %v4400_v42  ;;  %v4404_v55 = vunpack.c.l.bf16 %v4365_v49  ;;  %v4406_v46 = vunpack.c.h.bf16 %v4365_v49  ;;  %v4313_v17 = vmul.bf16 1065369472, %v6981_v57 }
 0x3d6   : > { %v6987_v34 = vpop.eup %6986  ;;  %v4459_v45 = vadd.f32 %v4458_v26, %v4401_v0  ;;  %v4407_v28 = vunpack.c.l.bf16 %v4366_v11  ;;  %v4409_v39 = vunpack.c.h.bf16 %v4366_v11  ;;  %v4315_v10 = vmul.bf16 1065369472, %v6983_v5 }
 0x3d7   : > { %v4496_v1 = vadd.f32 %v4495_v44, %v4402_v60  ;;  %v4367_v37 = vmul.bf16 %v4313_v17, %v9896_v30  ;;  %v4273_v54 = vadd.bf16 1065369472, %v6985_v29  ;;  %v4274_v22 = vadd.bf16 1065369472, %v6987_v34  ;;  %v10752_v60 = vld [vmem:[#allocation16_spill] sm:$0xff]  ;;  %v10754_v34 = vld [vmem:[#allocation17_spill] sm:$0xff] }
 0x3d8   : > { %v6989_v14 = vpop.eup %6988  ;;  %v4460_v15 = vadd.f32 %v4459_v45, %v4403_v32  ;;  %v4368_v53 = vmul.bf16 %v4315_v10, %v9906_v48  ;;  %6994 = vpow.bf16 %v5824_v25  ;;  %v4030_v19 = vadd.f32 %v10750_v20, %v9768_v21  ;;  %v6317_v17 = vld [vmem:[%s10354_s5 + $0x80] sm:$0xff]   ;;  %v10755_v10 = vld [vmem:[#allocation42_spill] sm:$0xff] }
 0x3d9   : > { %v6991_v51 = vpop.eup %6990  ;;  %v4497_v7 = vadd.f32 %v4496_v1, %v4404_v55  ;;  %v4408_v27 = vunpack.c.l.bf16 %v4367_v37  ;;  %v4410_v59 = vunpack.c.h.bf16 %v4367_v37  ;;  %6996 = vrcp.bf16 %v4273_v54  ;;  %v4552_v16 = vld [vmem:[#allocation2] sm:$0xff]  ;;  %v6318_v54 = vld [vmem:[%s10354_s5 + $0xc8] sm:$0xff]  }
 0x3da   : > { %v4461_v31 = vadd.f32 %v4460_v15, %v4405_v13  ;;  %v4411_v33 = vunpack.c.l.bf16 %v4368_v53  ;;  %v4413_v24 = vunpack.c.h.bf16 %v4368_v53  ;;  %6998 = vrcp.bf16 %v4274_v22  ;;  %v10756_v15 = vld [vmem:[#allocation43_spill] sm:$0xff] }
 0x3db   : > { %v6993_v30 = vpop.eup %6992  ;;  %v4498_v18 = vadd.f32 %v4497_v7, %v4406_v46  ;;  %v4275_v57 = vadd.bf16 1065369472, %v6989_v14  ;;  %v4276_v8 = vadd.bf16 1065369472, %v6991_v51  ;;  %v9995_v48 = vpack.c.bf16 %v4030_v19, %v9968_v58  ;;  %v10753_v58 = vld [vmem:[#allocation41_spill] sm:$0xff] }
 0x3dc   : > { %v4462_v25 = vadd.f32 %v4461_v31, %v4407_v28  ;;  %v4277_v0 = vadd.bf16 1065369472, %v6993_v30  ;;  %v4034_v3 = vadd.f32 %v10751_v61, %v10704_v56  ;;  %v9999_v5 = vmul.f32 0.00390625, %v4552_v16 }
 0x3dd   : > { %v4499_v38 = vadd.f32 %v4498_v18, %v4408_v27  ;;  %7000 = vrcp.bf16 %v4275_v57  ;;  %v5825_v42 = vmul.bf16 3216621497, %v9995_v48  ;;  %v4588_v49 = vsub.s32 7, %v10752_v60 }
 0x3de   : > { %v4463_v29 = vadd.f32 %v4462_v25, %v4409_v39  ;;  %7002 = vrcp.bf16 %v4276_v8  ;;  %v4565_v26 = vrot.slane %v9999_v5, %v10706_v23  ;;  %v4036_v32 = vadd.f32 %v10753_v58, %v9768_v21 }
 0x3df   : > { %v10007_v13 = vadd.f32 %v4499_v38, %v4410_v59  ;;  %7004 = vrcp.bf16 %v4277_v0  ;;  %v4589_v11 = vrot.slane %v9999_v5, %v4588_v49  ;;  %v4561_v44 = vrot.slane %v9999_v5, %v10754_v34 }
 0x3e0   : > { %v4464_v55 = vadd.f32 %v4463_v29, %v4411_v33  ;;  %7006 = vpow.bf16 %v5825_v42  ;;  %v4609_v46 = vpack.c.bf16 %v4565_v26, %v4565_v26  ;;  %v4584_v45 = vsub.s32 6, %v10752_v60 }
 0x3e1   : > { %v4615_v28 = vpack.c.bf16 %v4589_v11, %v4589_v11  ;;  %v4608_v39 = vpack.c.bf16 %v4561_v44, %v4561_v44  ;;  %v4038_v1 = vadd.f32 %v10755_v10, %v10704_v56  ;;  %v4572_v37 = vsub.s32 3, %v10752_v60 }
 0x3e2   : > { %v4465_v22 = vadd.f32 %v4464_v55, %v4413_v24  ;;  %5291 = vmatprep.mubr.bf16.mxu0 %v4609_v46  ;;  %v4585_v14 = vrot.slane %v9999_v5, %v4584_v45  ;;  %v4040_v53 = vadd.f32 %v10756_v15, %v9768_v21  ;;  %v4044_v20 = vadd.f32 %v9635_v6, %v10704_v56  ;;  %v6319_v6 = vld [vmem:[%s10354_s5 + $0x88] sm:$0xff]   ;;  %v6323_v15 = vld [vmem:[%s10354_s5 + $0x98] sm:$0xff]  }
 0x3e3   : > { %v6995_v19 = vpop.eup %6994  ;;  %5411 = vmatprep.mubr.bf16.mxu1 %v4615_v28  ;;  %5292 = vmatmul.mubr.bf16.vlgmr.msra.gmra.mrb[160].mxu0 %v4608_v39  ;;  %v10027_v51 = vpack.c.bf16 %v4038_v1, %v4034_v3  ;;  %v4573_v7 = vrot.slane %v9999_v5, %v4572_v37  ;;  %v4046_v27 = vadd.f32 %v9639_v36, %v9768_v21  ;;  %v6320_v36 = vld [vmem:[%s10354_s5 + $0xd0] sm:$0xff]   ;;  %v4568_v42 = vsub.s32 2, %v10752_v60 }
 0x3e4   : > { %v6997_v59 = vpop.eup %6996  ;;  %v4278_v16 = vadd.bf16 1065369472, %v6995_v19  ;;  %5965 = vmatpush3.bf16.msra.mxu0 %v6317_v17  ;;  %v4614_v31 = vpack.c.bf16 %v4585_v14, %v4585_v14  ;;  %v10032_v33 = vpack.c.bf16 %v4040_v53, %v4036_v32  ;;  %v4048_v24 = vadd.f32 %v9641_v9, %v10704_v56  ;;  %v10757_v53 = vld [vmem:[#allocation45_spill] sm:$0xff] }
 0x3e5   : > { %v6999_v30 = vpop.eup %6998  ;;  %v4317_v18 = vmul.bf16 1065369472, %v6997_v59  ;;  %v5826_v57 = vmul.bf16 3216621497, %v10027_v51  ;;  %v4611_v8 = vpack.c.bf16 %v4573_v7, %v4573_v7  ;;  %5966 = vmatprep.subr.bf16.mxu0 %v6318_v54  ;;  %v4050_v25 = vadd.f32 %v9645_v2, %v9768_v21  ;;  %v6321_v2 = vld [vmem:[%s10354_s5 + $0x90] sm:$0xff]  }
 0x3e6   : > { %v4319_v0 = vmul.bf16 1065369472, %v6999_v30  ;;  %7008 = vrcp.bf16 %v4278_v16  ;;  %5412 = vmatmul.mubr.bf16.vlgmr.msra.gmra.mrb[192].mxu1 %v4614_v31  ;;  %v5827_v61 = vmul.bf16 3216621497, %v10032_v33  ;;  %v10046_v3 = vpack.c.bf16 %v4048_v24, %v4044_v20 }
 0x3e7   : > { %v4369_v9 = vmul.bf16 %v4317_v18, %v9908_v47  ;;  %7010 = vpow.bf16 %v5826_v57  ;;  %5331 = vmatprep.mubr.bf16.mxu0 %v4611_v8  ;;  %v10049_v38 = vpack.c.bf16 %v4050_v25, %v4046_v27  ;;  %v4054_v47 = vadd.f32 %v9675_v41, %v10704_v56  ;;  %v10759_v8 = vld [vmem:[#allocation12_spill] sm:$0xff]  ;;  %v10760_v25 = vld [vmem:[#allocation19_spill] sm:$0xff] }
 0x3e8   : > { %v7001_v49 = vpop.eup %7000  ;;  %v4370_v29 = vmul.bf16 %v4319_v0, %v9921_v43  ;;  %7012 = vpow.bf16 %v5827_v61  ;;  %5967 = vmatpush3.bf16.msra.mxu0 %v6319_v6  ;;  %v5828_v26 = vmul.bf16 3216621497, %v10046_v3  ;;  %v6322_v43 = vld [vmem:[%s10354_s5 + $0xd8] sm:$0xff]   ;;  %v4058_v20 = vadd.f32 %v10757_v53, %v10704_v56  ;;  %v6328_v53 = vld [vmem:[%s10354_s5 + $0xf0] sm:$0xff]  }
 0x3e9   : > { %v7003_v58 = vpop.eup %7002  ;;  %v4412_v32 = vunpack.c.l.bf16 %v4369_v9  ;;  %v4414_v11 = vunpack.c.h.bf16 %v4369_v9  ;;  %v4321_v44 = vmul.bf16 1065369472, %v7001_v49  ;;  %5968 = vmatprep.subr.bf16.mxu0 %v6320_v36  ;;  %v5829_v55 = vmul.bf16 3216621497, %v10049_v38 }
 0x3ea   : > { %v7005_v46 = vpop.eup %7004  ;;  %v4415_v17 = vunpack.c.l.bf16 %v4370_v29  ;;  %v4417_v45 = vunpack.c.h.bf16 %v4370_v29  ;;  %v4323_v28 = vmul.bf16 1065369472, %v7003_v58  ;;  %7014 = vpow.bf16 %v5828_v26  ;;  %v6326_v29 = vld [vmem:[%s10354_s5 + $0xe8] sm:$0xff]  }
 0x3eb   : > { %v7007_v39 = vpop.eup %7006  ;;  %v4501_v10 = vadd.f32 %v10007_v13, %v4412_v32  ;;  %v4371_v41 = vmul.bf16 %v4321_v44, %v9950_v52  ;;  %v4325_v1 = vmul.bf16 1065369472, %v7005_v46  ;;  %7016 = vpow.bf16 %v5829_v55  ;;  %v6324_v52 = vld [vmem:[%s10354_s5 + $0xe0] sm:$0xff]  }
 0x3ec   : > { %v4466_v37 = vadd.f32 %v4465_v22, %v4415_v17  ;;  %v4372_v54 = vmul.bf16 %v4323_v28, %v9956_v35  ;;  %v4279_v14 = vadd.bf16 1065369472, %v7007_v39  ;;  %5969 = vmatpush3.bf16.msra.mxu0 %v6321_v2  ;;  %v10758_v35 = vld [vmem:[#allocation44_spill] sm:$0xff]  ;;  %v10077_v30 = vpack.c.bf16 %v4058_v20, %v4054_v47 }
 0x3ed   : > { %v4502_v19 = vadd.f32 %v4501_v10, %v4414_v11  ;;  %v4416_v7 = vunpack.c.l.bf16 %v4371_v41  ;;  %v4373_v13 = vmul.bf16 %v4325_v1, %v9962_v4  ;;  %5970 = vmatprep.subr.bf16.mxu0 %v6322_v43  ;;  %v4056_v22 = vadd.f32 %v10758_v35, %v9768_v21  ;;  %v6325_v4 = vld [vmem:[%s10354_s5 + $0xa0] sm:$0xff]   ;;  %v10763_v43 = vld [vmem:[#allocation6_spill] sm:$0xff] }
 0x3ee   : > { %v4467_v27 = vadd.f32 %v4466_v37, %v4417_v45  ;;  %v4418_v59 = vunpack.c.h.bf16 %v4371_v41  ;;  %v4419_v16 = vunpack.c.l.bf16 %v4372_v54  ;;  %7018 = vrcp.bf16 %v4279_v14  ;;  %v10761_v2 = vld [vmem:[#allocation20_spill] sm:$0xff]  ;;  %v6327_v37 = vld [vmem:[%s10354_s5 + $0xa8] sm:$0xff]  }
 0x3ef   : > { %v4503_v31 = vadd.f32 %v4502_v19, %v4416_v7  ;;  %v4421_v6 = vunpack.c.h.bf16 %v4372_v54  ;;  %v4420_v24 = vunpack.c.l.bf16 %v4373_v13  ;;  %v4422_v57 = vunpack.c.h.bf16 %v4373_v13  ;;  %v10762_v47 = vld [vmem:[#allocation24_spill] sm:$0xff] }
 0x3f0   : > { %v4468_v18 = vadd.f32 %v4467_v27, %v4419_v16  ;;  %5971 = vmatpush3.bf16.msra.mxu0 %v6323_v15  ;;  %v4060_v36 = vadd.f32 %v10759_v8, %v9768_v21  ;;  %v4064_v0 = vadd.f32 %v10760_v25, %v10704_v56  ;;  %v5830_v49 = vmul.bf16 3216621497, %v10077_v30 }
 0x3f1   : > { %v7009_v61 = vpop.eup %7008  ;;  %v4504_v9 = vadd.f32 %v4503_v31, %v4418_v59  ;;  %5972 = vmatprep.subr.bf16.mxu0 %v6324_v52  ;;  %v4068_v26 = vadd.f32 %v10761_v2, %v10704_v56  ;;  %v4070_v58 = vadd.f32 %v10762_v47, %v9768_v21  ;;  %v4066_v46 = vadd.f32 %v10763_v43, %v9768_v21  ;;  %v6331_v2 = vld [vmem:[%s10354_s5 + $0xb8] sm:$0xff]   ;;  %v6332_v43 = vld [vmem:[%s10354_s5 + $0x140] sm:$0xff]  }
 0x3f2   : > { %v7011_v32 = vpop.eup %7010  ;;  %v4469_v11 = vadd.f32 %v4468_v18, %v4421_v6  ;;  %v4327_v44 = vmul.bf16 1065369472, %v7009_v61  ;;  %v10094_v55 = vpack.c.bf16 %v4060_v36, %v4056_v22  ;;  %7020 = vpow.bf16 %v5830_v49  ;;  %v6330_v6 = vld [vmem:[%s10354_s5 + $0xf8] sm:$0xff]   ;;  %v10764_v18 = vld [vmem:[#allocation25_spill] sm:$0xff] }
 0x3f3   : > { %v7013_v17 = vpop.eup %7012  ;;  %v4505_v45 = vadd.f32 %v4504_v9, %v4420_v24  ;;  %v4280_v28 = vadd.bf16 1065369472, %v7011_v32  ;;  %v10098_v39 = vpack.c.bf16 %v4068_v26, %v4064_v0  ;;  %v10105_v54 = vpack.c.bf16 %v4070_v58, %v4066_v46  ;;  %v10766_v0 = vld [vmem:[#allocation67_spill] sm:$0xff]  ;;  %v10768_v58 = vld [vmem:[#allocation68_spill] sm:$0xff] }
 0x3f4   : > { %v4374_v10 = vmul.bf16 %v4327_v44, %v9976_v12  ;;  %v4281_v41 = vadd.bf16 1065369472, %v7013_v17  ;;  %5973 = vmatpush3.bf16.msra.mxu0 %v6325_v4  ;;  %v5831_v1 = vmul.bf16 3216621497, %v10094_v55  ;;  %v4074_v12 = vadd.f32 %v9742_v63, %v10704_v56  ;;  %v6329_v63 = vld [vmem:[%s10354_s5 + $0xb0] sm:$0xff]  }
 0x3f5   : > { %v7015_v14 = vpop.eup %7014  ;;  %v4506_v15 = vadd.f32 %v4505_v45, %v4422_v57  ;;  %7022 = vrcp.bf16 %v4280_v28  ;;  %5974 = vmatprep.subr.bf16.mxu0 %v6326_v29  ;;  %v10115_v20 = vrot.slane %v9999_v5, %v4568_v42  ;;  %v5832_v52 = vmul.bf16 3216621497, %v10098_v39  ;;  %v10765_v4 = vld [vmem:[#allocation26_spill] sm:$0xff]  ;;  %v10767_v26 = vld [vmem:[#allocation27_spill] sm:$0xff] }
 0x3f6   : > { %v7017_v19 = vpop.eup %7016  ;;  %v4423_v7 = vunpack.c.l.bf16 %v4374_v10  ;;  %7024 = vrcp.bf16 %v4281_v41  ;;  %v4282_v13 = vadd.bf16 1065369472, %v7015_v14  ;;  %v4425_v35 = vunpack.c.h.bf16 %v4374_v10  ;;  %v10770_v17 = vld [vmem:[#allocation70_spill] sm:$0xff]  ;;  %v10771_v28 = vld [vmem:[#allocation71_spill] sm:$0xff] }
 0x3f7   : > { %v4283_v22 = vadd.bf16 1065369472, %v7017_v19  ;;  %7026 = vpow.bf16 %v5831_v1  ;;  %v5833_v27 = vmul.bf16 3216621497, %v10105_v54  ;;  %v4610_v42 = vpack.c.bf16 %v10115_v20, %v10115_v20  ;;  %v10772_v20 = vld [vmem:[#allocation72_spill] sm:$0xff] }
 0x3f8   : > { %v4470_v59 = vadd.f32 %v4469_v11, %v4423_v7  ;;  %7028 = vrcp.bf16 %v4282_v13  ;;  %5975 = vmatpush3.bf16.msra.mxu0 %v6327_v37  ;;  %v4580_v16 = vsub.s32 5, %v10752_v60  ;;  %v4076_v24 = vadd.f32 %v9821_v40, %v9768_v21  ;;  %v10769_v11 = vld [vmem:[#allocation69_spill] sm:$0xff]  ;;  %v10773_v7 = vld [vmem:[#allocation28_spill] sm:$0xff] }
 0x3f9   : > { %v7019_v31 = vpop.eup %7018  ;;  %7030 = vrcp.bf16 %v4283_v22  ;;  %5976 = vmatprep.subr.bf16.mxu0 %v6328_v53  ;;  %v4078_v57 = vadd.f32 %v10764_v18, %v10704_v56  ;;  %v4080_v8 = vadd.f32 %v10765_v4, %v9768_v21  ;;  %v4084_v61 = vadd.f32 %v10766_v0, %v10704_v56  ;;  %v6333_v22 = vld [vmem:[%s10354_s5 + $0x100] sm:$0xff]  }
 0x3fa   : > { %v10134_v36 = vadd.f32 %v4470_v59, %v4425_v35  ;;  %v4329_v25 = vmul.bf16 1065369472, %v7019_v31  ;;  %7032 = vpow.bf16 %v5832_v52  ;;  %v4581_v9 = vrot.slane %v9999_v5, %v4580_v16 }
 0x3fb   : > { %7034 = vpow.bf16 %v5833_v27  ;;  %v10139_v49 = vpack.c.bf16 %v4078_v57, %v4074_v12  ;;  %v10141_v29 = vpack.c.bf16 %v4080_v8, %v4076_v24  ;;  %v4086_v47 = vadd.f32 %v10767_v26, %v9768_v21 }
 0x3fc   : > { %v4375_v40 = vmul.bf16 %v4329_v25, %v9995_v48  ;;  %5977 = vmatpush3.bf16.msra.mxu0 %v6329_v63  ;;  %v4088_v32 = vadd.f32 %v10768_v58, %v10704_v56  ;;  %v4090_v44 = vadd.f32 %v10769_v11, %v9768_v21  ;;  %v4094_v45 = vadd.f32 %v10770_v17, %v10704_v56 }
 0x3fd   : > { %5978 = vmatprep.subr.bf16.mxu0 %v6330_v6  ;;  %v5834_v48 = vmul.bf16 3216621497, %v10139_v49  ;;  %v5835_v46 = vmul.bf16 3216621497, %v10141_v29  ;;  %v4096_v10 = vadd.f32 %v10771_v28, %v9768_v21  ;;  %v7021_v41 = vpop.eup %7020  ;;  %v4098_v19 = vadd.f32 %v10772_v20, %v10704_v56  ;;  %v6334_v56 = vld [vmem:[%s10354_s5 + $0x148] sm:$0xff]  }
 0x3fe   : > { %v4424_v1 = vunpack.c.l.bf16 %v4375_v40  ;;  %v4426_v37 = vunpack.c.h.bf16 %v4375_v40  ;;  %v10162_v14 = vpack.c.bf16 %v4088_v32, %v4084_v61  ;;  %v10164_v53 = vpack.c.bf16 %v4090_v44, %v4086_v47 }
 0x3ff   : > { %v4284_v12 = vadd.bf16 1065369472, %v7021_v41  ;;  %7036 = vpow.bf16 %v5834_v48  ;;  %v4100_v13 = vadd.f32 %v10773_v7, %v9768_v21  ;;  %v10178_v21 = vpack.c.bf16 %v4098_v19, %v4094_v45 }
 0x400   : > { %v7023_v52 = vpop.eup %7022  ;;  %v4507_v35 = vadd.f32 %v4506_v15, %v4424_v1  ;;  %5979 = vmatpush3.bf16.msra.mxu0 %v6331_v2  ;;  %7038 = vpow.bf16 %v5835_v46  ;;  %v5836_v27 = vmul.bf16 3216621497, %v10162_v14  ;;  %v5837_v59 = vmul.bf16 3216621497, %v10164_v53  ;;  %v6335_v2 = vld [vmem:[%s10354_s5 + $0x108] sm:$0xff]  }
 0x401   : > { %v7025_v63 = vpop.eup %7024  ;;  %v4331_v16 = vmul.bf16 1065369472, %v7023_v52  ;;  %7040 = vrcp.bf16 %v4284_v12  ;;  %5986 = vmatprep.subr.bf16.mxu0 %v6332_v43  ;;  %v10180_v15 = vpack.c.bf16 %v4100_v13, %v4096_v10  ;;  %v4613_v18 = vpack.c.bf16 %v4581_v9, %v4581_v9  ;;  %v6337_v10 = vld [vmem:[%s10354_s5 + $0x110] sm:$0xff]  }
 0x402   : > { %v7027_v31 = vpop.eup %7026  ;;  %v4508_v6 = vadd.f32 %v4507_v35, %v4426_v37  ;;  %v4333_v24 = vmul.bf16 1065369472, %v7025_v63  ;;  %7042 = vpow.bf16 %v5836_v27  ;;  %v5838_v25 = vmul.bf16 3216621497, %v10178_v21 }
 0x403   : > { %v7029_v57 = vpop.eup %7028  ;;  %v4376_v4 = vmul.bf16 %v4331_v16, %v10027_v51  ;;  %v4285_v8 = vadd.bf16 1065369472, %v7027_v31  ;;  %5332 = vmatmul.mubr.bf16.vlgmr.msra.gmra.mrb[164].mxu0 %v4610_v42  ;;  %7044 = vpow.bf16 %v5837_v59  ;;  %v6336_v51 = vld [vmem:[%s10354_s5 + $0x150] sm:$0xff]   ;;  %v5839_v42 = vmul.bf16 3216621497, %v10180_v15  ;;  %v6340_v16 = vld [vmem:[%s10354_s5 + $0x160] sm:$0xff]  }
 0x404   : > { %v7031_v0 = vpop.eup %7030  ;;  %v4377_v61 = vmul.bf16 %v4333_v24, %v10032_v33  ;;  %v4335_v40 = vmul.bf16 1065369472, %v7029_v57  ;;  %5987 = vmatpush3.bf16.msra.mxu0 %v6333_v22  ;;  %5371 = vmatprep.mubr.bf16.mxu0 %v4613_v18  ;;  %v6339_v22 = vld [vmem:[%s10354_s5 + $0x118] sm:$0xff]  }
 0x405   : > { %v7033_v9 = vpop.eup %7032  ;;  %v4427_v26 = vunpack.c.l.bf16 %v4376_v4  ;;  %v4337_v47 = vmul.bf16 1065369472, %v7031_v0  ;;  %7046 = vrcp.bf16 %v4285_v8  ;;  %5988 = vmatprep.subr.bf16.mxu0 %v6334_v56  ;;  %v4429_v33 = vunpack.c.h.bf16 %v4376_v4  ;;  %v6341_v4 = vld [vmem:[%s10354_s5 + $0x120] sm:$0xff]   ;;  %v6342_v0 = vld [vmem:[%s10354_s5 + $0x168] sm:$0xff]  }
 0x406   : > { %v7035_v58 = vpop.eup %7034  ;;  %v4428_v32 = vunpack.c.l.bf16 %v4377_v61  ;;  %v4378_v11 = vmul.bf16 %v4335_v40, %v10046_v3  ;;  %v4286_v44 = vadd.bf16 1065369472, %v7033_v9  ;;  %7048 = vpow.bf16 %v5838_v25  ;;  %v6338_v3 = vld [vmem:[%s10354_s5 + $0x158] sm:$0xff]  }
 0x407   : > { %v4472_v43 = vadd.f32 %v10134_v36, %v4427_v26  ;;  %v4379_v48 = vmul.bf16 %v4337_v47, %v10049_v38  ;;  %v4287_v46 = vadd.bf16 1065369472, %v7035_v58  ;;  %v4430_v17 = vunpack.c.h.bf16 %v4377_v61 }
 0x408   : > { %v4509_v45 = vadd.f32 %v4508_v6, %v4428_v32  ;;  %v4431_v28 = vunpack.c.l.bf16 %v4378_v11  ;;  %7050 = vrcp.bf16 %v4286_v44  ;;  %5989 = vmatpush3.bf16.msra.mxu0 %v6335_v2  ;;  %v4433_v12 = vunpack.c.h.bf16 %v4378_v11  ;;  %v6344_v44 = vld [vmem:[%s10354_s5 + $0x170] sm:$0xff]  }
 0x409   : > { %v4473_v41 = vadd.f32 %v4472_v43, %v4429_v33  ;;  %v4432_v1 = vunpack.c.l.bf16 %v4379_v48  ;;  %7052 = vrcp.bf16 %v4287_v46  ;;  %5990 = vmatprep.subr.bf16.mxu0 %v6336_v51  ;;  %v4434_v13 = vunpack.c.h.bf16 %v4379_v48 }
 0x40a   : > { %v7037_v38 = vpop.eup %7036  ;;  %v4510_v36 = vadd.f32 %v4509_v45, %v4430_v17  ;;  %7054 = vpow.bf16 %v5839_v42  ;;  %v6343_v42 = vld [vmem:[%s10354_s5 + $0x128] sm:$0xff]  }
 0x40b   : > { %v7039_v37 = vpop.eup %7038  ;;  %v4474_v20 = vadd.f32 %v4473_v41, %v4431_v28  ;;  %v4288_v19 = vadd.bf16 1065369472, %v7037_v38 }
 0x40c   : > { %v7041_v7 = vpop.eup %7040  ;;  %v4511_v52 = vadd.f32 %v4510_v36, %v4432_v1  ;;  %v4289_v35 = vadd.bf16 1065369472, %v7039_v37  ;;  %5991 = vmatpush3.bf16.msra.mxu0 %v6337_v10  ;;  %v6345_v10 = vld [vmem:[%s10354_s5 + $0x130] sm:$0xff]   ;;  %v4576_v36 = vsub.s32 4, %v10752_v60 }
 0x40d   : > { %v7043_v27 = vpop.eup %7042  ;;  %v4475_v59 = vadd.f32 %v4474_v20, %v4433_v12  ;;  %v4339_v63 = vmul.bf16 1065369472, %v7041_v7  ;;  %7056 = vrcp.bf16 %v4288_v19  ;;  %5992 = vmatprep.subr.bf16.mxu0 %v6338_v3 }
 0x40e   : > { %v7045_v56 = vpop.eup %7044  ;;  %v4512_v31 = vadd.f32 %v4511_v52, %v4434_v13  ;;  %7058 = vrcp.bf16 %v4289_v35  ;;  %v4290_v6 = vadd.bf16 1065369472, %v7043_v27 }
 0x40f   : > { %v4380_v24 = vmul.bf16 %v4339_v63, %v10077_v30  ;;  %v4291_v18 = vadd.bf16 1065369472, %v7045_v56  ;;  %v4577_v56 = vrot.slane %v9999_v5, %v4576_v36 }
 0x410   : > { %v7047_v57 = vpop.eup %7046  ;;  %7060 = vrcp.bf16 %v4290_v6  ;;  %5993 = vmatpush3.bf16.msra.mxu0 %v6339_v22 }
 0x411   : > { %v4435_v8 = vunpack.c.l.bf16 %v4380_v24  ;;  %v4341_v25 = vmul.bf16 1065369472, %v7047_v57  ;;  %7062 = vrcp.bf16 %v4291_v18  ;;  %5994 = vmatprep.subr.bf16.mxu0 %v6340_v16  ;;  %v7049_v61 = vpop.eup %7048  ;;  %v4437_v2 = vunpack.c.h.bf16 %v4380_v24 }
 0x412   : > { %v4292_v26 = vadd.bf16 1065369472, %v7049_v61 }
 0x413   : > { %v7051_v40 = vpop.eup %7050  ;;  %v4476_v30 = vadd.f32 %v4475_v59, %v4435_v8  ;;  %v4381_v9 = vmul.bf16 %v4341_v25, %v10094_v55  ;;  %v6347_v59 = vld [vmem:[%s10354_s5 + $0x138] sm:$0xff]   ;;  %v6349_v25 = vld [vmem:[%s10354_s5 + $0x200] sm:$0xff]  }
 0x414   : > { %v7053_v47 = vpop.eup %7052  ;;  %v4343_v51 = vmul.bf16 1065369472, %v7051_v40  ;;  %5995 = vmatpush3.bf16.msra.mxu0 %v6341_v4  ;;  %7064 = vrcp.bf16 %v4292_v26  ;;  %v4612_v40 = vpack.c.bf16 %v4577_v56, %v4577_v56 }
 0x415   : > { %v7055_v58 = vpop.eup %7054  ;;  %v4477_v33 = vadd.f32 %v4476_v30, %v4437_v2  ;;  %v4436_v32 = vunpack.c.l.bf16 %v4381_v9  ;;  %v4345_v11 = vmul.bf16 1065369472, %v7053_v47  ;;  %5996 = vmatprep.subr.bf16.mxu0 %v6342_v0  ;;  %v4438_v48 = vunpack.c.h.bf16 %v4381_v9 }
 0x416   : > { %v4382_v43 = vmul.bf16 %v4343_v51, %v10098_v39  ;;  %v4293_v55 = vadd.bf16 1065369472, %v7055_v58  ;;  %v6346_v39 = vld [vmem:[%s10354_s5 + $0x178] sm:$0xff]  }
 0x417   : > { %v4513_v46 = vadd.f32 %v4512_v31, %v4436_v32  ;;  %v4383_v17 = vmul.bf16 %v4345_v11, %v10105_v54  ;;  %v6352_v11 = vld [vmem:[%s10354_s5 + $0x250] sm:$0xff]  }
 0x418   : > { %v7057_v45 = vpop.eup %7056  ;;  %v4439_v28 = vunpack.c.l.bf16 %v4382_v43  ;;  %7066 = vrcp.bf16 %v4293_v55  ;;  %5997 = vmatpush3.bf16.msra.mxu0 %v6343_v42  ;;  %v4441_v54 = vunpack.c.h.bf16 %v4382_v43 }
 0x419   : > { %v7059_v41 = vpop.eup %7058  ;;  %v4514_v1 = vadd.f32 %v4513_v46, %v4438_v48  ;;  %v4440_v3 = vunpack.c.l.bf16 %v4383_v17  ;;  %v4347_v38 = vmul.bf16 1065369472, %v7057_v45  ;;  %5998 = vmatprep.subr.bf16.mxu0 %v6344_v44  ;;  %v4442_v19 = vunpack.c.h.bf16 %v4383_v17  ;;  %v6354_v45 = vld [vmem:[%s10354_s5 + $0x258] sm:$0xff]  }
 0x41a   : > { %v4478_v37 = vadd.f32 %v4477_v33, %v4439_v28  ;;  %v4349_v12 = vmul.bf16 1065369472, %v7059_v41  ;;  %v6351_v33 = vld [vmem:[%s10354_s5 + $0x208] sm:$0xff]  }
 0x41b   : > { %v7061_v20 = vpop.eup %7060  ;;  %v4515_v7 = vadd.f32 %v4514_v1, %v4440_v3  ;;  %v4384_v13 = vmul.bf16 %v4347_v38, %v10139_v49  ;;  %v6348_v49 = vld [vmem:[%s10354_s5 + $0x240] sm:$0xff]  }
 0x41c   : > { %v7063_v52 = vpop.eup %7062  ;;  %v4479_v35 = vadd.f32 %v4478_v37, %v4441_v54  ;;  %v4385_v22 = vmul.bf16 %v4349_v12, %v10141_v29  ;;  %v4351_v27 = vmul.bf16 1065369472, %v7061_v20  ;;  %5999 = vmatpush3.bf16.msra.mxu0 %v6345_v10  ;;  %v6356_v38 = vld [vmem:[%s10354_s5 + $0x260] sm:$0xff]   ;;  %v6358_v20 = vld [vmem:[%s10354_s5 + $0x268] sm:$0xff]  }
 0x41d   : > { %v4516_v63 = vadd.f32 %v4515_v7, %v4442_v19  ;;  %v4443_v60 = vunpack.c.l.bf16 %v4384_v13  ;;  %v4353_v16 = vmul.bf16 1065369472, %v7063_v52  ;;  %6000 = vmatprep.subr.bf16.mxu0 %v6346_v39  ;;  %v4445_v29 = vunpack.c.h.bf16 %v4384_v13  ;;  %v6357_v12 = vld [vmem:[%s10354_s5 + $0x220] sm:$0xff]  }
 0x41e   : > { %v4444_v31 = vunpack.c.l.bf16 %v4385_v22  ;;  %v4386_v6 = vmul.bf16 %v4351_v27, %v10162_v14  ;;  %v4446_v57 = vunpack.c.h.bf16 %v4385_v22  ;;  %v6350_v14 = vld [vmem:[%s10354_s5 + $0x248] sm:$0xff]   ;;  %v6360_v22 = vld [vmem:[%s10354_s5 + $0x270] sm:$0xff]  }
 0x41f   : > { %v4480_v24 = vadd.f32 %v4479_v35, %v4443_v60  ;;  %v4387_v18 = vmul.bf16 %v4353_v16, %v10164_v53  ;;  %v7065_v5 = vpop.eup %7064  ;;  %v6359_v35 = vld [vmem:[%s10354_s5 + $0x228] sm:$0xff]   ;;  %v6361_v60 = vld [vmem:[%s10354_s5 + $0x230] sm:$0xff]   ;;  %v6362_v16 = vld [vmem:[%s10354_s5 + $0x278] sm:$0xff]  }
 0x420   : > { %v4517_v4 = vadd.f32 %v4516_v63, %v4444_v31  ;;  %v4447_v8 = vunpack.c.l.bf16 %v4386_v6  ;;  %6001 = vmatpush3.bf16.msra.mxu0 %v6347_v59  ;;  %v4355_v30 = vmul.bf16 1065369472, %v7065_v5  ;;  %v4449_v9 = vunpack.c.h.bf16 %v4386_v6  ;;  %v6363_v31 = vld [vmem:[%s10354_s5 + $0x238] sm:$0xff]   ;;  %v4390_v6 = vld [vmem:[#allocation2 + $0x8] sm:$0x3] }
 0x421   : > { %v4481_v0 = vadd.f32 %v4480_v24, %v4445_v29  ;;  %v4448_v61 = vunpack.c.l.bf16 %v4387_v18  ;;  %6030 = vmatprep.subr.bf16.mxu0 %v6348_v49  ;;  %v4450_v47 = vunpack.c.h.bf16 %v4387_v18 }
 0x422   : > { %v4518_v2 = vadd.f32 %v4517_v4, %v4446_v57  ;;  %v4388_v42 = vmul.bf16 %v4355_v30, %v10178_v21  ;;  %v6353_v21 = vld [vmem:[%s10354_s5 + $0x210] sm:$0xff]  }
 0x423   : > { %v7067_v53 = vpop.eup %7066  ;;  %v4482_v26 = vadd.f32 %v4481_v0, %v4447_v8  ;;  %5372 = vmatmul.mubr.bf16.vlgmr.msra.gmra.mrb[168].mxu0 %v4612_v40 }
 0x424   : > { %v4519_v51 = vadd.f32 %v4518_v2, %v4448_v61  ;;  %v4357_v58 = vmul.bf16 1065369472, %v7067_v53  ;;  %6031 = vmatpush3.bf16.msra.mxu0 %v6349_v25  ;;  %v4451_v43 = vunpack.c.l.bf16 %v4388_v42  ;;  %v4453_v48 = vunpack.c.h.bf16 %v4388_v42 }
 0x425   : > { %v4483_v32 = vadd.f32 %v4482_v26, %v4449_v9  ;;  %6032 = vmatprep.subr.bf16.mxu0 %v6350_v14 }
 0x426   : > { %v4520_v44 = vadd.f32 %v4519_v51, %v4450_v47  ;;  %v4389_v55 = vmul.bf16 %v4357_v58, %v10180_v15  ;;  %v6355_v15 = vld [vmem:[%s10354_s5 + $0x218] sm:$0xff]  }
 0x427   : > { %v4484_v46 = vadd.f32 %v4483_v32, %v4451_v43 }
 0x428   : > { %v4452_v17 = vunpack.c.l.bf16 %v4389_v55  ;;  %6033 = vmatpush3.bf16.msra.mxu0 %v6351_v33  ;;  %v4454_v10 = vunpack.c.h.bf16 %v4389_v55 }
 0x429   : > { %6034 = vmatprep.subr.bf16.mxu0 %v6352_v11  ;;  %v4485_v28 = vadd.f32 %v4484_v46, %v4453_v48 }
 0x42a   : > { %v4521_v41 = vadd.f32 %v4520_v44, %v4452_v17 }
 0x42b   : > { %v4486_v1 = vrot.slane %v4485_v28, 4 }
 0x42c   : > { %v4522_v3 = vadd.f32 %v4521_v41, %v4454_v10  ;;  %6035 = vmatpush3.bf16.msra.mxu0 %v6353_v21 }
 0x42d   : > { %6036 = vmatprep.subr.bf16.mxu0 %v6354_v45  ;;  %v4487_v39 = vadd.f32 %v4486_v1, %v4485_v28 }
 0x42e   : > { %v4523_v36 = vrot.slane %v4522_v3, 4 }
 0x42f   : > { %v4488_v54 = vrot.slane %v4487_v39, 2 }
 0x430   : > { %v4524_v37 = vadd.f32 %v4523_v36, %v4522_v3  ;;  %6037 = vmatpush3.bf16.msra.mxu0 %v6355_v15 }
 0x431   : > { %6038 = vmatprep.subr.bf16.mxu0 %v6356_v38  ;;  %v4489_v19 = vadd.f32 %v4488_v54, %v4487_v39 }
 0x432   : > { %v4525_v7 = vrot.slane %v4524_v37, 2 }
 0x433   : > { %v4490_v13 = vrot.slane %v4489_v19, 1 }
 0x434   : > { %v4526_v52 = vadd.f32 %v4525_v7, %v4524_v37  ;;  %6039 = vmatpush3.bf16.msra.mxu0 %v6357_v12 }
 0x435   : > { %6040 = vmatprep.subr.bf16.mxu0 %v6358_v20  ;;  %v4491_v27 = vadd.f32 %v4490_v13, %v4489_v19 }
 0x436   : > { %v4527_v59 = vrot.slane %v4526_v52, 1 }
 0x438   : > { %v4528_v63 = vadd.f32 %v4527_v59, %v4526_v52  ;;  %6041 = vmatpush3.bf16.msra.mxu0 %v6359_v35 }
 0x439   : > { %6042 = vmatprep.subr.bf16.mxu0 %v6360_v22 }
 0x43a   : > { %v4531_v56 = vcombine.low %v4491_v27, %v4528_v63 }
 0x43c   : > { %v4538_v49 = vrot.slane %v4531_v56, %v10748_v50  ;;  %6043 = vmatpush3.bf16.msra.mxu0 %v6361_v60 }
 0x43d   : > { %6044 = vmatprep.subr.bf16.mxu0 %v6362_v16 }
 0x43e   : > { %v4545_v29 = vrot.slane %v4538_v49, %v10748_v50 }
 0x440   : > { %v4547_v24 = vadd.f32 %v4545_v29, %v4390_v6  ;;  %6045 = vmatpush3.bf16.msra.mxu0 %v6363_v31 }
 0x442   : > { %4548 = vst.msk [vmem:[#allocation2 + $0x8] sm:$0x3] %vm8713_vm1, %v4547_v24 }
 0x449   : > { %v4553_v18 = vld [vmem:[#allocation2 + $0x8] sm:$0x3] }
 0x44a   : > { %v4555_v57 = vmul.f32 0.00390625, %v4553_v18 }
 0x44c   : > { %v4597_v4 = vrot.slane %v4555_v57, %v10706_v23  ;;  %v4593_v8 = vrot.slane %v4555_v57, %v10754_v34  ;;  %v4778_v23 = vld [vmem:[%s10355_s6] sm:$0x1] }
 0x44e   : > { %v4617_v25 = vpack.c.bf16 %v4597_v4, %v4597_v4  ;;  %v4616_v5 = vpack.c.bf16 %v4593_v8, %v4593_v8 }
 0x450   : > { %5451 = vmatprep.mubr.bf16.mxu0 %v4617_v25 }
 0x451   : > { %5452 = vmatmul.mubr.bf16.vlgmr.msra.gmra.mrb[172].mxu0 %v4616_v5 }
 0x4b6   : > { %v5958_v0 = vpop.f32.mrb[160].mxu0 }
 0x4b7   : > { %v5959_v61 = vpop.f32.mrb[161].mxu0 }
 0x4b8   : > { %v5960_v40 = vadd.f32 %v5959_v61, %v5958_v0  ;;  %v5961_v14 = vpop.f32.mrb[162].mxu0 }
 0x4b9   : > { %v6024_v50 = vpop.f32.mrb[192].mxu1  ;;  %v5962_v2 = vpop.f32.mrb[163].mxu0 }
 0x4ba   : > { %v6025_v30 = vpop.f32.mrb[193].mxu1  ;;  %v5294_v47 = vadd.f32 %v5960_v40, %v4778_v23 }
 0x4bb   : > { %v6026_v53 = vadd.f32 %v6025_v30, %v6024_v50  ;;  %v6027_v62 = vpop.f32.mrb[194].mxu1 }
 0x4bc   : > { %v6028_v9 = vpop.f32.mrb[195].mxu1 }
 0x4d6   : > { %v5980_v34 = vpop.f32.mrb[164].mxu0 }
 0x4d7   : > { %v5981_v26 = vpop.f32.mrb[165].mxu0 }
 0x4d8   : > { %v5982_v51 = vadd.f32 %v5981_v26, %v5980_v34  ;;  %v5983_v42 = vpop.f32.mrb[166].mxu0 }
 0x4d9   : > { %v5984_v58 = vpop.f32.mrb[167].mxu0 }
 0x4da   : > { %v5334_v33 = vadd.f32 %v5982_v51, %v5294_v47 }
 0x4f6   : > { %v6002_v32 = vpop.f32.mrb[168].mxu0 }
 0x4f7   : > { %v6003_v11 = vpop.f32.mrb[169].mxu0 }
 0x4f8   : > { %v6004_v44 = vadd.f32 %v6003_v11, %v6002_v32  ;;  %v6005_v43 = vpop.f32.mrb[170].mxu0 }
 0x4f9   : > { %v6006_v55 = vpop.f32.mrb[171].mxu0 }
 0x4fa   : > { %v5374_v48 = vadd.f32 %v6004_v44, %v5334_v33 }
 0x4fc   : > { %v5414_v46 = vadd.f32 %v6026_v53, %v5374_v48 }
 0x524   : > { %v6046_v17 = vpop.f32.mrb[172].mxu0 }
 0x525   : > { %v6047_v21 = vpop.f32.mrb[173].mxu0 }
 0x526   : > { %v6048_v45 = vadd.f32 %v6047_v21, %v6046_v17  ;;  %v6049_v28 = vpop.f32.mrb[174].mxu0 }
 0x527   : > { %v6050_v10 = vpop.f32.mrb[175].mxu0 }
 0x528   : > { %v5454_v41 = vadd.f32 %v6048_v45, %v5414_v46 }
 0x52a   : > { %5459 = vst [vmem:[%s293_s30] sm:$0x1] %v5454_v41 }
 0x52b   : > { %7082 = shalt.err (!%p7079_p5)
}
 0x52c   : > { %s7083_s20 = scalar_lea.hbm %s10302_s15, 16  ;;  %s7087_s23 = scalar_lea.hbm %s10356_s7, 32 }
 0x52d   : > { %p7084_p6 = scmp.ne.s32.totalorder %s10302_s15, %s7083_s20  ;;  %p7088_p10 = scmp.lt.u32.totalorder %s10302_s15, %s10356_s7 }
 0x52e   : > { %p7089_p11 = scmp.lt.u32.totalorder %s7087_s23, %s7083_s20  ;;  %p7091_p13 = scmp.lt.u32.totalorder %s7083_s20, %s10302_s15 }
 0x52f   : > { %p7085_p7 = pnand %p7084_p6, %p7233_p4 }
 0x530   : > { %p7090_p12 = por %p7089_p11, %p7088_p10 }
 0x531   : > { %p7086_p9 = pneg %p7085_p7 }
 0x532   : > { %p7092_p0 = por %p7091_p13, %p7090_p12 }
 0x534   : > { %p7093_p1 = pnand %p7092_p0, %p7086_p9 }
 0x536   : > { %7096 = shalt.err (!%p7093_p1)
}
 0x537   : > { %6088 = dma.vmem_to_hbm [thread:$0]  (%p7233_p4), %s10304_s8, 16, %s10302_s15, %s5461_s16  }
 0x538 PF: > { %p6094_p2 = scmp.ge.s32.totalorder %s7147_s29, 2  ;;  %s5485_s12 = sand.u32 1, %s7127_s24  }
 0x539   : > { %s5486_s17 = scalar_lea.sflag [#allocation4], %s5485_s12 }
 0x53a   : > { %p6091_p3 = pnand %p6094_p2, %p7240_p8 }
 0x53c   : > { %7122 = dma.done.wait (!%p6091_p3), %s5486_s17, 16  }
 0x53d   : > { %7124 = vsyncadd (!%p6091_p3), %s5486_s17, 4294967280  ;;  %s20_s29 = sadd.s32 1, %s7147_s29   ;;  %s10774_s24 = smov %s7131_s25 }
 0x53e   : > { %p17_p5 = scmp.ge.s32.totalorder %s20_s29, 4   ;;  %s10775_s25 = smov %s7135_s26 }
 0x53f   : > { %s10776_s26 = smov %s7246_s14  ;;  %s10777_s27 = smov %s7143_s28 }
 0x540   : > { %s10778_s28 = smov %s10780_s9  ;;  %19 = sbr.rel (!%p17_p5) target bundleno = 4 (0x4), region = 91 }
 0x547   :  { %5490 = vsyncpa [#allocation4], 1 }
 0x548   :  { %5492 = vsyncpa [#allocation4 + $0x1], 1 }

</bundles_post_ra>
